<compile_context>
chip_gen: v7x
topology: tpu7x:2x2x1
jax: 0.10.0
libtpu: 0.0.40
codegen_flags: <defaults>
</compile_context>

<pallas_src>
import functools

import jax
import jax.numpy as jnp
import numpy as np
from jax.experimental import pallas as pl
from jax.experimental.pallas import tpu as pltpu


# ----------------------------------------------------------------------------
# Fused Pallas kernel: 2-layer LSTM (eval-mode dropout) + Linear head
# ----------------------------------------------------------------------------
def _char_rnn_fused_kernel(x_ref, h0_ref, c0_ref,
                           wih0_ref, whh0_ref, b0_ref,
                           w1_ref, b1_ref,
                           wfc_ref, bfc_ref,
                           logits_ref, h_out_ref, c_out_ref,
                           ys_ref):
    """Single-invocation kernel; all operands fully resident in VMEM.

    x_ref    : (T*B, I)      time-major flattened one-hot input (row = t*B + b)
    h0/c0    : (2, B, H)     initial hidden / cell state
    wih0     : (I,  4*Hp)    layer-0 input weights, gate order i|f|o|g, 128-lane slots
    whh0     : (Hp, 4*Hp)    layer-0 hidden weights, rows >= H zeroed
    w1       : (2*Hp, 4*Hp)  layer-1 [w_ih; w_hh] stacked (fused input+hidden matmul)
    b0/b1    : (1,  4*Hp)    b_ih + b_hh, gate-packed
    wfc      : (Hp, Lp)      fc.weight.T, rows >= H and cols >= L zeroed
    bfc      : (1,  Lp)
    logits   : (T*B, Lp)     time-major logits (reordered/un-padded in wrapper)
    h_out/c_out : (2, B, Hp) final states (lane-dense; sliced to H in wrapper)
    ys_ref   : (T*B, Hp)     VMEM scratch holding layer-1 outputs, time-major
    """
    TB = x_ref.shape[0]
    B = h0_ref.shape[1]
    H = h0_ref.shape[2]
    Hp = whh0_ref.shape[0]
    T = TB // B

    def pad_state(s):  # (B, H) -> (B, Hp); padded lanes MUST start at zero.
        s = s.astype(jnp.float32)
        if Hp == H:
            return s
        return jnp.concatenate([s, jnp.zeros((B, Hp - H), jnp.float32)], axis=1)

    h0 = pad_state(h0_ref[0])
    c0 = pad_state(c0_ref[0])
    h1 = pad_state(h0_ref[1])
    c1 = pad_state(c0_ref[1])

    # Layer-0 input projection (+ bias) hoisted out of the recurrence:
    # one time-major (T*B, I) x (I, 4*Hp) matmul covering all timesteps.
    gx0 = jnp.dot(x_ref[...].astype(jnp.float32), wih0_ref[...],
                  preferred_element_type=jnp.float32) + b0_ref[...]     # (T*B, 4*Hp)

    def lstm_cell(gates, c_prev):
        # gate order i|f|o|g: one sigmoid over 3 contiguous slots, one tanh.
        sig = jax.nn.sigmoid(gates[:, :3 * Hp])
        i_g = sig[:, 0 * Hp:1 * Hp]
        f_g = sig[:, 1 * Hp:2 * Hp]
        o_g = sig[:, 2 * Hp:3 * Hp]
        g_g = jnp.tanh(gates[:, 3 * Hp:4 * Hp])
        c_new = f_g * c_prev + i_g * g_g
        h_new = o_g * jnp.tanh(c_new)
        return h_new, c_new

    # T is small & static: fully-unrolled Python loop keeps every index static
    # and gives the scheduler full visibility of the recurrence.
    for t in range(T):
        # layer 0: precomputed input projection + recurrent matmul
        gates0 = gx0[t * B:(t + 1) * B, :] + jnp.dot(
            h0, whh0_ref[...], preferred_element_type=jnp.float32)
        h0, c0 = lstm_cell(gates0, c0)

        # layer 1: fused input+hidden matmul ([h0 | h1] @ [w_ih1; w_hh1]).
        # Inter-layer dropout is identity in eval mode.
        hh = jnp.concatenate([h0, h1], axis=1)                           # (B, 2*Hp)
        gates1 = jnp.dot(hh, w1_ref[...],
                         preferred_element_type=jnp.float32) + b1_ref[...]
        h1, c1 = lstm_cell(gates1, c1)

        ys_ref[t * B:(t + 1) * B, :] = h1          # time-major per-step store

    # Final hidden / cell state, written once (lane-dense Hp; sliced outside).
    h_out_ref[0] = h0.astype(h_out_ref.dtype)
    h_out_ref[1] = h1.astype(h_out_ref.dtype)
    c_out_ref[0] = c0.astype(c_out_ref.dtype)
    c_out_ref[1] = c1.astype(c_out_ref.dtype)

    # dropout (eval -> identity) then fc over all T*B rows in one matmul.
    logits_ref[...] = (jnp.dot(ys_ref[...], wfc_ref[...],
                               preferred_element_type=jnp.float32)
                       + bfc_ref[...]).astype(logits_ref.dtype)


# ----------------------------------------------------------------------------
# Parameter prep (done ONCE, outside the per-call jitted path)
# ----------------------------------------------------------------------------
def prepare_params(params, n_hidden, n_labels):
    """Transpose + gate-pack weights into 128-lane gate slots (order i|f|o|g)."""
    H = n_hidden
    Hp = ((H + 127) // 128) * 128
    L = n_labels
    Lp = ((L + 127) // 128) * 128

    # Target slot -> source PyTorch gate index (PyTorch order is i, f, g, o).
    GATE_ORDER = (0, 1, 3, 2)   # slots: i | f | o | g

    def pack_cols(w_t):            # (in, 4H) -> (in, 4Hp)
        out = jnp.zeros((w_t.shape[0], 4 * Hp), jnp.float32)
        for slot, g in enumerate(GATE_ORDER):
            out = out.at[:, slot * Hp:slot * Hp + H].set(w_t[:, g * H:(g + 1) * H])
        return out

    def pack_hidden(w):            # torch (4H, H) -> (Hp, 4Hp), rows >= H zero
        w_t = jnp.transpose(w)     # (H, 4H)
        out = jnp.zeros((Hp, 4 * Hp), jnp.float32)
        for slot, g in enumerate(GATE_ORDER):
            out = out.at[:H, slot * Hp:slot * Hp + H].set(w_t[:, g * H:(g + 1) * H])
        return out

    def pack_bias(b):              # (4H,) -> (1, 4Hp)
        out = jnp.zeros((1, 4 * Hp), jnp.float32)
        for slot, g in enumerate(GATE_ORDER):
            out = out.at[0, slot * Hp:slot * Hp + H].set(b[g * H:(g + 1) * H])
        return out

    # Layer-1 input + hidden weights stacked vertically -> one fused matmul.
    w1 = jnp.concatenate([pack_hidden(params["w_ih_l1"]),      # input size == H
                          pack_hidden(params["w_hh_l1"])], axis=0)   # (2Hp, 4Hp)

    prepped = {
        "wih0": pack_cols(jnp.transpose(params["w_ih_l0"])),          # (I, 4Hp)
        "whh0": pack_hidden(params["w_hh_l0"]),                       # (Hp, 4Hp)
        "b0": pack_bias(params["b_ih_l0"] + params["b_hh_l0"]),
        "w1": w1,                                                     # (2Hp, 4Hp)
        "b1": pack_bias(params["b_ih_l1"] + params["b_hh_l1"]),
        "wfc": jnp.zeros((Hp, Lp), jnp.float32).at[:H, :L].set(
            jnp.transpose(params["fc_w"])),                           # (Hp, Lp)
        "bfc": jnp.zeros((1, Lp), jnp.float32).at[0, :L].set(params["fc_b"]),
    }
    return prepped


# ----------------------------------------------------------------------------
# Forward wrapper (jitted; transposes/reshapes live here, off the kernel path)
# ----------------------------------------------------------------------------
@functools.partial(jax.jit)
def char_rnn_forward(x, h0, c0, prepped):
    """x: (B, T, n_labels), h0/c0: (2, B, H). Returns (logits (B*T, L), (h, c))."""
    B, T, L = x.shape                       # input one-hot width == n_labels
    n_layers, _, H = h0.shape
    assert n_layers == 2, "fused kernel implements the module default n_layers=2"
    Hp = prepped["whh0"].shape[0]
    Lp = prepped["wfc"].shape[1]

    # Time-major flatten of the input: row = t*B + b (XLA op, not in the kernel).
    x_tm = jnp.transpose(x, (1, 0, 2)).reshape(T * B, L)

    cost = pl.CostEstimate(
        flops=2 * T * B * (L * 4 * Hp + Hp * 4 * Hp + 2 * Hp * 4 * Hp + Hp * Lp),
        transcendentals=T * B * 2 * 5 * Hp,
        bytes_accessed=4 * (T * B * (L + Lp + Hp) + 4 * n_layers * B * Hp
                            + (L + 3 * Hp) * 4 * Hp + 8 * Hp
                            + Hp * Lp + Lp),
    )

    vmem = pl.BlockSpec(memory_space=pltpu.MemorySpace.VMEM)
    logits_tm, h_out_p, c_out_p = pl.pallas_call(
        _char_rnn_fused_kernel,
        out_shape=(jax.ShapeDtypeStruct((T * B, Lp), jnp.float32),
                   jax.ShapeDtypeStruct((n_layers, B, Hp), jnp.float32),
                   jax.ShapeDtypeStruct((n_layers, B, Hp), jnp.float32)),
        in_specs=[vmem] * 10,
        out_specs=(vmem, vmem, vmem),
        scratch_shapes=[pltpu.VMEM((T * B, Hp), jnp.float32)],
        cost_estimate=cost,
    )(x_tm, h0, c0,
      prepped["wih0"], prepped["whh0"], prepped["b0"],
      prepped["w1"], prepped["b1"],
      prepped["wfc"], prepped["bfc"])

    # Time-major -> PyTorch batch-first row order (row = b*T + t), un-pad lanes.
    logits = jnp.transpose(logits_tm.reshape(T, B, Lp),
                           (1, 0, 2)).reshape(B * T, Lp)[:, :L]
    h_out = h_out_p[:, :, :H]
    c_out = c_out_p[:, :, :H]
    return logits, (h_out, c_out)


# ----------------------------------------------------------------------------
# Pure-JAX reference (for correctness check)
# ----------------------------------------------------------------------------
def ref_forward(x, h0, c0, params):
    B, T, _ = x.shape
    n_layers, _, H = h0.shape
    layer_in = x
    hs, cs = [], []
    for layer in range(n_layers):
        w_ih = params[f"w_ih_l{layer}"]
        w_hh = params[f"w_hh_l{layer}"]
        b = params[f"b_ih_l{layer}"] + params[f"b_hh_l{layer}"]
        h, c = h0[layer], c0[layer]
        outs = []
        for t in range(T):
            g = layer_in[:, t, :] @ w_ih.T + h @ w_hh.T + b
            i = jax.nn.sigmoid(g[:, 0 * H:1 * H])
            f = jax.nn.sigmoid(g[:, 1 * H:2 * H])
            gg = jnp.tanh(g[:, 2 * H:3 * H])
            o = jax.nn.sigmoid(g[:, 3 * H:4 * H])
            c = f * c + i * gg
            h = o * jnp.tanh(c)
            outs.append(h)
        layer_in = jnp.stack(outs, axis=1)
        hs.append(h)
        cs.append(c)
    flat = layer_in.reshape(-1, H)
    logits = flat @ params["fc_w"].T + params["fc_b"]
    return logits, (jnp.stack(hs, 0), jnp.stack(cs, 0))


# ----------------------------------------------------------------------------
# Main
# ----------------------------------------------------------------------------
if __name__ == "__main__":
    tokens = list("abcdefghijklmnop")             # 16 characters
    n_labels = len(tokens)                        # 16
    n_hidden = 32
    n_layers = 2
    B, T = 2, 8

    key = jax.random.PRNGKey(0)
    keys = jax.random.split(key, 16)
    k_iter = iter(keys)

    # Deterministic params (PyTorch-style uniform(-1/sqrt(H), 1/sqrt(H)) for the
    # LSTM; fc.weight ~ uniform(-1,1), fc.bias = 0 as in initweight()).
    stdv = 1.0 / np.sqrt(n_hidden)
    params = {}
    for layer in range(n_layers):
        in_sz = n_labels if layer == 0 else n_hidden
        params[f"w_ih_l{layer}"] = jax.random.uniform(
            next(k_iter), (4 * n_hidden, in_sz), jnp.float32, -stdv, stdv)
        params[f"w_hh_l{layer}"] = jax.random.uniform(
            next(k_iter), (4 * n_hidden, n_hidden), jnp.float32, -stdv, stdv)
        params[f"b_ih_l{layer}"] = jax.random.uniform(
            next(k_iter), (4 * n_hidden,), jnp.float32, -stdv, stdv)
        params[f"b_hh_l{layer}"] = jax.random.uniform(
            next(k_iter), (4 * n_hidden,), jnp.float32, -stdv, stdv)
    params["fc_w"] = jax.random.uniform(
        next(k_iter), (n_labels, n_hidden), jnp.float32, -1.0, 1.0)
    params["fc_b"] = jnp.zeros((n_labels,), jnp.float32)

    # One-time weight packing (outside the jitted forward).
    prepped = jax.tree_util.tree_map(jnp.asarray,
                                     prepare_params(params, n_hidden, n_labels))

    # One-hot float input (B, T, n_labels), zero initial (h, c) as in init_hidden.
    idx = jax.random.randint(next(k_iter), (B, T), 0, n_labels)
    x = jax.nn.one_hot(idx, n_labels, dtype=jnp.float32)
    h0 = jnp.zeros((n_layers, B, n_hidden), jnp.float32)
    c0 = jnp.zeros((n_layers, B, n_hidden), jnp.float32)

    logits, (h_out, c_out) = char_rnn_forward(x, h0, c0, prepped)
    jax.block_until_ready((logits, h_out, c_out))

    # Correctness check against pure-JAX reference.
    ref_logits, (ref_h, ref_c) = ref_forward(x, h0, c0, params)
    np.testing.assert_allclose(np.asarray(logits), np.asarray(ref_logits),
                               rtol=1e-5, atol=1e-5)
    np.testing.assert_allclose(np.asarray(h_out), np.asarray(ref_h),
                               rtol=1e-5, atol=1e-5)
    np.testing.assert_allclose(np.asarray(c_out), np.asarray(ref_c),
                               rtol=1e-5, atol=1e-5)

    print("KERNEL_OK")
</pallas_src>

<mosaic_0001>
module attributes {stable_mosaic.version = 11 : i64} {
  func.func @_char_rnn_fused_kernel(%arg0: memref<16x16xf32, #tpu.memory_space<vmem>>, %arg1: memref<2x2x32xf32, #tpu.memory_space<vmem>>, %arg2: memref<2x2x32xf32, #tpu.memory_space<vmem>>, %arg3: memref<16x512xf32, #tpu.memory_space<vmem>>, %arg4: memref<128x512xf32, #tpu.memory_space<vmem>>, %arg5: memref<1x512xf32, #tpu.memory_space<vmem>>, %arg6: memref<256x512xf32, #tpu.memory_space<vmem>>, %arg7: memref<1x512xf32, #tpu.memory_space<vmem>>, %arg8: memref<128x128xf32, #tpu.memory_space<vmem>>, %arg9: memref<1x128xf32, #tpu.memory_space<vmem>>, %arg10: memref<16x128xf32, #tpu.memory_space<vmem>>, %arg11: memref<2x2x128xf32, #tpu.memory_space<vmem>>, %arg12: memref<2x2x128xf32, #tpu.memory_space<vmem>>, %arg13: memref<16x128xf32, #tpu.memory_space<vmem>>) attributes {dimension_semantics = [], scalar_prefetch = 0 : i64, scratch_operands = 1 : i64, tpu.core_type = #tpu.core_type<tc>} {
    %c0 = arith.constant 0 : index
    %c0_0 = arith.constant 0 : index
    %c0_1 = arith.constant 0 : index
    %0 = vector.load %arg1[%c0, %c0_0, %c0_1] : memref<2x2x32xf32, #tpu.memory_space<vmem>>, vector<1x2x32xf32>
    %1 = vector.shape_cast %0 : vector<1x2x32xf32> to vector<2x32xf32>
    %cst = arith.constant 0.000000e+00 : f32
    %2 = vector.broadcast %cst : f32 to vector<2x96xf32>
    %3 = tpu.concatenate %1, %2 in 1 : vector<2x32xf32>, vector<2x96xf32> -> vector<2x128xf32>
    %c0_2 = arith.constant 0 : index
    %c0_3 = arith.constant 0 : index
    %c0_4 = arith.constant 0 : index
    %4 = vector.load %arg2[%c0_2, %c0_3, %c0_4] : memref<2x2x32xf32, #tpu.memory_space<vmem>>, vector<1x2x32xf32>
    %5 = vector.shape_cast %4 : vector<1x2x32xf32> to vector<2x32xf32>
    %cst_5 = arith.constant 0.000000e+00 : f32
    %6 = vector.broadcast %cst_5 : f32 to vector<2x96xf32>
    %7 = tpu.concatenate %5, %6 in 1 : vector<2x32xf32>, vector<2x96xf32> -> vector<2x128xf32>
    %c1 = arith.constant 1 : index
    %c0_6 = arith.constant 0 : index
    %c0_7 = arith.constant 0 : index
    %8 = vector.load %arg1[%c1, %c0_6, %c0_7] : memref<2x2x32xf32, #tpu.memory_space<vmem>>, vector<1x2x32xf32>
    %9 = vector.shape_cast %8 : vector<1x2x32xf32> to vector<2x32xf32>
    %cst_8 = arith.constant 0.000000e+00 : f32
    %10 = vector.broadcast %cst_8 : f32 to vector<2x96xf32>
    %11 = tpu.concatenate %9, %10 in 1 : vector<2x32xf32>, vector<2x96xf32> -> vector<2x128xf32>
    %c1_9 = arith.constant 1 : index
    %c0_10 = arith.constant 0 : index
    %c0_11 = arith.constant 0 : index
    %12 = vector.load %arg2[%c1_9, %c0_10, %c0_11] : memref<2x2x32xf32, #tpu.memory_space<vmem>>, vector<1x2x32xf32>
    %13 = vector.shape_cast %12 : vector<1x2x32xf32> to vector<2x32xf32>
    %cst_12 = arith.constant 0.000000e+00 : f32
    %14 = vector.broadcast %cst_12 : f32 to vector<2x96xf32>
    %15 = tpu.concatenate %13, %14 in 1 : vector<2x32xf32>, vector<2x96xf32> -> vector<2x128xf32>
    %c0_13 = arith.constant 0 : index
    %c0_14 = arith.constant 0 : index
    %16 = vector.load %arg0[%c0_13, %c0_14] : memref<16x16xf32, #tpu.memory_space<vmem>>, vector<16x16xf32>
    %c0_15 = arith.constant 0 : index
    %c0_16 = arith.constant 0 : index
    %17 = vector.load %arg3[%c0_15, %c0_16] : memref<16x512xf32, #tpu.memory_space<vmem>>, vector<16x512xf32>
    %cst_17 = arith.constant dense<0.000000e+00> : vector<16x512xf32>
    %18 = tpu.matmul %16, %17, %cst_17 {dimension_numbers = #tpu.dot_dimension_numbers<[1], [0], [0], [1], [0, 0, 1, 1], [], []>} : vector<16x16xf32>, vector<16x512xf32>, vector<16x512xf32> -> vector<16x512xf32>
    %c0_18 = arith.constant 0 : index
    %c0_19 = arith.constant 0 : index
    %19 = vector.load %arg5[%c0_18, %c0_19] : memref<1x512xf32, #tpu.memory_space<vmem>>, vector<1x512xf32>
    %20 = vector.broadcast %19 : vector<1x512xf32> to vector<16x512xf32>
    %21 = arith.addf %18, %20 : vector<16x512xf32>
    %22 = vector.extract_strided_slice %21 {offsets = [0, 0], sizes = [2, 512], strides = [1, 1]} : vector<16x512xf32> to vector<2x512xf32>
    %c0_20 = arith.constant 0 : index
    %c0_21 = arith.constant 0 : index
    %23 = vector.load %arg4[%c0_20, %c0_21] : memref<128x512xf32, #tpu.memory_space<vmem>>, vector<128x512xf32>
    %cst_22 = arith.constant dense<0.000000e+00> : vector<2x512xf32>
    %24 = tpu.matmul %3, %23, %cst_22 {dimension_numbers = #tpu.dot_dimension_numbers<[1], [0], [0], [1], [0, 0, 1, 1], [], []>} : vector<2x128xf32>, vector<128x512xf32>, vector<2x512xf32> -> vector<2x512xf32>
    %25 = arith.addf %22, %24 : vector<2x512xf32>
    %26 = vector.extract_strided_slice %25 {offsets = [0, 0], sizes = [2, 384], strides = [1, 1]} : vector<2x512xf32> to vector<2x384xf32>
    %27 = arith.negf %26 : vector<2x384xf32>
    %28 = math.exp %27 : vector<2x384xf32>
    %cst_23 = arith.constant 1.000000e+00 : f32
    %29 = vector.broadcast %cst_23 : f32 to vector<2x384xf32>
    %30 = arith.addf %29, %28 : vector<2x384xf32>
    %31 = arith.divf %29, %30 : vector<2x384xf32>
    %32 = vector.extract_strided_slice %31 {offsets = [0, 0], sizes = [2, 128], strides = [1, 1]} : vector<2x384xf32> to vector<2x128xf32>
    %33 = vector.extract_strided_slice %31 {offsets = [0, 128], sizes = [2, 128], strides = [1, 1]} : vector<2x384xf32> to vector<2x128xf32>
    %34 = vector.extract_strided_slice %31 {offsets = [0, 256], sizes = [2, 128], strides = [1, 1]} : vector<2x384xf32> to vector<2x128xf32>
    %35 = vector.extract_strided_slice %25 {offsets = [0, 384], sizes = [2, 128], strides = [1, 1]} : vector<2x512xf32> to vector<2x128xf32>
    %36 = math.tanh %35 : vector<2x128xf32>
    %37 = arith.mulf %33, %7 : vector<2x128xf32>
    %38 = arith.mulf %32, %36 : vector<2x128xf32>
    %39 = arith.addf %37, %38 : vector<2x128xf32>
    %40 = math.tanh %39 : vector<2x128xf32>
    %41 = arith.mulf %34, %40 : vector<2x128xf32>
    %42 = tpu.concatenate %41, %11 in 1 : vector<2x128xf32>, vector<2x128xf32> -> vector<2x256xf32>
    %c0_24 = arith.constant 0 : index
    %c0_25 = arith.constant 0 : index
    %43 = vector.load %arg6[%c0_24, %c0_25] : memref<256x512xf32, #tpu.memory_space<vmem>>, vector<256x512xf32>
    %cst_26 = arith.constant dense<0.000000e+00> : vector<2x512xf32>
    %44 = tpu.matmul %42, %43, %cst_26 {dimension_numbers = #tpu.dot_dimension_numbers<[1], [0], [0], [1], [0, 0, 1, 1], [], []>} : vector<2x256xf32>, vector<256x512xf32>, vector<2x512xf32> -> vector<2x512xf32>
    %c0_27 = arith.constant 0 : index
    %c0_28 = arith.constant 0 : index
    %45 = vector.load %arg7[%c0_27, %c0_28] : memref<1x512xf32, #tpu.memory_space<vmem>>, vector<1x512xf32>
    %46 = vector.broadcast %45 : vector<1x512xf32> to vector<2x512xf32>
    %47 = arith.addf %44, %46 : vector<2x512xf32>
    %48 = vector.extract_strided_slice %47 {offsets = [0, 0], sizes = [2, 384], strides = [1, 1]} : vector<2x512xf32> to vector<2x384xf32>
    %49 = arith.negf %48 : vector<2x384xf32>
    %50 = math.exp %49 : vector<2x384xf32>
    %cst_29 = arith.constant 1.000000e+00 : f32
    %51 = vector.broadcast %cst_29 : f32 to vector<2x384xf32>
    %52 = arith.addf %51, %50 : vector<2x384xf32>
    %53 = arith.divf %51, %52 : vector<2x384xf32>
    %54 = vector.extract_strided_slice %53 {offsets = [0, 0], sizes = [2, 128], strides = [1, 1]} : vector<2x384xf32> to vector<2x128xf32>
    %55 = vector.extract_strided_slice %53 {offsets = [0, 128], sizes = [2, 128], strides = [1, 1]} : vector<2x384xf32> to vector<2x128xf32>
    %56 = vector.extract_strided_slice %53 {offsets = [0, 256], sizes = [2, 128], strides = [1, 1]} : vector<2x384xf32> to vector<2x128xf32>
    %57 = vector.extract_strided_slice %47 {offsets = [0, 384], sizes = [2, 128], strides = [1, 1]} : vector<2x512xf32> to vector<2x128xf32>
    %58 = math.tanh %57 : vector<2x128xf32>
    %59 = arith.mulf %55, %15 : vector<2x128xf32>
    %60 = arith.mulf %54, %58 : vector<2x128xf32>
    %61 = arith.addf %59, %60 : vector<2x128xf32>
    %62 = math.tanh %61 : vector<2x128xf32>
    %63 = arith.mulf %56, %62 : vector<2x128xf32>
    %c0_30 = arith.constant 0 : index
    %c0_31 = arith.constant 0 : index
    %64 = vector.load %arg13[%c0_30, %c0_31] : memref<16x128xf32, #tpu.memory_space<vmem>>, vector<2x128xf32>
    tpu.vector_store %arg13[%c0_30, %c0_31], %63 {strides = array<i32>} : memref<16x128xf32, #tpu.memory_space<vmem>>, vector<2x128xf32>,
    %65 = vector.extract_strided_slice %21 {offsets = [2, 0], sizes = [2, 512], strides = [1, 1]} : vector<16x512xf32> to vector<2x512xf32>
    %c0_32 = arith.constant 0 : index
    %c0_33 = arith.constant 0 : index
    %66 = vector.load %arg4[%c0_32, %c0_33] : memref<128x512xf32, #tpu.memory_space<vmem>>, vector<128x512xf32>
    %cst_34 = arith.constant dense<0.000000e+00> : vector<2x512xf32>
    %67 = tpu.matmul %41, %66, %cst_34 {dimension_numbers = #tpu.dot_dimension_numbers<[1], [0], [0], [1], [0, 0, 1, 1], [], []>} : vector<2x128xf32>, vector<128x512xf32>, vector<2x512xf32> -> vector<2x512xf32>
    %68 = arith.addf %65, %67 : vector<2x512xf32>
    %69 = vector.extract_strided_slice %68 {offsets = [0, 0], sizes = [2, 384], strides = [1, 1]} : vector<2x512xf32> to vector<2x384xf32>
    %70 = arith.negf %69 : vector<2x384xf32>
    %71 = math.exp %70 : vector<2x384xf32>
    %cst_35 = arith.constant 1.000000e+00 : f32
    %72 = vector.broadcast %cst_35 : f32 to vector<2x384xf32>
    %73 = arith.addf %72, %71 : vector<2x384xf32>
    %74 = arith.divf %72, %73 : vector<2x384xf32>
    %75 = vector.extract_strided_slice %74 {offsets = [0, 0], sizes = [2, 128], strides = [1, 1]} : vector<2x384xf32> to vector<2x128xf32>
    %76 = vector.extract_strided_slice %74 {offsets = [0, 128], sizes = [2, 128], strides = [1, 1]} : vector<2x384xf32> to vector<2x128xf32>
    %77 = vector.extract_strided_slice %74 {offsets = [0, 256], sizes = [2, 128], strides = [1, 1]} : vector<2x384xf32> to vector<2x128xf32>
    %78 = vector.extract_strided_slice %68 {offsets = [0, 384], sizes = [2, 128], strides = [1, 1]} : vector<2x512xf32> to vector<2x128xf32>
    %79 = math.tanh %78 : vector<2x128xf32>
    %80 = arith.mulf %76, %39 : vector<2x128xf32>
    %81 = arith.mulf %75, %79 : vector<2x128xf32>
    %82 = arith.addf %80, %81 : vector<2x128xf32>
    %83 = math.tanh %82 : vector<2x128xf32>
    %84 = arith.mulf %77, %83 : vector<2x128xf32>
    %85 = tpu.concatenate %84, %63 in 1 : vector<2x128xf32>, vector<2x128xf32> -> vector<2x256xf32>
    %c0_36 = arith.constant 0 : index
    %c0_37 = arith.constant 0 : index
    %86 = vector.load %arg6[%c0_36, %c0_37] : memref<256x512xf32, #tpu.memory_space<vmem>>, vector<256x512xf32>
    %cst_38 = arith.constant dense<0.000000e+00> : vector<2x512xf32>
    %87 = tpu.matmul %85, %86, %cst_38 {dimension_numbers = #tpu.dot_dimension_numbers<[1], [0], [0], [1], [0, 0, 1, 1], [], []>} : vector<2x256xf32>, vector<256x512xf32>, vector<2x512xf32> -> vector<2x512xf32>
    %c0_39 = arith.constant 0 : index
    %c0_40 = arith.constant 0 : index
    %88 = vector.load %arg7[%c0_39, %c0_40] : memref<1x512xf32, #tpu.memory_space<vmem>>, vector<1x512xf32>
    %89 = vector.broadcast %88 : vector<1x512xf32> to vector<2x512xf32>
    %90 = arith.addf %87, %89 : vector<2x512xf32>
    %91 = vector.extract_strided_slice %90 {offsets = [0, 0], sizes = [2, 384], strides = [1, 1]} : vector<2x512xf32> to vector<2x384xf32>
    %92 = arith.negf %91 : vector<2x384xf32>
    %93 = math.exp %92 : vector<2x384xf32>
    %cst_41 = arith.constant 1.000000e+00 : f32
    %94 = vector.broadcast %cst_41 : f32 to vector<2x384xf32>
    %95 = arith.addf %94, %93 : vector<2x384xf32>
    %96 = arith.divf %94, %95 : vector<2x384xf32>
    %97 = vector.extract_strided_slice %96 {offsets = [0, 0], sizes = [2, 128], strides = [1, 1]} : vector<2x384xf32> to vector<2x128xf32>
    %98 = vector.extract_strided_slice %96 {offsets = [0, 128], sizes = [2, 128], strides = [1, 1]} : vector<2x384xf32> to vector<2x128xf32>
    %99 = vector.extract_strided_slice %96 {offsets = [0, 256], sizes = [2, 128], strides = [1, 1]} : vector<2x384xf32> to vector<2x128xf32>
    %100 = vector.extract_strided_slice %90 {offsets = [0, 384], sizes = [2, 128], strides = [1, 1]} : vector<2x512xf32> to vector<2x128xf32>
    %101 = math.tanh %100 : vector<2x128xf32>
    %102 = arith.mulf %98, %61 : vector<2x128xf32>
    %103 = arith.mulf %97, %101 : vector<2x128xf32>
    %104 = arith.addf %102, %103 : vector<2x128xf32>
    %105 = math.tanh %104 : vector<2x128xf32>
    %106 = arith.mulf %99, %105 : vector<2x128xf32>
    %c2 = arith.constant 2 : index
    %c0_42 = arith.constant 0 : index
    %107 = vector.load %arg13[%c2, %c0_42] : memref<16x128xf32, #tpu.memory_space<vmem>>, vector<2x128xf32>
    tpu.vector_store %arg13[%c2, %c0_42], %106 {strides = array<i32>} : memref<16x128xf32, #tpu.memory_space<vmem>>, vector<2x128xf32>,
    %108 = vector.extract_strided_slice %21 {offsets = [4, 0], sizes = [2, 512], strides = [1, 1]} : vector<16x512xf32> to vector<2x512xf32>
    %c0_43 = arith.constant 0 : index
    %c0_44 = arith.constant 0 : index
    %109 = vector.load %arg4[%c0_43, %c0_44] : memref<128x512xf32, #tpu.memory_space<vmem>>, vector<128x512xf32>
    %cst_45 = arith.constant dense<0.000000e+00> : vector<2x512xf32>
    %110 = tpu.matmul %84, %109, %cst_45 {dimension_numbers = #tpu.dot_dimension_numbers<[1], [0], [0], [1], [0, 0, 1, 1], [], []>} : vector<2x128xf32>, vector<128x512xf32>, vector<2x512xf32> -> vector<2x512xf32>
    %111 = arith.addf %108, %110 : vector<2x512xf32>
    %112 = vector.extract_strided_slice %111 {offsets = [0, 0], sizes = [2, 384], strides = [1, 1]} : vector<2x512xf32> to vector<2x384xf32>
    %113 = arith.negf %112 : vector<2x384xf32>
    %114 = math.exp %113 : vector<2x384xf32>
    %cst_46 = arith.constant 1.000000e+00 : f32
    %115 = vector.broadcast %cst_46 : f32 to vector<2x384xf32>
    %116 = arith.addf %115, %114 : vector<2x384xf32>
    %117 = arith.divf %115, %116 : vector<2x384xf32>
    %118 = vector.extract_strided_slice %117 {offsets = [0, 0], sizes = [2, 128], strides = [1, 1]} : vector<2x384xf32> to vector<2x128xf32>
    %119 = vector.extract_strided_slice %117 {offsets = [0, 128], sizes = [2, 128], strides = [1, 1]} : vector<2x384xf32> to vector<2x128xf32>
    %120 = vector.extract_strided_slice %117 {offsets = [0, 256], sizes = [2, 128], strides = [1, 1]} : vector<2x384xf32> to vector<2x128xf32>
    %121 = vector.extract_strided_slice %111 {offsets = [0, 384], sizes = [2, 128], strides = [1, 1]} : vector<2x512xf32> to vector<2x128xf32>
    %122 = math.tanh %121 : vector<2x128xf32>
    %123 = arith.mulf %119, %82 : vector<2x128xf32>
    %124 = arith.mulf %118, %122 : vector<2x128xf32>
    %125 = arith.addf %123, %124 : vector<2x128xf32>
    %126 = math.tanh %125 : vector<2x128xf32>
    %127 = arith.mulf %120, %126 : vector<2x128xf32>
    %128 = tpu.concatenate %127, %106 in 1 : vector<2x128xf32>, vector<2x128xf32> -> vector<2x256xf32>
    %c0_47 = arith.constant 0 : index
    %c0_48 = arith.constant 0 : index
    %129 = vector.load %arg6[%c0_47, %c0_48] : memref<256x512xf32, #tpu.memory_space<vmem>>, vector<256x512xf32>
    %cst_49 = arith.constant dense<0.000000e+00> : vector<2x512xf32>
    %130 = tpu.matmul %128, %129, %cst_49 {dimension_numbers = #tpu.dot_dimension_numbers<[1], [0], [0], [1], [0, 0, 1, 1], [], []>} : vector<2x256xf32>, vector<256x512xf32>, vector<2x512xf32> -> vector<2x512xf32>
    %c0_50 = arith.constant 0 : index
    %c0_51 = arith.constant 0 : index
    %131 = vector.load %arg7[%c0_50, %c0_51] : memref<1x512xf32, #tpu.memory_space<vmem>>, vector<1x512xf32>
    %132 = vector.broadcast %131 : vector<1x512xf32> to vector<2x512xf32>
    %133 = arith.addf %130, %132 : vector<2x512xf32>
    %134 = vector.extract_strided_slice %133 {offsets = [0, 0], sizes = [2, 384], strides = [1, 1]} : vector<2x512xf32> to vector<2x384xf32>
    %135 = arith.negf %134 : vector<2x384xf32>
    %136 = math.exp %135 : vector<2x384xf32>
    %cst_52 = arith.constant 1.000000e+00 : f32
    %137 = vector.broadcast %cst_52 : f32 to vector<2x384xf32>
    %138 = arith.addf %137, %136 : vector<2x384xf32>
    %139 = arith.divf %137, %138 : vector<2x384xf32>
    %140 = vector.extract_strided_slice %139 {offsets = [0, 0], sizes = [2, 128], strides = [1, 1]} : vector<2x384xf32> to vector<2x128xf32>
    %141 = vector.extract_strided_slice %139 {offsets = [0, 128], sizes = [2, 128], strides = [1, 1]} : vector<2x384xf32> to vector<2x128xf32>
    %142 = vector.extract_strided_slice %139 {offsets = [0, 256], sizes = [2, 128], strides = [1, 1]} : vector<2x384xf32> to vector<2x128xf32>
    %143 = vector.extract_strided_slice %133 {offsets = [0, 384], sizes = [2, 128], strides = [1, 1]} : vector<2x512xf32> to vector<2x128xf32>
    %144 = math.tanh %143 : vector<2x128xf32>
    %145 = arith.mulf %141, %104 : vector<2x128xf32>
    %146 = arith.mulf %140, %144 : vector<2x128xf32>
    %147 = arith.addf %145, %146 : vector<2x128xf32>
    %148 = math.tanh %147 : vector<2x128xf32>
    %149 = arith.mulf %142, %148 : vector<2x128xf32>
    %c4 = arith.constant 4 : index
    %c0_53 = arith.constant 0 : index
    %150 = vector.load %arg13[%c4, %c0_53] : memref<16x128xf32, #tpu.memory_space<vmem>>, vector<2x128xf32>
    tpu.vector_store %arg13[%c4, %c0_53], %149 {strides = array<i32>} : memref<16x128xf32, #tpu.memory_space<vmem>>, vector<2x128xf32>,
    %151 = vector.extract_strided_slice %21 {offsets = [6, 0], sizes = [2, 512], strides = [1, 1]} : vector<16x512xf32> to vector<2x512xf32>
    %c0_54 = arith.constant 0 : index
    %c0_55 = arith.constant 0 : index
    %152 = vector.load %arg4[%c0_54, %c0_55] : memref<128x512xf32, #tpu.memory_space<vmem>>, vector<128x512xf32>
    %cst_56 = arith.constant dense<0.000000e+00> : vector<2x512xf32>
    %153 = tpu.matmul %127, %152, %cst_56 {dimension_numbers = #tpu.dot_dimension_numbers<[1], [0], [0], [1], [0, 0, 1, 1], [], []>} : vector<2x128xf32>, vector<128x512xf32>, vector<2x512xf32> -> vector<2x512xf32>
    %154 = arith.addf %151, %153 : vector<2x512xf32>
    %155 = vector.extract_strided_slice %154 {offsets = [0, 0], sizes = [2, 384], strides = [1, 1]} : vector<2x512xf32> to vector<2x384xf32>
    %156 = arith.negf %155 : vector<2x384xf32>
    %157 = math.exp %156 : vector<2x384xf32>
    %cst_57 = arith.constant 1.000000e+00 : f32
    %158 = vector.broadcast %cst_57 : f32 to vector<2x384xf32>
    %159 = arith.addf %158, %157 : vector<2x384xf32>
    %160 = arith.divf %158, %159 : vector<2x384xf32>
    %161 = vector.extract_strided_slice %160 {offsets = [0, 0], sizes = [2, 128], strides = [1, 1]} : vector<2x384xf32> to vector<2x128xf32>
    %162 = vector.extract_strided_slice %160 {offsets = [0, 128], sizes = [2, 128], strides = [1, 1]} : vector<2x384xf32> to vector<2x128xf32>
    %163 = vector.extract_strided_slice %160 {offsets = [0, 256], sizes = [2, 128], strides = [1, 1]} : vector<2x384xf32> to vector<2x128xf32>
    %164 = vector.extract_strided_slice %154 {offsets = [0, 384], sizes = [2, 128], strides = [1, 1]} : vector<2x512xf32> to vector<2x128xf32>
    %165 = math.tanh %164 : vector<2x128xf32>
    %166 = arith.mulf %162, %125 : vector<2x128xf32>
    %167 = arith.mulf %161, %165 : vector<2x128xf32>
    %168 = arith.addf %166, %167 : vector<2x128xf32>
    %169 = math.tanh %168 : vector<2x128xf32>
    %170 = arith.mulf %163, %169 : vector<2x128xf32>
    %171 = tpu.concatenate %170, %149 in 1 : vector<2x128xf32>, vector<2x128xf32> -> vector<2x256xf32>
    %c0_58 = arith.constant 0 : index
    %c0_59 = arith.constant 0 : index
    %172 = vector.load %arg6[%c0_58, %c0_59] : memref<256x512xf32, #tpu.memory_space<vmem>>, vector<256x512xf32>
    %cst_60 = arith.constant dense<0.000000e+00> : vector<2x512xf32>
    %173 = tpu.matmul %171, %172, %cst_60 {dimension_numbers = #tpu.dot_dimension_numbers<[1], [0], [0], [1], [0, 0, 1, 1], [], []>} : vector<2x256xf32>, vector<256x512xf32>, vector<2x512xf32> -> vector<2x512xf32>
    %c0_61 = arith.constant 0 : index
    %c0_62 = arith.constant 0 : index
    %174 = vector.load %arg7[%c0_61, %c0_62] : memref<1x512xf32, #tpu.memory_space<vmem>>, vector<1x512xf32>
    %175 = vector.broadcast %174 : vector<1x512xf32> to vector<2x512xf32>
    %176 = arith.addf %173, %175 : vector<2x512xf32>
    %177 = vector.extract_strided_slice %176 {offsets = [0, 0], sizes = [2, 384], strides = [1, 1]} : vector<2x512xf32> to vector<2x384xf32>
    %178 = arith.negf %177 : vector<2x384xf32>
    %179 = math.exp %178 : vector<2x384xf32>
    %cst_63 = arith.constant 1.000000e+00 : f32
    %180 = vector.broadcast %cst_63 : f32 to vector<2x384xf32>
    %181 = arith.addf %180, %179 : vector<2x384xf32>
    %182 = arith.divf %180, %181 : vector<2x384xf32>
    %183 = vector.extract_strided_slice %182 {offsets = [0, 0], sizes = [2, 128], strides = [1, 1]} : vector<2x384xf32> to vector<2x128xf32>
    %184 = vector.extract_strided_slice %182 {offsets = [0, 128], sizes = [2, 128], strides = [1, 1]} : vector<2x384xf32> to vector<2x128xf32>
    %185 = vector.extract_strided_slice %182 {offsets = [0, 256], sizes = [2, 128], strides = [1, 1]} : vector<2x384xf32> to vector<2x128xf32>
    %186 = vector.extract_strided_slice %176 {offsets = [0, 384], sizes = [2, 128], strides = [1, 1]} : vector<2x512xf32> to vector<2x128xf32>
    %187 = math.tanh %186 : vector<2x128xf32>
    %188 = arith.mulf %184, %147 : vector<2x128xf32>
    %189 = arith.mulf %183, %187 : vector<2x128xf32>
    %190 = arith.addf %188, %189 : vector<2x128xf32>
    %191 = math.tanh %190 : vector<2x128xf32>
    %192 = arith.mulf %185, %191 : vector<2x128xf32>
    %c6 = arith.constant 6 : index
    %c0_64 = arith.constant 0 : index
    %193 = vector.load %arg13[%c6, %c0_64] : memref<16x128xf32, #tpu.memory_space<vmem>>, vector<2x128xf32>
    tpu.vector_store %arg13[%c6, %c0_64], %192 {strides = array<i32>} : memref<16x128xf32, #tpu.memory_space<vmem>>, vector<2x128xf32>,
    %194 = vector.extract_strided_slice %21 {offsets = [8, 0], sizes = [2, 512], strides = [1, 1]} : vector<16x512xf32> to vector<2x512xf32>
    %c0_65 = arith.constant 0 : index
    %c0_66 = arith.constant 0 : index
    %195 = vector.load %arg4[%c0_65, %c0_66] : memref<128x512xf32, #tpu.memory_space<vmem>>, vector<128x512xf32>
    %cst_67 = arith.constant dense<0.000000e+00> : vector<2x512xf32>
    %196 = tpu.matmul %170, %195, %cst_67 {dimension_numbers = #tpu.dot_dimension_numbers<[1], [0], [0], [1], [0, 0, 1, 1], [], []>} : vector<2x128xf32>, vector<128x512xf32>, vector<2x512xf32> -> vector<2x512xf32>
    %197 = arith.addf %194, %196 : vector<2x512xf32>
    %198 = vector.extract_strided_slice %197 {offsets = [0, 0], sizes = [2, 384], strides = [1, 1]} : vector<2x512xf32> to vector<2x384xf32>
    %199 = arith.negf %198 : vector<2x384xf32>
    %200 = math.exp %199 : vector<2x384xf32>
    %cst_68 = arith.constant 1.000000e+00 : f32
    %201 = vector.broadcast %cst_68 : f32 to vector<2x384xf32>
    %202 = arith.addf %201, %200 : vector<2x384xf32>
    %203 = arith.divf %201, %202 : vector<2x384xf32>
    %204 = vector.extract_strided_slice %203 {offsets = [0, 0], sizes = [2, 128], strides = [1, 1]} : vector<2x384xf32> to vector<2x128xf32>
    %205 = vector.extract_strided_slice %203 {offsets = [0, 128], sizes = [2, 128], strides = [1, 1]} : vector<2x384xf32> to vector<2x128xf32>
    %206 = vector.extract_strided_slice %203 {offsets = [0, 256], sizes = [2, 128], strides = [1, 1]} : vector<2x384xf32> to vector<2x128xf32>
    %207 = vector.extract_strided_slice %197 {offsets = [0, 384], sizes = [2, 128], strides = [1, 1]} : vector<2x512xf32> to vector<2x128xf32>
    %208 = math.tanh %207 : vector<2x128xf32>
    %209 = arith.mulf %205, %168 : vector<2x128xf32>
    %210 = arith.mulf %204, %208 : vector<2x128xf32>
    %211 = arith.addf %209, %210 : vector<2x128xf32>
    %212 = math.tanh %211 : vector<2x128xf32>
    %213 = arith.mulf %206, %212 : vector<2x128xf32>
    %214 = tpu.concatenate %213, %192 in 1 : vector<2x128xf32>, vector<2x128xf32> -> vector<2x256xf32>
    %c0_69 = arith.constant 0 : index
    %c0_70 = arith.constant 0 : index
    %215 = vector.load %arg6[%c0_69, %c0_70] : memref<256x512xf32, #tpu.memory_space<vmem>>, vector<256x512xf32>
    %cst_71 = arith.constant dense<0.000000e+00> : vector<2x512xf32>
    %216 = tpu.matmul %214, %215, %cst_71 {dimension_numbers = #tpu.dot_dimension_numbers<[1], [0], [0], [1], [0, 0, 1, 1], [], []>} : vector<2x256xf32>, vector<256x512xf32>, vector<2x512xf32> -> vector<2x512xf32>
    %c0_72 = arith.constant 0 : index
    %c0_73 = arith.constant 0 : index
    %217 = vector.load %arg7[%c0_72, %c0_73] : memref<1x512xf32, #tpu.memory_space<vmem>>, vector<1x512xf32>
    %218 = vector.broadcast %217 : vector<1x512xf32> to vector<2x512xf32>
    %219 = arith.addf %216, %218 : vector<2x512xf32>
    %220 = vector.extract_strided_slice %219 {offsets = [0, 0], sizes = [2, 384], strides = [1, 1]} : vector<2x512xf32> to vector<2x384xf32>
    %221 = arith.negf %220 : vector<2x384xf32>
    %222 = math.exp %221 : vector<2x384xf32>
    %cst_74 = arith.constant 1.000000e+00 : f32
    %223 = vector.broadcast %cst_74 : f32 to vector<2x384xf32>
    %224 = arith.addf %223, %222 : vector<2x384xf32>
    %225 = arith.divf %223, %224 : vector<2x384xf32>
    %226 = vector.extract_strided_slice %225 {offsets = [0, 0], sizes = [2, 128], strides = [1, 1]} : vector<2x384xf32> to vector<2x128xf32>
    %227 = vector.extract_strided_slice %225 {offsets = [0, 128], sizes = [2, 128], strides = [1, 1]} : vector<2x384xf32> to vector<2x128xf32>
    %228 = vector.extract_strided_slice %225 {offsets = [0, 256], sizes = [2, 128], strides = [1, 1]} : vector<2x384xf32> to vector<2x128xf32>
    %229 = vector.extract_strided_slice %219 {offsets = [0, 384], sizes = [2, 128], strides = [1, 1]} : vector<2x512xf32> to vector<2x128xf32>
    %230 = math.tanh %229 : vector<2x128xf32>
    %231 = arith.mulf %227, %190 : vector<2x128xf32>
    %232 = arith.mulf %226, %230 : vector<2x128xf32>
    %233 = arith.addf %231, %232 : vector<2x128xf32>
    %234 = math.tanh %233 : vector<2x128xf32>
    %235 = arith.mulf %228, %234 : vector<2x128xf32>
    %c8 = arith.constant 8 : index
    %c0_75 = arith.constant 0 : index
    %236 = vector.load %arg13[%c8, %c0_75] : memref<16x128xf32, #tpu.memory_space<vmem>>, vector<2x128xf32>
    tpu.vector_store %arg13[%c8, %c0_75], %235 {strides = array<i32>} : memref<16x128xf32, #tpu.memory_space<vmem>>, vector<2x128xf32>,
    %237 = vector.extract_strided_slice %21 {offsets = [10, 0], sizes = [2, 512], strides = [1, 1]} : vector<16x512xf32> to vector<2x512xf32>
    %c0_76 = arith.constant 0 : index
    %c0_77 = arith.constant 0 : index
    %238 = vector.load %arg4[%c0_76, %c0_77] : memref<128x512xf32, #tpu.memory_space<vmem>>, vector<128x512xf32>
    %cst_78 = arith.constant dense<0.000000e+00> : vector<2x512xf32>
    %239 = tpu.matmul %213, %238, %cst_78 {dimension_numbers = #tpu.dot_dimension_numbers<[1], [0], [0], [1], [0, 0, 1, 1], [], []>} : vector<2x128xf32>, vector<128x512xf32>, vector<2x512xf32> -> vector<2x512xf32>
    %240 = arith.addf %237, %239 : vector<2x512xf32>
    %241 = vector.extract_strided_slice %240 {offsets = [0, 0], sizes = [2, 384], strides = [1, 1]} : vector<2x512xf32> to vector<2x384xf32>
    %242 = arith.negf %241 : vector<2x384xf32>
    %243 = math.exp %242 : vector<2x384xf32>
    %cst_79 = arith.constant 1.000000e+00 : f32
    %244 = vector.broadcast %cst_79 : f32 to vector<2x384xf32>
    %245 = arith.addf %244, %243 : vector<2x384xf32>
    %246 = arith.divf %244, %245 : vector<2x384xf32>
    %247 = vector.extract_strided_slice %246 {offsets = [0, 0], sizes = [2, 128], strides = [1, 1]} : vector<2x384xf32> to vector<2x128xf32>
    %248 = vector.extract_strided_slice %246 {offsets = [0, 128], sizes = [2, 128], strides = [1, 1]} : vector<2x384xf32> to vector<2x128xf32>
    %249 = vector.extract_strided_slice %246 {offsets = [0, 256], sizes = [2, 128], strides = [1, 1]} : vector<2x384xf32> to vector<2x128xf32>
    %250 = vector.extract_strided_slice %240 {offsets = [0, 384], sizes = [2, 128], strides = [1, 1]} : vector<2x512xf32> to vector<2x128xf32>
    %251 = math.tanh %250 : vector<2x128xf32>
    %252 = arith.mulf %248, %211 : vector<2x128xf32>
    %253 = arith.mulf %247, %251 : vector<2x128xf32>
    %254 = arith.addf %252, %253 : vector<2x128xf32>
    %255 = math.tanh %254 : vector<2x128xf32>
    %256 = arith.mulf %249, %255 : vector<2x128xf32>
    %257 = tpu.concatenate %256, %235 in 1 : vector<2x128xf32>, vector<2x128xf32> -> vector<2x256xf32>
    %c0_80 = arith.constant 0 : index
    %c0_81 = arith.constant 0 : index
    %258 = vector.load %arg6[%c0_80, %c0_81] : memref<256x512xf32, #tpu.memory_space<vmem>>, vector<256x512xf32>
    %cst_82 = arith.constant dense<0.000000e+00> : vector<2x512xf32>
    %259 = tpu.matmul %257, %258, %cst_82 {dimension_numbers = #tpu.dot_dimension_numbers<[1], [0], [0], [1], [0, 0, 1, 1], [], []>} : vector<2x256xf32>, vector<256x512xf32>, vector<2x512xf32> -> vector<2x512xf32>
    %c0_83 = arith.constant 0 : index
    %c0_84 = arith.constant 0 : index
    %260 = vector.load %arg7[%c0_83, %c0_84] : memref<1x512xf32, #tpu.memory_space<vmem>>, vector<1x512xf32>
    %261 = vector.broadcast %260 : vector<1x512xf32> to vector<2x512xf32>
    %262 = arith.addf %259, %261 : vector<2x512xf32>
    %263 = vector.extract_strided_slice %262 {offsets = [0, 0], sizes = [2, 384], strides = [1, 1]} : vector<2x512xf32> to vector<2x384xf32>
    %264 = arith.negf %263 : vector<2x384xf32>
    %265 = math.exp %264 : vector<2x384xf32>
    %cst_85 = arith.constant 1.000000e+00 : f32
    %266 = vector.broadcast %cst_85 : f32 to vector<2x384xf32>
    %267 = arith.addf %266, %265 : vector<2x384xf32>
    %268 = arith.divf %266, %267 : vector<2x384xf32>
    %269 = vector.extract_strided_slice %268 {offsets = [0, 0], sizes = [2, 128], strides = [1, 1]} : vector<2x384xf32> to vector<2x128xf32>
    %270 = vector.extract_strided_slice %268 {offsets = [0, 128], sizes = [2, 128], strides = [1, 1]} : vector<2x384xf32> to vector<2x128xf32>
    %271 = vector.extract_strided_slice %268 {offsets = [0, 256], sizes = [2, 128], strides = [1, 1]} : vector<2x384xf32> to vector<2x128xf32>
    %272 = vector.extract_strided_slice %262 {offsets = [0, 384], sizes = [2, 128], strides = [1, 1]} : vector<2x512xf32> to vector<2x128xf32>
    %273 = math.tanh %272 : vector<2x128xf32>
    %274 = arith.mulf %270, %233 : vector<2x128xf32>
    %275 = arith.mulf %269, %273 : vector<2x128xf32>
    %276 = arith.addf %274, %275 : vector<2x128xf32>
    %277 = math.tanh %276 : vector<2x128xf32>
    %278 = arith.mulf %271, %277 : vector<2x128xf32>
    %c10 = arith.constant 10 : index
    %c0_86 = arith.constant 0 : index
    %279 = vector.load %arg13[%c10, %c0_86] : memref<16x128xf32, #tpu.memory_space<vmem>>, vector<2x128xf32>
    tpu.vector_store %arg13[%c10, %c0_86], %278 {strides = array<i32>} : memref<16x128xf32, #tpu.memory_space<vmem>>, vector<2x128xf32>,
    %280 = vector.extract_strided_slice %21 {offsets = [12, 0], sizes = [2, 512], strides = [1, 1]} : vector<16x512xf32> to vector<2x512xf32>
    %c0_87 = arith.constant 0 : index
    %c0_88 = arith.constant 0 : index
    %281 = vector.load %arg4[%c0_87, %c0_88] : memref<128x512xf32, #tpu.memory_space<vmem>>, vector<128x512xf32>
    %cst_89 = arith.constant dense<0.000000e+00> : vector<2x512xf32>
    %282 = tpu.matmul %256, %281, %cst_89 {dimension_numbers = #tpu.dot_dimension_numbers<[1], [0], [0], [1], [0, 0, 1, 1], [], []>} : vector<2x128xf32>, vector<128x512xf32>, vector<2x512xf32> -> vector<2x512xf32>
    %283 = arith.addf %280, %282 : vector<2x512xf32>
    %284 = vector.extract_strided_slice %283 {offsets = [0, 0], sizes = [2, 384], strides = [1, 1]} : vector<2x512xf32> to vector<2x384xf32>
    %285 = arith.negf %284 : vector<2x384xf32>
    %286 = math.exp %285 : vector<2x384xf32>
    %cst_90 = arith.constant 1.000000e+00 : f32
    %287 = vector.broadcast %cst_90 : f32 to vector<2x384xf32>
    %288 = arith.addf %287, %286 : vector<2x384xf32>
    %289 = arith.divf %287, %288 : vector<2x384xf32>
    %290 = vector.extract_strided_slice %289 {offsets = [0, 0], sizes = [2, 128], strides = [1, 1]} : vector<2x384xf32> to vector<2x128xf32>
    %291 = vector.extract_strided_slice %289 {offsets = [0, 128], sizes = [2, 128], strides = [1, 1]} : vector<2x384xf32> to vector<2x128xf32>
    %292 = vector.extract_strided_slice %289 {offsets = [0, 256], sizes = [2, 128], strides = [1, 1]} : vector<2x384xf32> to vector<2x128xf32>
    %293 = vector.extract_strided_slice %283 {offsets = [0, 384], sizes = [2, 128], strides = [1, 1]} : vector<2x512xf32> to vector<2x128xf32>
    %294 = math.tanh %293 : vector<2x128xf32>
    %295 = arith.mulf %291, %254 : vector<2x128xf32>
    %296 = arith.mulf %290, %294 : vector<2x128xf32>
    %297 = arith.addf %295, %296 : vector<2x128xf32>
    %298 = math.tanh %297 : vector<2x128xf32>
    %299 = arith.mulf %292, %298 : vector<2x128xf32>
    %300 = tpu.concatenate %299, %278 in 1 : vector<2x128xf32>, vector<2x128xf32> -> vector<2x256xf32>
    %c0_91 = arith.constant 0 : index
    %c0_92 = arith.constant 0 : index
    %301 = vector.load %arg6[%c0_91, %c0_92] : memref<256x512xf32, #tpu.memory_space<vmem>>, vector<256x512xf32>
    %cst_93 = arith.constant dense<0.000000e+00> : vector<2x512xf32>
    %302 = tpu.matmul %300, %301, %cst_93 {dimension_numbers = #tpu.dot_dimension_numbers<[1], [0], [0], [1], [0, 0, 1, 1], [], []>} : vector<2x256xf32>, vector<256x512xf32>, vector<2x512xf32> -> vector<2x512xf32>
    %c0_94 = arith.constant 0 : index
    %c0_95 = arith.constant 0 : index
    %303 = vector.load %arg7[%c0_94, %c0_95] : memref<1x512xf32, #tpu.memory_space<vmem>>, vector<1x512xf32>
    %304 = vector.broadcast %303 : vector<1x512xf32> to vector<2x512xf32>
    %305 = arith.addf %302, %304 : vector<2x512xf32>
    %306 = vector.extract_strided_slice %305 {offsets = [0, 0], sizes = [2, 384], strides = [1, 1]} : vector<2x512xf32> to vector<2x384xf32>
    %307 = arith.negf %306 : vector<2x384xf32>
    %308 = math.exp %307 : vector<2x384xf32>
    %cst_96 = arith.constant 1.000000e+00 : f32
    %309 = vector.broadcast %cst_96 : f32 to vector<2x384xf32>
    %310 = arith.addf %309, %308 : vector<2x384xf32>
    %311 = arith.divf %309, %310 : vector<2x384xf32>
    %312 = vector.extract_strided_slice %311 {offsets = [0, 0], sizes = [2, 128], strides = [1, 1]} : vector<2x384xf32> to vector<2x128xf32>
    %313 = vector.extract_strided_slice %311 {offsets = [0, 128], sizes = [2, 128], strides = [1, 1]} : vector<2x384xf32> to vector<2x128xf32>
    %314 = vector.extract_strided_slice %311 {offsets = [0, 256], sizes = [2, 128], strides = [1, 1]} : vector<2x384xf32> to vector<2x128xf32>
    %315 = vector.extract_strided_slice %305 {offsets = [0, 384], sizes = [2, 128], strides = [1, 1]} : vector<2x512xf32> to vector<2x128xf32>
    %316 = math.tanh %315 : vector<2x128xf32>
    %317 = arith.mulf %313, %276 : vector<2x128xf32>
    %318 = arith.mulf %312, %316 : vector<2x128xf32>
    %319 = arith.addf %317, %318 : vector<2x128xf32>
    %320 = math.tanh %319 : vector<2x128xf32>
    %321 = arith.mulf %314, %320 : vector<2x128xf32>
    %c12 = arith.constant 12 : index
    %c0_97 = arith.constant 0 : index
    %322 = vector.load %arg13[%c12, %c0_97] : memref<16x128xf32, #tpu.memory_space<vmem>>, vector<2x128xf32>
    tpu.vector_store %arg13[%c12, %c0_97], %321 {strides = array<i32>} : memref<16x128xf32, #tpu.memory_space<vmem>>, vector<2x128xf32>,
    %323 = vector.extract_strided_slice %21 {offsets = [14, 0], sizes = [2, 512], strides = [1, 1]} : vector<16x512xf32> to vector<2x512xf32>
    %c0_98 = arith.constant 0 : index
    %c0_99 = arith.constant 0 : index
    %324 = vector.load %arg4[%c0_98, %c0_99] : memref<128x512xf32, #tpu.memory_space<vmem>>, vector<128x512xf32>
    %cst_100 = arith.constant dense<0.000000e+00> : vector<2x512xf32>
    %325 = tpu.matmul %299, %324, %cst_100 {dimension_numbers = #tpu.dot_dimension_numbers<[1], [0], [0], [1], [0, 0, 1, 1], [], []>} : vector<2x128xf32>, vector<128x512xf32>, vector<2x512xf32> -> vector<2x512xf32>
    %326 = arith.addf %323, %325 : vector<2x512xf32>
    %327 = vector.extract_strided_slice %326 {offsets = [0, 0], sizes = [2, 384], strides = [1, 1]} : vector<2x512xf32> to vector<2x384xf32>
    %328 = arith.negf %327 : vector<2x384xf32>
    %329 = math.exp %328 : vector<2x384xf32>
    %cst_101 = arith.constant 1.000000e+00 : f32
    %330 = vector.broadcast %cst_101 : f32 to vector<2x384xf32>
    %331 = arith.addf %330, %329 : vector<2x384xf32>
    %332 = arith.divf %330, %331 : vector<2x384xf32>
    %333 = vector.extract_strided_slice %332 {offsets = [0, 0], sizes = [2, 128], strides = [1, 1]} : vector<2x384xf32> to vector<2x128xf32>
    %334 = vector.extract_strided_slice %332 {offsets = [0, 128], sizes = [2, 128], strides = [1, 1]} : vector<2x384xf32> to vector<2x128xf32>
    %335 = vector.extract_strided_slice %332 {offsets = [0, 256], sizes = [2, 128], strides = [1, 1]} : vector<2x384xf32> to vector<2x128xf32>
    %336 = vector.extract_strided_slice %326 {offsets = [0, 384], sizes = [2, 128], strides = [1, 1]} : vector<2x512xf32> to vector<2x128xf32>
    %337 = math.tanh %336 : vector<2x128xf32>
    %338 = arith.mulf %334, %297 : vector<2x128xf32>
    %339 = arith.mulf %333, %337 : vector<2x128xf32>
    %340 = arith.addf %338, %339 : vector<2x128xf32>
    %341 = math.tanh %340 : vector<2x128xf32>
    %342 = arith.mulf %335, %341 : vector<2x128xf32>
    %343 = tpu.concatenate %342, %321 in 1 : vector<2x128xf32>, vector<2x128xf32> -> vector<2x256xf32>
    %c0_102 = arith.constant 0 : index
    %c0_103 = arith.constant 0 : index
    %344 = vector.load %arg6[%c0_102, %c0_103] : memref<256x512xf32, #tpu.memory_space<vmem>>, vector<256x512xf32>
    %cst_104 = arith.constant dense<0.000000e+00> : vector<2x512xf32>
    %345 = tpu.matmul %343, %344, %cst_104 {dimension_numbers = #tpu.dot_dimension_numbers<[1], [0], [0], [1], [0, 0, 1, 1], [], []>} : vector<2x256xf32>, vector<256x512xf32>, vector<2x512xf32> -> vector<2x512xf32>
    %c0_105 = arith.constant 0 : index
    %c0_106 = arith.constant 0 : index
    %346 = vector.load %arg7[%c0_105, %c0_106] : memref<1x512xf32, #tpu.memory_space<vmem>>, vector<1x512xf32>
    %347 = vector.broadcast %346 : vector<1x512xf32> to vector<2x512xf32>
    %348 = arith.addf %345, %347 : vector<2x512xf32>
    %349 = vector.extract_strided_slice %348 {offsets = [0, 0], sizes = [2, 384], strides = [1, 1]} : vector<2x512xf32> to vector<2x384xf32>
    %350 = arith.negf %349 : vector<2x384xf32>
    %351 = math.exp %350 : vector<2x384xf32>
    %cst_107 = arith.constant 1.000000e+00 : f32
    %352 = vector.broadcast %cst_107 : f32 to vector<2x384xf32>
    %353 = arith.addf %352, %351 : vector<2x384xf32>
    %354 = arith.divf %352, %353 : vector<2x384xf32>
    %355 = vector.extract_strided_slice %354 {offsets = [0, 0], sizes = [2, 128], strides = [1, 1]} : vector<2x384xf32> to vector<2x128xf32>
    %356 = vector.extract_strided_slice %354 {offsets = [0, 128], sizes = [2, 128], strides = [1, 1]} : vector<2x384xf32> to vector<2x128xf32>
    %357 = vector.extract_strided_slice %354 {offsets = [0, 256], sizes = [2, 128], strides = [1, 1]} : vector<2x384xf32> to vector<2x128xf32>
    %358 = vector.extract_strided_slice %348 {offsets = [0, 384], sizes = [2, 128], strides = [1, 1]} : vector<2x512xf32> to vector<2x128xf32>
    %359 = math.tanh %358 : vector<2x128xf32>
    %360 = arith.mulf %356, %319 : vector<2x128xf32>
    %361 = arith.mulf %355, %359 : vector<2x128xf32>
    %362 = arith.addf %360, %361 : vector<2x128xf32>
    %363 = math.tanh %362 : vector<2x128xf32>
    %364 = arith.mulf %357, %363 : vector<2x128xf32>
    %c14 = arith.constant 14 : index
    %c0_108 = arith.constant 0 : index
    %365 = vector.load %arg13[%c14, %c0_108] : memref<16x128xf32, #tpu.memory_space<vmem>>, vector<2x128xf32>
    tpu.vector_store %arg13[%c14, %c0_108], %364 {strides = array<i32>} : memref<16x128xf32, #tpu.memory_space<vmem>>, vector<2x128xf32>,
    %c0_109 = arith.constant 0 : index
    %c0_110 = arith.constant 0 : index
    %c0_111 = arith.constant 0 : index
    %366 = vector.load %arg11[%c0_109, %c0_110, %c0_111] : memref<2x2x128xf32, #tpu.memory_space<vmem>>, vector<1x2x128xf32>
    %367 = vector.shape_cast %366 : vector<1x2x128xf32> to vector<2x128xf32>
    %368 = vector.shape_cast %342 : vector<2x128xf32> to vector<1x2x128xf32>
    tpu.vector_store %arg11[%c0_109, %c0_110, %c0_111], %368 {strides = array<i32>} : memref<2x2x128xf32, #tpu.memory_space<vmem>>, vector<1x2x128xf32>,
    %c1_112 = arith.constant 1 : index
    %c0_113 = arith.constant 0 : index
    %c0_114 = arith.constant 0 : index
    %369 = vector.load %arg11[%c1_112, %c0_113, %c0_114] : memref<2x2x128xf32, #tpu.memory_space<vmem>>, vector<1x2x128xf32>
    %370 = vector.shape_cast %369 : vector<1x2x128xf32> to vector<2x128xf32>
    %371 = vector.shape_cast %364 : vector<2x128xf32> to vector<1x2x128xf32>
    tpu.vector_store %arg11[%c1_112, %c0_113, %c0_114], %371 {strides = array<i32>} : memref<2x2x128xf32, #tpu.memory_space<vmem>>, vector<1x2x128xf32>,
    %c0_115 = arith.constant 0 : index
    %c0_116 = arith.constant 0 : index
    %c0_117 = arith.constant 0 : index
    %372 = vector.load %arg12[%c0_115, %c0_116, %c0_117] : memref<2x2x128xf32, #tpu.memory_space<vmem>>, vector<1x2x128xf32>
    %373 = vector.shape_cast %372 : vector<1x2x128xf32> to vector<2x128xf32>
    %374 = vector.shape_cast %340 : vector<2x128xf32> to vector<1x2x128xf32>
    tpu.vector_store %arg12[%c0_115, %c0_116, %c0_117], %374 {strides = array<i32>} : memref<2x2x128xf32, #tpu.memory_space<vmem>>, vector<1x2x128xf32>,
    %c1_118 = arith.constant 1 : index
    %c0_119 = arith.constant 0 : index
    %c0_120 = arith.constant 0 : index
    %375 = vector.load %arg12[%c1_118, %c0_119, %c0_120] : memref<2x2x128xf32, #tpu.memory_space<vmem>>, vector<1x2x128xf32>
    %376 = vector.shape_cast %375 : vector<1x2x128xf32> to vector<2x128xf32>
    %377 = vector.shape_cast %362 : vector<2x128xf32> to vector<1x2x128xf32>
    tpu.vector_store %arg12[%c1_118, %c0_119, %c0_120], %377 {strides = array<i32>} : memref<2x2x128xf32, #tpu.memory_space<vmem>>, vector<1x2x128xf32>,
    %c0_121 = arith.constant 0 : index
    %c0_122 = arith.constant 0 : index
    %378 = vector.load %arg13[%c0_121, %c0_122] : memref<16x128xf32, #tpu.memory_space<vmem>>, vector<16x128xf32>
    %c0_123 = arith.constant 0 : index
    %c0_124 = arith.constant 0 : index
    %379 = vector.load %arg8[%c0_123, %c0_124] : memref<128x128xf32, #tpu.memory_space<vmem>>, vector<128x128xf32>
    %cst_125 = arith.constant dense<0.000000e+00> : vector<16x128xf32>
    %380 = tpu.matmul %378, %379, %cst_125 {dimension_numbers = #tpu.dot_dimension_numbers<[1], [0], [0], [1], [0, 0, 1, 1], [], []>} : vector<16x128xf32>, vector<128x128xf32>, vector<16x128xf32> -> vector<16x128xf32>
    %c0_126 = arith.constant 0 : index
    %c0_127 = arith.constant 0 : index
    %381 = vector.load %arg9[%c0_126, %c0_127] : memref<1x128xf32, #tpu.memory_space<vmem>>, vector<1x128xf32>
    %382 = vector.broadcast %381 : vector<1x128xf32> to vector<16x128xf32>
    %383 = arith.addf %380, %382 : vector<16x128xf32>
    %c0_128 = arith.constant 0 : index
    %c0_129 = arith.constant 0 : index
    %384 = vector.load %arg10[%c0_128, %c0_129] : memref<16x128xf32, #tpu.memory_space<vmem>>, vector<16x128xf32>
    tpu.vector_store %arg10[%c0_128, %c0_129], %383 {strides = array<i32>} : memref<16x128xf32, #tpu.memory_space<vmem>>, vector<16x128xf32>,
    return
  }
}

</mosaic_0001>

<bundles_post_ra>
// kernel: char_rnn_forward.1
= control target key start
LH: loop header
LB: loop body
LE: loop exit
PB: predicated region body
PF: predicated region fallthrough
CT: control target
= control target key end

     0   :  { %18 = vsyncpa [#allocation4], 0  ;;  %s9070_s0 = inlined_call_operand.vmem [shape: f32[16,16], index: 0, kind: input, shape index: {}]   ;;  %s9071_s1 = inlined_call_operand.vmem [shape: f32[2,2,32], index: 1, kind: input, shape index: {}]   ;;  %s9072_s2 = inlined_call_operand.vmem [shape: f32[2,2,32], index: 2, kind: input, shape index: {}]   ;;  %s9073_s3 = inlined_call_operand.vmem [shape: f32[16,512], index: 3, kind: input, shape index: {}]   ;;  %s9074_s4 = inlined_call_operand.hbm [shape: f32[128,512], index: 4, kind: input, shape index: {}]   ;;  %s9075_s5 = inlined_call_operand.hbm [shape: f32[1,512], index: 5, kind: input, shape index: {}]   ;;  %s9076_s6 = inlined_call_operand.hbm [shape: f32[256,512], index: 6, kind: input, shape index: {}]   ;;  %s9077_s7 = inlined_call_operand.hbm [shape: f32[1,512], index: 7, kind: input, shape index: {}]   ;;  %s9078_s8 = inlined_call_operand.hbm [shape: f32[128,128], index: 8, kind: input, shape index: {}]   ;;  %s9079_s9 = inlined_call_operand.vmem [shape: f32[1,128], index: 9, kind: input, shape index: {}]   ;;  %s9080_s10 = inlined_call_operand.vmem [shape: f32[16,128], index: 10, kind: output, shape index: {0}]   ;;  %s9081_s11 = inlined_call_operand.hbm [shape: f32[2,2,128], index: 11, kind: output, shape index: {1}]   ;;  %s9082_s12 = inlined_call_operand.hbm [shape: f32[2,2,128], index: 12, kind: output, shape index: {2}]  }
   0x1   :  { %19 = vsyncpa [#allocation7], 0 }
   0x2   :  { %20 = vsyncpa [#allocation10], 0 }
   0x3   :  { %21 = vsyncpa [#allocation5], 0 }
   0x4   :  { %22 = vsyncpa [#allocation14], 0  ;;  %s7119_s21 = smov [#allocation6]   ;;  %s7120_s23 = smov [#allocation9]  }
   0x5   :  { %s49_s22 = sshll.u32 %s7119_s21, 4  ;;  %s71_s24 = sshll.u32 %s7120_s23, 4  ;;  %s50_s22 = int_to_ptr.vmem [resolvable:$true] %s49_s22  ;;  %s72_s24 = int_to_ptr.vmem [resolvable:$true] %s71_s24 }
   0x6   :  { %s6955_s27 = scalar_lea.hbm %s9075_s5, 64 }
   0x7   :  { %p6956_p0 = scmp.ne.s32.totalorder %s9075_s5, %s6955_s27  ;;  %p6959_p1 = scmp.lt.u32.totalorder %s6955_s27, %s9075_s5 }
   0x9   :  { %p6961_p2 = pnand %p6959_p1, %p6956_p0 }
   0xb   :  { %6964 = shalt.err (!%p6961_p2)
}
   0xc   :  { %s6965_s14 = scalar_lea.vmem %s50_s22, 64  ;;  %p6970_p4 = scmp.lt.s32.totalorder %s50_s22, %s50_s22 }
   0xd   :  { %p6966_p3 = scmp.ne.s32.totalorder %s50_s22, %s6965_s14  ;;  %p6971_p5 = scmp.lt.s32.totalorder %s6965_s14, %s6965_s14 }
   0xf   :  { %p6972_p6 = por %p6971_p5, %p6970_p4 }
  0x11   :  { %p6973_p7 = pnand %p6972_p6, %p6966_p3 }
  0x13   :  { %6976 = shalt.err (!%p6973_p7)
}
  0x14   :  { %52 = dma.hbm_to_vmem [thread:$0]  %s9075_s5, 64, %s50_s22, [#allocation7]  }
  0x15   :  { %s6977_s19 = scalar_lea.hbm %s9077_s7, 64 }
  0x16   :  { %p6978_p8 = scmp.ne.s32.totalorder %s9077_s7, %s6977_s19  ;;  %p6981_p9 = scmp.lt.u32.totalorder %s6977_s19, %s9077_s7 }
  0x18   :  { %p6983_p10 = pnand %p6981_p9, %p6978_p8 }
  0x1a   :  { %6986 = shalt.err (!%p6983_p10)
}
  0x1b   :  { %s6987_s26 = scalar_lea.vmem %s72_s24, 64  ;;  %p6992_p12 = scmp.lt.s32.totalorder %s72_s24, %s72_s24 }
  0x1c   :  { %p6988_p11 = scmp.ne.s32.totalorder %s72_s24, %s6987_s26  ;;  %p6993_p13 = scmp.lt.s32.totalorder %s6987_s26, %s6987_s26 }
  0x1e   :  { %p6994_p0 = por %p6993_p13, %p6992_p12 }
  0x20   :  { %p6995_p1 = pnand %p6994_p0, %p6988_p11 }
  0x22   :  { %6998 = shalt.err (!%p6995_p1)
}
  0x23   :  { %74 = dma.hbm_to_vmem [thread:$0]  %s9077_s7, 64, %s72_s24, [#allocation10]  }
  0x24   :  { %s7121_s27 = smov [#allocation3]   ;;  %s6999_s13 = scalar_lea.hbm %s9074_s4, 8192 }
  0x25   :  { %s36_s28 = sshll.u32 %s7121_s27, 4  ;;  %p7000_p2 = scmp.ne.s32.totalorder %s9074_s4, %s6999_s13  ;;  %s37_s28 = int_to_ptr.vmem [resolvable:$true] %s36_s28 }
  0x26   :  { %p7003_p3 = scmp.lt.u32.totalorder %s6999_s13, %s9074_s4 }
  0x28   :  { %p7005_p4 = pnand %p7003_p3, %p7000_p2 }
  0x2a   :  { %7008 = shalt.err (!%p7005_p4)
}
  0x2b   :  { %s7009_s18 = scalar_lea.vmem %s37_s28, 8192  ;;  %p7014_p6 = scmp.lt.s32.totalorder %s37_s28, %s37_s28 }
  0x2c   :  { %p7010_p5 = scmp.ne.s32.totalorder %s37_s28, %s7009_s18  ;;  %p7015_p7 = scmp.lt.s32.totalorder %s7009_s18, %s7009_s18 }
  0x2e   :  { %p7016_p8 = por %p7015_p7, %p7014_p6 }
  0x30   :  { %p7017_p9 = pnand %p7016_p8, %p7010_p5 }
  0x32   :  { %7020 = shalt.err (!%p7017_p9)
}
  0x33   :  { %s7122_s7 = smov 512   ;;  %s7123_s24 = smov 32  }
  0x34   :  { %42 = dma.hbm_to_vmem [thread:$0]  %s9074_s4, 8192, %s37_s28, [#allocation4], %s7122_s7, %s7122_s7, %s7123_s24  }
  0x35   :  { %s7124_s21 = smov [#allocation8]   ;;  %s7125_s25 = smov [#allocation11]  }
  0x36   :  { %s58_s23 = sshll.u32 %s7124_s21, 4  ;;  %s80_s26 = sshll.u32 %s7125_s25, 4  ;;  %s59_s23 = int_to_ptr.vmem [resolvable:$true] %s58_s23  ;;  %s81_s26 = int_to_ptr.vmem [resolvable:$true] %s80_s26 }
  0x37   :  { %s7021_s27 = scalar_lea.hbm %s9076_s6, 16384 }
  0x38   :  { %p7022_p10 = scmp.ne.s32.totalorder %s9076_s6, %s7021_s27  ;;  %p7025_p11 = scmp.lt.u32.totalorder %s7021_s27, %s9076_s6 }
  0x3a   :  { %p7027_p12 = pnand %p7025_p11, %p7022_p10 }
  0x3c   :  { %7030 = shalt.err (!%p7027_p12)
}
  0x3d   :  { %s7031_s4 = scalar_lea.vmem %s59_s23, 16384  ;;  %p7036_p0 = scmp.lt.s32.totalorder %s59_s23, %s59_s23 }
  0x3e   :  { %p7032_p13 = scmp.ne.s32.totalorder %s59_s23, %s7031_s4  ;;  %p7037_p1 = scmp.lt.s32.totalorder %s7031_s4, %s7031_s4 }
  0x40   :  { %p7038_p2 = por %p7037_p1, %p7036_p0 }
  0x42   :  { %p7039_p3 = pnand %p7038_p2, %p7032_p13 }
  0x44   :  { %7042 = shalt.err (!%p7039_p3)
}
  0x45   :  { %64 = dma.hbm_to_vmem [thread:$0]  %s9076_s6, 16384, %s59_s23, [#allocation7], %s7122_s7, %s7122_s7, %s7123_s24  }
  0x46   :  { %s7043_s18 = scalar_lea.hbm %s9078_s8, 2048 }
  0x47   :  { %p7044_p4 = scmp.ne.s32.totalorder %s9078_s8, %s7043_s18  ;;  %p7047_p5 = scmp.lt.u32.totalorder %s7043_s18, %s9078_s8 }
  0x49   :  { %p7049_p6 = pnand %p7047_p5, %p7044_p4 }
  0x4b   :  { %7052 = shalt.err (!%p7049_p6)
}
  0x4c   :  { %s7053_s5 = scalar_lea.vmem %s81_s26, 2048  ;;  %p7058_p8 = scmp.lt.s32.totalorder %s81_s26, %s81_s26 }
  0x4d   :  { %p7054_p7 = scmp.ne.s32.totalorder %s81_s26, %s7053_s5  ;;  %p7059_p9 = scmp.lt.s32.totalorder %s7053_s5, %s7053_s5 }
  0x4f   :  { %p7060_p10 = por %p7059_p9, %p7058_p8 }
  0x51   :  { %p7061_p11 = pnand %p7060_p10, %p7054_p7 }
  0x53   :  { %7064 = shalt.err (!%p7061_p11)
}
  0x54   :  { %s7126_s6 = smov 128   ;;  %s7127_s7 = smov 8  }
  0x55   :  { %86 = dma.hbm_to_vmem [thread:$0]  %s9078_s8, 2048, %s81_s26, [#allocation10], %s7126_s6, %s7126_s6, %s7127_s7  }
  0x56   :  { %7109 = dma.done.wait [#allocation4], 8192  }
  0x57   :  { %7110 = vsyncadd [#allocation4], 4294959104 }
  0x58   :  { %7111 = dma.done.wait [#allocation7], 16448  }
  0x59   :  { %7112 = vsyncadd [#allocation7], 4294950848 }
  0x5a   :  { %7113 = dma.done.wait [#allocation10], 2112  }
  0x5b   :  { %7114 = vsyncadd [#allocation10], 4294965184  ;;  %v9083_v0 = vmov 0.0   ;;  %v118_v1 = vld [vmem:[%s9073_s3 + $0x8] sm:$0xff]  ;;  %v309_v3 = vld [vmem:[#allocation3 + $0x8] sm:$0xff]  ;;  %vm147_vm0 = vcmask 130048  }
  0x5c   :  { %218 = vmatprep.mubr.f32.mxu1 %v9083_v0  ;;  %436 = vmatprep.mubr.f32.mxu0 %v9083_v0  ;;  %v122_v2 = vld [vmem:[%s9073_s3 + $0x28] sm:$0xff]  ;;  %v313_v5 = vld [vmem:[#allocation3 + $0x28] sm:$0xff]  ;;  %v117_v6 = vld [vmem:[%s9073_s3] sm:$0xff]  ;;  %vm105_vm1 = vcmask 261120   ;;  %s7130_s8 = smov [#allocation13]  }
  0x5d   :  { %v5110_v4 = vpack.c.bf16 %v122_v2, %v118_v1  ;;  %v121_v7 = vld [vmem:[%s9073_s3 + $0x20] sm:$0xff]  ;;  %v7273_v8 = vpack.c.bf16 %v313_v5, %v309_v3  ;;  %v308_v10 = vld [vmem:[#allocation3] sm:$0xff]  ;;  %v317_v14 = vld [vmem:[#allocation3 + $0x48] sm:$0xff]  ;;  %s4978_s26 = sshll.u32 %s7130_s8, 4  ;;  %s4979_s26 = int_to_ptr.vmem [resolvable:$true] %s4978_s26 }
  0x5e   :  { %v5112_v9 = vpack.c.bf16 %v121_v7, %v117_v6  ;;  %v312_v11 = vld [vmem:[#allocation3 + $0x20] sm:$0xff]  ;;  %v115_v12 = vld [vmem:[%s9070_s0] sm:$0xff]  ;;  %v321_v15 = vld [vmem:[#allocation3 + $0x68] sm:$0xff] }
  0x5f   :  { %5111 = vmatprep.subr.bf16.mxu1 %v5110_v4  ;;  %v7278_v13 = vpack.c.bf16 %v312_v11, %v308_v10  ;;  %v316_v16 = vld [vmem:[#allocation3 + $0x40] sm:$0xff]  ;;  %5119 = vmatprep.subr.bf16.mxu0 %v7273_v8  ;;  %v7281_v17 = vpack.c.bf16 %v321_v15, %v317_v14  ;;  %v120_v19 = vld [vmem:[%s9073_s3 + $0x18] sm:$0xff]  ;;  %v311_v31 = vld [vmem:[#allocation3 + $0x18] sm:$0xff] }
  0x60   :  { %5113 = vmatpush1.bf16.msra.mxu1 %v5112_v9  ;;  %v320_v18 = vld [vmem:[#allocation3 + $0x60] sm:$0xff]  ;;  %v124_v20 = vld [vmem:[%s9073_s3 + $0x38] sm:$0xff]  ;;  %v315_v32 = vld [vmem:[#allocation3 + $0x38] sm:$0xff] }
  0x61   :  { %5121 = vmatpush1.bf16.msra.mxu0 %v7278_v13  ;;  %v7290_v21 = vpack.c.bf16 %v320_v18, %v316_v16  ;;  %v5114_v22 = vpack.c.bf16 %v124_v20, %v120_v19  ;;  %v119_v23 = vld [vmem:[%s9073_s3 + $0x10] sm:$0xff]  ;;  %v325_v26 = vld [vmem:[#allocation3 + $0x88] sm:$0xff]  ;;  %v116_v33 = vld [vmem:[%s9070_s0 + $0x8] sm:$0xff]  ;;  %v7306_v34 = vpack.c.bf16 %v315_v32, %v311_v31 }
  0x62   :  { %v123_v24 = vld [vmem:[%s9073_s3 + $0x30] sm:$0xff]  ;;  %5123 = vmatprep.subr.bf16.mxu0 %v7281_v17  ;;  %v329_v27 = vld [vmem:[#allocation3 + $0xa8] sm:$0xff]  ;;  %v310_v38 = vld [vmem:[#allocation3 + $0x10] sm:$0xff] }
  0x63   :  { %v5116_v25 = vpack.c.bf16 %v123_v24, %v119_v23  ;;  %v324_v28 = vld [vmem:[#allocation3 + $0x80] sm:$0xff]  ;;  %5000 = vmatmul.mubr.msk.f32.vlgmr.msra.gmra.mrb[0].mxu1 %vm147_vm0, %v115_v12  ;;  %5115 = vmatprep.subr.bf16.mxu1 %v5114_v22  ;;  %v7300_v29 = vpack.c.bf16 %v329_v27, %v325_v26  ;;  %v333_v35 = vld [vmem:[#allocation3 + $0xc8] sm:$0xff]  ;;  %v314_v39 = vld [vmem:[#allocation3 + $0x30] sm:$0xff] }
  0x64   :  { %v328_v30 = vld [vmem:[#allocation3 + $0xa0] sm:$0xff]  ;;  %224 = vmatprep.mubr.f32.mxu1 %v9083_v0  ;;  %v337_v36 = vld [vmem:[#allocation3 + $0xe8] sm:$0xff]  ;;  %v319_v43 = vld [vmem:[#allocation3 + $0x58] sm:$0xff]  ;;  %v7317_v47 = vpack.c.bf16 %v314_v39, %v310_v38 }
  0x65   :  { %5117 = vmatpush1.bf16.msra.mxu1 %v5116_v25  ;;  %5125 = vmatpush1.bf16.msra.mxu0 %v7290_v21  ;;  %v7309_v37 = vpack.c.bf16 %v328_v30, %v324_v28  ;;  %v332_v40 = vld [vmem:[#allocation3 + $0xc0] sm:$0xff]  ;;  %v7313_v41 = vpack.c.bf16 %v337_v36, %v333_v35  ;;  %v323_v44 = vld [vmem:[#allocation3 + $0x78] sm:$0xff]  ;;  %v341_v45 = vld [vmem:[#allocation3 + $0x108] sm:$0xff] }
  0x66   :  { %5127 = vmatprep.subr.bf16.mxu0 %v7300_v29  ;;  %5151 = vmatprep.subr.bf16.mxu1 %v7306_v34  ;;  %v336_v42 = vld [vmem:[#allocation3 + $0xe0] sm:$0xff]  ;;  %v345_v46 = vld [vmem:[#allocation3 + $0x128] sm:$0xff]  ;;  %v7322_v49 = vpack.c.bf16 %v323_v44, %v319_v43  ;;  %v318_v50 = vld [vmem:[#allocation3 + $0x50] sm:$0xff] }
  0x67   :  { %5001 = vmatmul.mubr.msk.f32.gmra.mrb[2].mxu1 %vm147_vm0, %v116_v33  ;;  %v7320_v48 = vpack.c.bf16 %v336_v42, %v332_v40  ;;  %v322_v51 = vld [vmem:[#allocation3 + $0x70] sm:$0xff]  ;;  %v340_v52 = vld [vmem:[#allocation3 + $0x100] sm:$0xff]  ;;  %v7325_v53 = vpack.c.bf16 %v345_v46, %v341_v45  ;;  %v327_v55 = vld [vmem:[#allocation3 + $0x98] sm:$0xff] }
  0x68   :  { %295 = vmatprep.mubr.f32.mxu1 %v9083_v0  ;;  %v344_v54 = vld [vmem:[#allocation3 + $0x120] sm:$0xff]  ;;  %v331_v56 = vld [vmem:[#allocation3 + $0xb8] sm:$0xff]  ;;  %v349_v57 = vld [vmem:[#allocation3 + $0x148] sm:$0xff]  ;;  %v7329_v59 = vpack.c.bf16 %v322_v51, %v318_v50 }
  0x69   :  { %5129 = vmatpush1.bf16.msra.mxu0 %v7309_v37  ;;  %v353_v58 = vld [vmem:[#allocation3 + $0x168] sm:$0xff]  ;;  %v7334_v60 = vpack.c.bf16 %v344_v54, %v340_v52  ;;  %v7336_v61 = vpack.c.bf16 %v331_v56, %v327_v55  ;;  %v326_v62 = vld [vmem:[#allocation3 + $0x90] sm:$0xff]  ;;  %v348_v1 = vld [vmem:[#allocation3 + $0x140] sm:$0xff] }
  0x6a   :  { %5131 = vmatprep.subr.bf16.mxu0 %v7313_v41  ;;  %v330_v63 = vld [vmem:[#allocation3 + $0xb0] sm:$0xff]  ;;  %v7339_v2 = vpack.c.bf16 %v353_v58, %v349_v57  ;;  %v352_v3 = vld [vmem:[#allocation3 + $0x160] sm:$0xff]  ;;  %v335_v4 = vld [vmem:[#allocation3 + $0xd8] sm:$0xff] }
  0x6b   :  { %5002 = vmatmul.mubr.msk.f32.vlgmr.msra.gmra.mrb[4].mxu1 %vm147_vm0, %v115_v12  ;;  %v339_v5 = vld [vmem:[#allocation3 + $0xf8] sm:$0xff]  ;;  %v357_v6 = vld [vmem:[#allocation3 + $0x188] sm:$0xff]  ;;  %v7343_v9 = vpack.c.bf16 %v330_v63, %v326_v62  ;;  %v7348_v10 = vpack.c.bf16 %v352_v3, %v348_v1  ;;  %v334_v12 = vld [vmem:[#allocation3 + $0xd0] sm:$0xff] }
  0x6c   :  { %5153 = vmatpush1.bf16.msra.mxu1 %v7317_v47  ;;  %301 = vmatprep.mubr.f32.mxu1 %v9083_v0  ;;  %v361_v7 = vld [vmem:[#allocation3 + $0x1a8] sm:$0xff]  ;;  %v7350_v11 = vpack.c.bf16 %v339_v5, %v335_v4  ;;  %v338_v14 = vld [vmem:[#allocation3 + $0xf0] sm:$0xff]  ;;  %v356_v15 = vld [vmem:[#allocation3 + $0x180] sm:$0xff] }
  0x6d   :  { %5133 = vmatpush1.bf16.msra.mxu0 %v7320_v48  ;;  %5155 = vmatprep.subr.bf16.mxu1 %v7322_v49  ;;  %v7353_v16 = vpack.c.bf16 %v361_v7, %v357_v6  ;;  %v360_v18 = vld [vmem:[#allocation3 + $0x1a0] sm:$0xff]  ;;  %v343_v19 = vld [vmem:[#allocation3 + $0x118] sm:$0xff]  ;;  %v365_v22 = vld [vmem:[#allocation3 + $0x1c8] sm:$0xff]  ;;  %v7356_v24 = vpack.c.bf16 %v338_v14, %v334_v12 }
  0x6e   :  { %5135 = vmatprep.subr.bf16.mxu0 %v7325_v53  ;;  %v347_v20 = vld [vmem:[#allocation3 + $0x138] sm:$0xff]  ;;  %v369_v23 = vld [vmem:[#allocation3 + $0x1e8] sm:$0xff]  ;;  %v7360_v25 = vpack.c.bf16 %v360_v18, %v356_v15  ;;  %v342_v27 = vld [vmem:[#allocation3 + $0x110] sm:$0xff] }
  0x6f   :  { %5003 = vmatmul.mubr.msk.f32.gmra.mrb[6].mxu1 %vm147_vm0, %v116_v33  ;;  %v7362_v26 = vpack.c.bf16 %v347_v20, %v343_v19  ;;  %v346_v28 = vld [vmem:[#allocation3 + $0x130] sm:$0xff]  ;;  %v364_v30 = vld [vmem:[#allocation3 + $0x1c0] sm:$0xff]  ;;  %v7365_v31 = vpack.c.bf16 %v369_v23, %v365_v22  ;;  %v351_v33 = vld [vmem:[#allocation3 + $0x158] sm:$0xff] }
  0x70   :  { %5157 = vmatpush1.bf16.msra.mxu1 %v7329_v59  ;;  %507 = vmatprep.mubr.f32.mxu1 %v9083_v0  ;;  %v368_v32 = vld [vmem:[#allocation3 + $0x1e0] sm:$0xff]  ;;  %v355_v35 = vld [vmem:[#allocation3 + $0x178] sm:$0xff]  ;;  %v7368_v36 = vpack.c.bf16 %v346_v28, %v342_v27  ;;  %v350_v40 = vld [vmem:[#allocation3 + $0x150] sm:$0xff] }
  0x71   :  { %5137 = vmatpush1.bf16.msra.mxu0 %v7334_v60  ;;  %5159 = vmatprep.subr.bf16.mxu1 %v7336_v61  ;;  %v7372_v38 = vpack.c.bf16 %v368_v32, %v364_v30  ;;  %v7374_v39 = vpack.c.bf16 %v355_v35, %v351_v33  ;;  %v354_v42 = vld [vmem:[#allocation3 + $0x170] sm:$0xff]  ;;  %v359_v43 = vld [vmem:[#allocation3 + $0x198] sm:$0xff]  ;;  %v542_v12 = vld [vmem:[#allocation8] sm:$0xff] }
  0x72   :  { %5139 = vmatprep.subr.bf16.mxu0 %v7339_v2  ;;  %v363_v44 = vld [vmem:[#allocation3 + $0x1b8] sm:$0xff]  ;;  %v7378_v45 = vpack.c.bf16 %v354_v42, %v350_v40  ;;  %v104_v46 = vld [vmem:[%s9071_s1] sm:$0x3]  ;;  %v546_v14 = vld [vmem:[#allocation8 + $0x20] sm:$0xff] }
  0x73   :  { %v7385_v50 = vpack.c.bf16 %v363_v44, %v359_v43  ;;  %v358_v51 = vld [vmem:[#allocation3 + $0x190] sm:$0xff]  ;;  %v367_v54 = vld [vmem:[#allocation3 + $0x1d8] sm:$0xff]  ;;  %v7406_v18 = vpack.c.bf16 %v546_v14, %v542_v12  ;;  %v550_v32 = vld [vmem:[#allocation8 + $0x40] sm:$0xff] }
  0x74   :  { %5161 = vmatpush1.bf16.msra.mxu1 %v7343_v9  ;;  %v362_v52 = vld [vmem:[#allocation3 + $0x1b0] sm:$0xff]  ;;  %v371_v55 = vld [vmem:[#allocation3 + $0x1f8] sm:$0xff]  ;;  %v554_v35 = vld [vmem:[#allocation8 + $0x60] sm:$0xff] }
  0x75   :  { %5141 = vmatpush1.bf16.msra.mxu0 %v7348_v10  ;;  %5163 = vmatprep.subr.bf16.mxu1 %v7350_v11  ;;  %v7389_v56 = vpack.c.bf16 %v362_v52, %v358_v51  ;;  %v7392_v57 = vpack.c.bf16 %v371_v55, %v367_v54  ;;  %v366_v58 = vld [vmem:[#allocation3 + $0x1d0] sm:$0xff]  ;;  %v545_v4 = vld [vmem:[#allocation8 + $0x18] sm:$0xff]  ;;  %v7417_v43 = vpack.c.bf16 %v554_v35, %v550_v32 }
  0x76   :  { %5143 = vmatprep.subr.bf16.mxu0 %v7353_v16  ;;  %v370_v62 = vld [vmem:[#allocation3 + $0x1f0] sm:$0xff]  ;;  %v549_v6 = vld [vmem:[#allocation8 + $0x38] sm:$0xff] }
  0x77   :  { %v7395_v63 = vpack.c.bf16 %v370_v62, %v366_v58  ;;  %v543_v1 = vld [vmem:[#allocation8 + $0x8] sm:$0xff]  ;;  %v7402_v7 = vpack.c.bf16 %v549_v6, %v545_v4  ;;  %v544_v15 = vld [vmem:[#allocation8 + $0x10] sm:$0xff]  ;;  %v553_v28 = vld [vmem:[#allocation8 + $0x58] sm:$0xff] }
  0x78   :  { %5165 = vmatpush1.bf16.msra.mxu1 %v7356_v24  ;;  %v547_v3 = vld [vmem:[#allocation8 + $0x28] sm:$0xff]  ;;  %v548_v19 = vld [vmem:[#allocation8 + $0x30] sm:$0xff]  ;;  %v557_v30 = vld [vmem:[#allocation8 + $0x78] sm:$0xff] }
  0x79   :  { %5145 = vmatpush1.bf16.msra.mxu0 %v7360_v25  ;;  %5167 = vmatprep.subr.bf16.mxu1 %v7362_v26  ;;  %v7400_v5 = vpack.c.bf16 %v547_v3, %v543_v1  ;;  %v551_v20 = vld [vmem:[#allocation8 + $0x48] sm:$0xff]  ;;  %v7408_v23 = vpack.c.bf16 %v548_v19, %v544_v15  ;;  %v7413_v33 = vpack.c.bf16 %v557_v30, %v553_v28  ;;  %v552_v40 = vld [vmem:[#allocation8 + $0x50] sm:$0xff]  ;;  %v561_v52 = vld [vmem:[#allocation8 + $0x98] sm:$0xff] }
  0x7a   :  { %5147 = vmatprep.subr.bf16.mxu0 %v7365_v31  ;;  %v555_v22 = vld [vmem:[#allocation8 + $0x68] sm:$0xff]  ;;  %v556_v42 = vld [vmem:[#allocation8 + $0x70] sm:$0xff]  ;;  %v565_v55 = vld [vmem:[#allocation8 + $0xb8] sm:$0xff] }
  0x7b   :  { %v7410_v27 = vpack.c.bf16 %v555_v22, %v551_v20  ;;  %v7419_v44 = vpack.c.bf16 %v556_v42, %v552_v40  ;;  %v563_v51 = vld [vmem:[#allocation8 + $0xa8] sm:$0xff]  ;;  %v558_v58 = vld [vmem:[#allocation8 + $0x80] sm:$0xff]  ;;  %v7424_v1 = vpack.c.bf16 %v565_v55, %v561_v52  ;;  %v560_v3 = vld [vmem:[#allocation8 + $0x90] sm:$0xff] }
  0x7c   :  { %5169 = vmatpush1.bf16.msra.mxu1 %v7368_v36  ;;  %v562_v62 = vld [vmem:[#allocation8 + $0xa0] sm:$0xff]  ;;  %v564_v4 = vld [vmem:[#allocation8 + $0xb0] sm:$0xff]  ;;  %v567_v6 = vld [vmem:[#allocation8 + $0xc8] sm:$0xff] }
  0x7d   :  { %5149 = vmatpush1.bf16.msra.mxu0 %v7372_v38  ;;  %5171 = vmatprep.subr.bf16.mxu1 %v7374_v39  ;;  %v7427_v12 = vpack.c.bf16 %v562_v62, %v558_v58  ;;  %v571_v14 = vld [vmem:[#allocation8 + $0xe8] sm:$0xff]  ;;  %v569_v15 = vld [vmem:[#allocation8 + $0xd8] sm:$0xff]  ;;  %v7431_v20 = vpack.c.bf16 %v564_v4, %v560_v3  ;;  %v566_v28 = vld [vmem:[#allocation8 + $0xc0] sm:$0xff] }
  0x7e   :  { %5183 = vmatprep.subr.bf16.mxu0 %v7400_v5  ;;  %v573_v19 = vld [vmem:[#allocation8 + $0xf8] sm:$0xff]  ;;  %v7433_v22 = vpack.c.bf16 %v571_v14, %v567_v6  ;;  %v570_v30 = vld [vmem:[#allocation8 + $0xe0] sm:$0xff]  ;;  %v568_v32 = vld [vmem:[#allocation8 + $0xd0] sm:$0xff] }
  0x7f   :  { %v7436_v35 = vpack.c.bf16 %v573_v19, %v569_v15  ;;  %v572_v40 = vld [vmem:[#allocation8 + $0xf0] sm:$0xff]  ;;  %v575_v42 = vld [vmem:[#allocation8 + $0x108] sm:$0xff]  ;;  %v581_v52 = vld [vmem:[#allocation8 + $0x138] sm:$0xff]  ;;  %v7439_v55 = vpack.c.bf16 %v570_v30, %v566_v28 }
  0x80   :  { %5004 = vmatmul.mubr.msk.f32.vlgmr.msra.gmra.mrb[0].mxu0 %vm105_vm1, %v104_v46  ;;  %5173 = vmatpush1.bf16.msra.mxu1 %v7378_v45  ;;  %9323 = vst [vmem:[#allocation20_spill] sm:$0xff] %v7433_v22  ;;  %v7443_v58 = vpack.c.bf16 %v572_v40, %v568_v32  ;;  %v574_v3 = vld [vmem:[#allocation8 + $0x100] sm:$0xff]  ;;  %v576_v14 = vld [vmem:[#allocation8 + $0x110] sm:$0xff]  ;;  %v583_v30 = vld [vmem:[#allocation8 + $0x148] sm:$0xff] }
  0x81   :  { %5175 = vmatprep.subr.bf16.mxu1 %v7385_v50  ;;  %5185 = vmatpush1.bf16.msra.mxu0 %v7406_v18  ;;  %9324 = vst [vmem:[#allocation21_spill] sm:$0xff] %v7436_v35  ;;  %9325 = vst [vmem:[#allocation22_spill] sm:$0xff] %v7439_v55  ;;  %v578_v4 = vld [vmem:[#allocation8 + $0x120] sm:$0xff]  ;;  %v580_v15 = vld [vmem:[#allocation8 + $0x130] sm:$0xff] }
  0x82   :  { %5187 = vmatprep.subr.bf16.mxu0 %v7410_v27  ;;  %9326 = vst [vmem:[#allocation23_spill] sm:$0xff] %v7443_v58  ;;  %v7451_v19 = vpack.c.bf16 %v578_v4, %v574_v3  ;;  %v7455_v28 = vpack.c.bf16 %v580_v15, %v576_v14  ;;  %v587_v32 = vld [vmem:[#allocation8 + $0x168] sm:$0xff]  ;;  %v585_v40 = vld [vmem:[#allocation8 + $0x158] sm:$0xff]  ;;  %v584_v14 = vld [vmem:[#allocation8 + $0x150] sm:$0xff] }
  0x83   :  { %v588_v15 = vld [vmem:[#allocation8 + $0x170] sm:$0xff] }
  0x84   :  { %5177 = vmatpush1.bf16.msra.mxu1 %v7389_v56  ;;  %9329 = vst [vmem:[#allocation26_spill] sm:$0xff] %v7451_v19  ;;  %9330 = vst [vmem:[#allocation27_spill] sm:$0xff] %v7455_v28  ;;  %v7467_v0 = vpack.c.bf16 %v588_v15, %v584_v14  ;;  %v592_v14 = vld [vmem:[#allocation8 + $0x190] sm:$0xff] }
  0x85   :  { %5179 = vmatprep.subr.bf16.mxu1 %v7392_v57  ;;  %5189 = vmatpush1.bf16.msra.mxu0 %v7417_v43  ;;  %v596_v15 = vld [vmem:[#allocation8 + $0x1b0] sm:$0xff] }
  0x86   :  { %9334 = vst [vmem:[#allocation31_spill] sm:$0xff] %v7467_v0 }
  0x88   :  { %5181 = vmatpush1.bf16.msra.mxu1 %v7395_v63 }
  0x89   :  { %5247 = vmatprep.subr.bf16.mxu1 %v7402_v7 }
  0x8b   :  { %5005 = vmatmul.mubr.msk.f32.vlgmr.msra.gmra.mrb[8].mxu1 %vm105_vm1, %v104_v46  ;;  %v559_v46 = vld [vmem:[#allocation8 + $0x88] sm:$0xff] }
  0x8c   :  { %5249 = vmatpush1.bf16.msra.mxu1 %v7408_v23  ;;  %v7422_v54 = vpack.c.bf16 %v563_v51, %v559_v46  ;;  %v579_v46 = vld [vmem:[#allocation8 + $0x128] sm:$0xff]  ;;  %v577_v51 = vld [vmem:[#allocation8 + $0x118] sm:$0xff] }
  0x8d   :  { %5251 = vmatprep.subr.bf16.mxu1 %v7413_v33  ;;  %v7445_v62 = vpack.c.bf16 %v579_v46, %v575_v42  ;;  %v7448_v6 = vpack.c.bf16 %v581_v52, %v577_v51  ;;  %v7460_v42 = vpack.c.bf16 %v587_v32, %v583_v30  ;;  %v589_v46 = vld [vmem:[#allocation8 + $0x178] sm:$0xff]  ;;  %v582_v51 = vld [vmem:[#allocation8 + $0x140] sm:$0xff]  ;;  %v595_v30 = vld [vmem:[#allocation8 + $0x1a8] sm:$0xff] }
  0x8e   :  { %5191 = vmatprep.subr.bf16.mxu0 %v7422_v54  ;;  %v586_v52 = vld [vmem:[#allocation8 + $0x160] sm:$0xff]  ;;  %v7462_v3 = vpack.c.bf16 %v589_v46, %v585_v40  ;;  %v593_v32 = vld [vmem:[#allocation8 + $0x198] sm:$0xff] }
  0x8f   :  { %5193 = vmatpush1.bf16.msra.mxu0 %v7427_v12  ;;  %9327 = vst [vmem:[#allocation24_spill] sm:$0xff] %v7445_v62  ;;  %9328 = vst [vmem:[#allocation25_spill] sm:$0xff] %v7448_v6  ;;  %v7464_v4 = vpack.c.bf16 %v586_v52, %v582_v51  ;;  %v597_v40 = vld [vmem:[#allocation8 + $0x1b8] sm:$0xff]  ;;  %v590_v46 = vld [vmem:[#allocation8 + $0x180] sm:$0xff] }
  0x90   :  { %5253 = vmatpush1.bf16.msra.mxu1 %v7419_v44  ;;  %5195 = vmatprep.subr.bf16.mxu0 %v7433_v22  ;;  %9331 = vst [vmem:[#allocation28_spill] sm:$0xff] %v7460_v42  ;;  %9332 = vst [vmem:[#allocation29_spill] sm:$0xff] %v7462_v3  ;;  %v594_v51 = vld [vmem:[#allocation8 + $0x1a0] sm:$0xff]  ;;  %v7474_v52 = vpack.c.bf16 %v597_v40, %v593_v32  ;;  %v605_v32 = vld [vmem:[#allocation8 + $0x1f8] sm:$0xff] }
  0x91   :  { %5255 = vmatprep.subr.bf16.mxu1 %v7424_v1  ;;  %9333 = vst [vmem:[#allocation30_spill] sm:$0xff] %v7464_v4  ;;  %v598_v40 = vld [vmem:[#allocation8 + $0x1c0] sm:$0xff] }
  0x92   :  { %9336 = vst [vmem:[#allocation33_spill] sm:$0xff] %v7474_v52 }
  0x93   :  { %5197 = vmatpush1.bf16.msra.mxu0 %v7439_v55 }
  0x94   :  { %5257 = vmatpush1.bf16.msra.mxu1 %v7431_v20  ;;  %5199 = vmatprep.subr.bf16.mxu0 %v7445_v62  ;;  %v657_v62 = vld [vmem:[#allocation8 + $0x398] sm:$0xff] }
  0x95   :  { %5259 = vmatprep.subr.bf16.mxu1 %v7436_v35 }
  0x97   :  { %5201 = vmatpush1.bf16.msra.mxu0 %v7451_v19 }
  0x98   :  { %5261 = vmatpush1.bf16.msra.mxu1 %v7443_v58  ;;  %5203 = vmatprep.subr.bf16.mxu0 %v7460_v42 }
  0x99   :  { %5263 = vmatprep.subr.bf16.mxu1 %v7448_v6  ;;  %v7476_v6 = vpack.c.bf16 %v594_v51, %v590_v46  ;;  %v602_v46 = vld [vmem:[#allocation8 + $0x1e0] sm:$0xff] }
  0x9a   :  { %v7488_v42 = vpack.c.bf16 %v602_v46, %v598_v40  ;;  %v610_v40 = vld [vmem:[#allocation8 + $0x220] sm:$0xff] }
  0x9b   :  { %5205 = vmatpush1.bf16.msra.mxu0 %v7464_v4  ;;  %9337 = vst [vmem:[#allocation34_spill] sm:$0xff] %v7476_v6 }
  0x9c   :  { %5265 = vmatpush1.bf16.msra.mxu1 %v7455_v28  ;;  %v591_v28 = vld [vmem:[#allocation8 + $0x188] sm:$0xff]  ;;  %9341 = vst [vmem:[#allocation38_spill] sm:$0xff] %v7488_v42 }
  0x9d   :  { %5267 = vmatprep.subr.bf16.mxu1 %v7462_v3  ;;  %v7472_v19 = vpack.c.bf16 %v595_v30, %v591_v28  ;;  %v7479_v3 = vpack.c.bf16 %v596_v15, %v592_v14  ;;  %v603_v28 = vld [vmem:[#allocation8 + $0x1e8] sm:$0xff]  ;;  %v601_v30 = vld [vmem:[#allocation8 + $0x1d8] sm:$0xff]  ;;  %v600_v14 = vld [vmem:[#allocation8 + $0x1d0] sm:$0xff] }
  0x9e   :  { %v7486_v51 = vpack.c.bf16 %v605_v32, %v601_v30  ;;  %v604_v15 = vld [vmem:[#allocation8 + $0x1f0] sm:$0xff]  ;;  %v613_v30 = vld [vmem:[#allocation8 + $0x238] sm:$0xff]  ;;  %v606_v32 = vld [vmem:[#allocation8 + $0x200] sm:$0xff] }
  0x9f   :  { %9335 = vst [vmem:[#allocation32_spill] sm:$0xff] %v7472_v19  ;;  %5207 = vmatprep.subr.bf16.mxu0 %v7472_v19  ;;  %9338 = vst [vmem:[#allocation35_spill] sm:$0xff] %v7479_v3  ;;  %v7500_v19 = vpack.c.bf16 %v610_v40, %v606_v32  ;;  %v618_v32 = vld [vmem:[#allocation8 + $0x260] sm:$0xff] }
  0xa0   :  { %5269 = vmatpush1.bf16.msra.mxu1 %v7467_v0  ;;  %5209 = vmatpush1.bf16.msra.mxu0 %v7476_v6  ;;  %v599_v0 = vld [vmem:[#allocation8 + $0x1c8] sm:$0xff]  ;;  %9340 = vst [vmem:[#allocation37_spill] sm:$0xff] %v7486_v51 }
  0xa1   :  { %5271 = vmatprep.subr.bf16.mxu1 %v7474_v52  ;;  %v7484_v4 = vpack.c.bf16 %v603_v28, %v599_v0  ;;  %v7491_v52 = vpack.c.bf16 %v604_v15, %v600_v14  ;;  %v611_v0 = vld [vmem:[#allocation8 + $0x228] sm:$0xff]  ;;  %v609_v28 = vld [vmem:[#allocation8 + $0x218] sm:$0xff]  ;;  %9345 = vst [vmem:[#allocation42_spill] sm:$0xff] %v7500_v19  ;;  %v608_v14 = vld [vmem:[#allocation8 + $0x210] sm:$0xff] }
  0xa2   :  { %v7498_v46 = vpack.c.bf16 %v613_v30, %v609_v28  ;;  %v612_v15 = vld [vmem:[#allocation8 + $0x230] sm:$0xff]  ;;  %v621_v28 = vld [vmem:[#allocation8 + $0x278] sm:$0xff]  ;;  %v614_v30 = vld [vmem:[#allocation8 + $0x240] sm:$0xff] }
  0xa3   :  { %9339 = vst [vmem:[#allocation36_spill] sm:$0xff] %v7484_v4  ;;  %5211 = vmatprep.subr.bf16.mxu0 %v7484_v4  ;;  %9342 = vst [vmem:[#allocation39_spill] sm:$0xff] %v7491_v52  ;;  %v7512_v4 = vpack.c.bf16 %v618_v32, %v614_v30  ;;  %v626_v30 = vld [vmem:[#allocation8 + $0x2a0] sm:$0xff] }
  0xa4   :  { %5273 = vmatpush1.bf16.msra.mxu1 %v7479_v3  ;;  %5213 = vmatpush1.bf16.msra.mxu0 %v7488_v42  ;;  %v607_v3 = vld [vmem:[#allocation8 + $0x208] sm:$0xff]  ;;  %9344 = vst [vmem:[#allocation41_spill] sm:$0xff] %v7498_v46 }
  0xa5   :  { %5275 = vmatprep.subr.bf16.mxu1 %v7486_v51  ;;  %v7496_v6 = vpack.c.bf16 %v611_v0, %v607_v3  ;;  %v7503_v51 = vpack.c.bf16 %v612_v15, %v608_v14  ;;  %v619_v3 = vld [vmem:[#allocation8 + $0x268] sm:$0xff]  ;;  %v617_v0 = vld [vmem:[#allocation8 + $0x258] sm:$0xff]  ;;  %9349 = vst [vmem:[#allocation46_spill] sm:$0xff] %v7512_v4  ;;  %v616_v14 = vld [vmem:[#allocation8 + $0x250] sm:$0xff] }
  0xa6   :  { %v7510_v40 = vpack.c.bf16 %v621_v28, %v617_v0  ;;  %v620_v15 = vld [vmem:[#allocation8 + $0x270] sm:$0xff]  ;;  %v629_v0 = vld [vmem:[#allocation8 + $0x2b8] sm:$0xff]  ;;  %v622_v28 = vld [vmem:[#allocation8 + $0x280] sm:$0xff] }
  0xa7   :  { %9343 = vst [vmem:[#allocation40_spill] sm:$0xff] %v7496_v6  ;;  %5215 = vmatprep.subr.bf16.mxu0 %v7496_v6  ;;  %9346 = vst [vmem:[#allocation43_spill] sm:$0xff] %v7503_v51  ;;  %v7524_v6 = vpack.c.bf16 %v626_v30, %v622_v28  ;;  %v634_v28 = vld [vmem:[#allocation8 + $0x2e0] sm:$0xff] }
  0xa8   :  { %5277 = vmatpush1.bf16.msra.mxu1 %v7491_v52  ;;  %5217 = vmatpush1.bf16.msra.mxu0 %v7500_v19  ;;  %v615_v52 = vld [vmem:[#allocation8 + $0x248] sm:$0xff]  ;;  %9348 = vst [vmem:[#allocation45_spill] sm:$0xff] %v7510_v40 }
  0xa9   :  { %5279 = vmatprep.subr.bf16.mxu1 %v7498_v46  ;;  %v7508_v42 = vpack.c.bf16 %v619_v3, %v615_v52  ;;  %v7515_v46 = vpack.c.bf16 %v620_v15, %v616_v14  ;;  %v627_v52 = vld [vmem:[#allocation8 + $0x2a8] sm:$0xff]  ;;  %v625_v3 = vld [vmem:[#allocation8 + $0x298] sm:$0xff]  ;;  %9353 = vst [vmem:[#allocation50_spill] sm:$0xff] %v7524_v6  ;;  %v624_v14 = vld [vmem:[#allocation8 + $0x290] sm:$0xff] }
  0xaa   :  { %v7522_v32 = vpack.c.bf16 %v629_v0, %v625_v3  ;;  %v628_v15 = vld [vmem:[#allocation8 + $0x2b0] sm:$0xff]  ;;  %v637_v3 = vld [vmem:[#allocation8 + $0x2f8] sm:$0xff]  ;;  %v630_v0 = vld [vmem:[#allocation8 + $0x2c0] sm:$0xff] }
  0xab   :  { %9347 = vst [vmem:[#allocation44_spill] sm:$0xff] %v7508_v42  ;;  %5219 = vmatprep.subr.bf16.mxu0 %v7508_v42  ;;  %9350 = vst [vmem:[#allocation47_spill] sm:$0xff] %v7515_v46  ;;  %v7536_v42 = vpack.c.bf16 %v634_v28, %v630_v0  ;;  %v642_v0 = vld [vmem:[#allocation8 + $0x320] sm:$0xff] }
  0xac   :  { %5281 = vmatpush1.bf16.msra.mxu1 %v7503_v51  ;;  %5221 = vmatpush1.bf16.msra.mxu0 %v7512_v4  ;;  %v623_v51 = vld [vmem:[#allocation8 + $0x288] sm:$0xff]  ;;  %9352 = vst [vmem:[#allocation49_spill] sm:$0xff] %v7522_v32 }
  0xad   :  { %5283 = vmatprep.subr.bf16.mxu1 %v7510_v40  ;;  %v7520_v19 = vpack.c.bf16 %v627_v52, %v623_v51  ;;  %v7527_v40 = vpack.c.bf16 %v628_v15, %v624_v14  ;;  %v635_v51 = vld [vmem:[#allocation8 + $0x2e8] sm:$0xff]  ;;  %v633_v52 = vld [vmem:[#allocation8 + $0x2d8] sm:$0xff]  ;;  %9357 = vst [vmem:[#allocation54_spill] sm:$0xff] %v7536_v42  ;;  %v632_v14 = vld [vmem:[#allocation8 + $0x2d0] sm:$0xff] }
  0xae   :  { %v7534_v30 = vpack.c.bf16 %v637_v3, %v633_v52  ;;  %v636_v15 = vld [vmem:[#allocation8 + $0x2f0] sm:$0xff]  ;;  %v645_v52 = vld [vmem:[#allocation8 + $0x338] sm:$0xff]  ;;  %v638_v3 = vld [vmem:[#allocation8 + $0x300] sm:$0xff] }
  0xaf   :  { %9351 = vst [vmem:[#allocation48_spill] sm:$0xff] %v7520_v19  ;;  %5223 = vmatprep.subr.bf16.mxu0 %v7520_v19  ;;  %9354 = vst [vmem:[#allocation51_spill] sm:$0xff] %v7527_v40  ;;  %v7548_v19 = vpack.c.bf16 %v642_v0, %v638_v3  ;;  %v650_v3 = vld [vmem:[#allocation8 + $0x360] sm:$0xff] }
  0xb0   :  { %5285 = vmatpush1.bf16.msra.mxu1 %v7515_v46  ;;  %5225 = vmatpush1.bf16.msra.mxu0 %v7524_v6  ;;  %v631_v46 = vld [vmem:[#allocation8 + $0x2c8] sm:$0xff]  ;;  %9356 = vst [vmem:[#allocation53_spill] sm:$0xff] %v7534_v30 }
  0xb1   :  { %5287 = vmatprep.subr.bf16.mxu1 %v7522_v32  ;;  %v7532_v4 = vpack.c.bf16 %v635_v51, %v631_v46  ;;  %v7539_v32 = vpack.c.bf16 %v636_v15, %v632_v14  ;;  %v643_v46 = vld [vmem:[#allocation8 + $0x328] sm:$0xff]  ;;  %v641_v51 = vld [vmem:[#allocation8 + $0x318] sm:$0xff]  ;;  %9361 = vst [vmem:[#allocation58_spill] sm:$0xff] %v7548_v19  ;;  %v640_v14 = vld [vmem:[#allocation8 + $0x310] sm:$0xff] }
  0xb2   :  { %v7546_v28 = vpack.c.bf16 %v645_v52, %v641_v51  ;;  %v644_v15 = vld [vmem:[#allocation8 + $0x330] sm:$0xff]  ;;  %v653_v51 = vld [vmem:[#allocation8 + $0x378] sm:$0xff]  ;;  %v646_v52 = vld [vmem:[#allocation8 + $0x340] sm:$0xff] }
  0xb3   :  { %9355 = vst [vmem:[#allocation52_spill] sm:$0xff] %v7532_v4  ;;  %5227 = vmatprep.subr.bf16.mxu0 %v7532_v4  ;;  %9358 = vst [vmem:[#allocation55_spill] sm:$0xff] %v7539_v32  ;;  %v7560_v4 = vpack.c.bf16 %v650_v3, %v646_v52 }
  0xb4   :  { %5289 = vmatpush1.bf16.msra.mxu1 %v7527_v40  ;;  %5229 = vmatpush1.bf16.msra.mxu0 %v7536_v42  ;;  %v639_v40 = vld [vmem:[#allocation8 + $0x308] sm:$0xff]  ;;  %9360 = vst [vmem:[#allocation57_spill] sm:$0xff] %v7546_v28 }
  0xb5   :  { %5291 = vmatprep.subr.bf16.mxu1 %v7534_v30  ;;  %v7544_v6 = vpack.c.bf16 %v643_v46, %v639_v40  ;;  %v7551_v30 = vpack.c.bf16 %v644_v15, %v640_v14  ;;  %v651_v40 = vld [vmem:[#allocation8 + $0x368] sm:$0xff]  ;;  %v649_v46 = vld [vmem:[#allocation8 + $0x358] sm:$0xff]  ;;  %9365 = vst [vmem:[#allocation62_spill] sm:$0xff] %v7560_v4  ;;  %v648_v14 = vld [vmem:[#allocation8 + $0x350] sm:$0xff] }
  0xb6   :  { %v7558_v0 = vpack.c.bf16 %v653_v51, %v649_v46  ;;  %v652_v15 = vld [vmem:[#allocation8 + $0x370] sm:$0xff]  ;;  %v654_v46 = vld [vmem:[#allocation8 + $0x380] sm:$0xff] }
  0xb7   :  { %9359 = vst [vmem:[#allocation56_spill] sm:$0xff] %v7544_v6  ;;  %5231 = vmatprep.subr.bf16.mxu0 %v7544_v6  ;;  %9362 = vst [vmem:[#allocation59_spill] sm:$0xff] %v7551_v30  ;;  %v659_v6 = vld [vmem:[#allocation8 + $0x3a8] sm:$0xff]  ;;  %v658_v51 = vld [vmem:[#allocation8 + $0x3a0] sm:$0xff] }
  0xb8   :  { %5293 = vmatpush1.bf16.msra.mxu1 %v7539_v32  ;;  %5233 = vmatpush1.bf16.msra.mxu0 %v7548_v19  ;;  %v647_v32 = vld [vmem:[#allocation8 + $0x348] sm:$0xff]  ;;  %9364 = vst [vmem:[#allocation61_spill] sm:$0xff] %v7558_v0  ;;  %v7572_v3 = vpack.c.bf16 %v658_v51, %v654_v46  ;;  %v664_v46 = vld [vmem:[#allocation8 + $0x3d0] sm:$0xff] }
  0xb9   :  { %5295 = vmatprep.subr.bf16.mxu1 %v7546_v28  ;;  %v7556_v42 = vpack.c.bf16 %v651_v40, %v647_v32  ;;  %v7563_v28 = vpack.c.bf16 %v652_v15, %v648_v14  ;;  %v655_v19 = vld [vmem:[#allocation8 + $0x388] sm:$0xff]  ;;  %v661_v40 = vld [vmem:[#allocation8 + $0x3b8] sm:$0xff]  ;;  %v656_v14 = vld [vmem:[#allocation8 + $0x390] sm:$0xff] }
  0xba   :  { %v7567_v32 = vpack.c.bf16 %v659_v6, %v655_v19  ;;  %v7570_v52 = vpack.c.bf16 %v661_v40, %v657_v62  ;;  %9369 = vst [vmem:[#allocation66_spill] sm:$0xff] %v7572_v3  ;;  %v660_v15 = vld [vmem:[#allocation8 + $0x3b0] sm:$0xff]  ;;  %v669_v6 = vld [vmem:[#allocation8 + $0x3f8] sm:$0xff]  ;;  %v662_v62 = vld [vmem:[#allocation8 + $0x3c0] sm:$0xff] }
  0xbb   :  { %9363 = vst [vmem:[#allocation60_spill] sm:$0xff] %v7556_v42  ;;  %5235 = vmatprep.subr.bf16.mxu0 %v7556_v42  ;;  %9366 = vst [vmem:[#allocation63_spill] sm:$0xff] %v7563_v28  ;;  %v663_v42 = vld [vmem:[#allocation8 + $0x3c8] sm:$0xff]  ;;  %v666_v40 = vld [vmem:[#allocation8 + $0x3e0] sm:$0xff] }
  0xbc   :  { %5297 = vmatpush1.bf16.msra.mxu1 %v7551_v30  ;;  %5237 = vmatpush1.bf16.msra.mxu0 %v7560_v4  ;;  %9367 = vst [vmem:[#allocation64_spill] sm:$0xff] %v7567_v32  ;;  %9368 = vst [vmem:[#allocation65_spill] sm:$0xff] %v7570_v52  ;;  %v7575_v30 = vpack.c.bf16 %v660_v15, %v656_v14  ;;  %v665_v4 = vld [vmem:[#allocation8 + $0x3d8] sm:$0xff]  ;;  %v7583_v51 = vpack.c.bf16 %v666_v40, %v662_v62  ;;  %v4998_v14 = vld [vmem:[%s9071_s1 + $0x2] sm:$0x3] }
  0xbd   :  { %5299 = vmatprep.subr.bf16.mxu1 %v7558_v0  ;;  %5239 = vmatprep.subr.bf16.mxu0 %v7567_v32  ;;  %v667_v0 = vld [vmem:[#allocation8 + $0x3e8] sm:$0xff]  ;;  %v7580_v58 = vpack.c.bf16 %v669_v6, %v665_v4  ;;  %v127_v4 = vlaneseq }
  0xbe   :  { %9370 = vst [vmem:[#allocation67_spill] sm:$0xff] %v7575_v30  ;;  %v7578_v19 = vpack.c.bf16 %v667_v0, %v663_v42  ;;  %9373 = vst [vmem:[#allocation70_spill] sm:$0xff] %v7583_v51  ;;  %5009 = vmatprep.mubr.msk.f32.mxu0 %vm105_vm1, %v4998_v14  ;;  %5010 = vmatprep.mubr.msk.f32.mxu1 %vm105_vm1, %v4998_v14 }
  0xbf   :  { %9372 = vst [vmem:[#allocation69_spill] sm:$0xff] %v7580_v58  ;;  %v128_v0 = vshrl.u32 %v127_v4, 7 }
  0xc0   :  { %5301 = vmatpush1.bf16.msra.mxu1 %v7563_v28  ;;  %9371 = vst [vmem:[#allocation68_spill] sm:$0xff] %v7578_v19  ;;  %5241 = vmatpush1.bf16.msra.mxu0 %v7572_v3  ;;  %v668_v28 = vld [vmem:[#allocation8 + $0x3f0] sm:$0xff] }
  0xc1   :  { %5303 = vmatprep.subr.bf16.mxu1 %v7570_v52  ;;  %5243 = vmatprep.subr.bf16.mxu0 %v7578_v19  ;;  %v7590_v42 = vpack.c.bf16 %v668_v28, %v664_v46  ;;  %v7599_v15 = vsub.s32 0, %v128_v0  ;;  %v125_v28 = vld [vmem:[#allocation6] sm:$0xf]  ;;  %v7601_v62 = vsub.s32 1, %v128_v0  ;;  %v7611_v19 = vsub.s32 3, %v128_v0 }
  0xc3   :  { %9374 = vst [vmem:[#allocation71_spill] sm:$0xff] %v7590_v42  ;;  %9375 = vst [vmem:[#allocation72_spill] sm:$0xff] %v7599_v15  ;;  %v130_v46 = vrot.slane %v125_v28, %v7599_v15  ;;  %v134_v14 = vrot.slane %v125_v28, %v7601_v62  ;;  %v142_v52 = vrot.slane %v125_v28, %v7611_v19 }
  0xc4   :  { %5305 = vmatpush1.bf16.msra.mxu1 %v7575_v30  ;;  %5245 = vmatpush1.bf16.msra.mxu0 %v7583_v51  ;;  %9376 = vst [vmem:[#allocation73_spill] sm:$0xff] %v7601_v62 }
  0xc5   :  { %5307 = vmatprep.subr.bf16.mxu1 %v7580_v58  ;;  %5311 = vmatprep.subr.bf16.mxu0 %v7273_v8 }
  0xc8   :  { %5309 = vmatpush1.bf16.msra.mxu1 %v7590_v42 }
  0xc9   :  { %5343 = vmatprep.subr.bf16.mxu1 %v7306_v34  ;;  %v7609_v34 = vsub.s32 2, %v128_v0 }
  0xcb   :  { %9379 = vst [vmem:[#allocation76_spill] sm:$0xff] %v7609_v34  ;;  %v138_v3 = vrot.slane %v125_v28, %v7609_v34 }
 0x136   :  { %v220_v6 = vpop.f32.mrb[0].mxu1 }
 0x137   :  { %v222_v40 = vpop.f32.mrb[1].mxu1 }
 0x13a   :  { %v226_v51 = vpop.f32.mrb[2].mxu1 }
 0x13b   :  { %v7605_v58 = vadd.f32 %v226_v51, %v130_v46  ;;  %v228_v42 = vpop.f32.mrb[3].mxu1  ;;  %v7619_v51 = vadd.f32 %v220_v6, %v130_v46 }
 0x13c   :  { %v7607_v8 = vadd.f32 %v228_v42, %v134_v14  ;;  %v7621_v42 = vadd.f32 %v222_v40, %v134_v14 }
 0x13d   :  { %9377 = vst [vmem:[#allocation74_spill] sm:$0xff] %v7605_v58 }
 0x13e   :  { %9378 = vst [vmem:[#allocation75_spill] sm:$0xff] %v7607_v8  ;;  %v297_v4 = vpop.f32.mrb[4].mxu1 }
 0x13f   :  { %v299_v30 = vpop.f32.mrb[5].mxu1  ;;  %v7625_v28 = vadd.f32 %v297_v4, %v138_v3 }
 0x142   :  { %v303_v32 = vpop.f32.mrb[6].mxu1 }
 0x143   :  { %v7615_v15 = vadd.f32 %v303_v32, %v138_v3  ;;  %v305_v62 = vpop.f32.mrb[7].mxu1  ;;  %v7627_v32 = vadd.f32 %v299_v30, %v142_v52 }
 0x144   :  { %v7617_v55 = vadd.f32 %v305_v62, %v142_v52 }
 0x145   :  { %9380 = vst [vmem:[#allocation77_spill] sm:$0xff] %v7615_v15 }
 0x146   :  { %9381 = vst [vmem:[#allocation78_spill] sm:$0xff] %v7617_v55 }
 0x153   :  { %v438_v8 = vpop.f32.mrb[0].mxu0 }
 0x154   :  { %v514_v58 = vadd.f32 %v438_v8, %v7619_v51  ;;  %v440_v0 = vpop.f32.mrb[1].mxu0 }
 0x155   :  { %v515_v35 = vadd.f32 %v440_v0, %v7621_v42 }
 0x156   :  { %v5006_v22 = vmul.f32 -1.442695, %v514_v58 }
 0x157   :  { %v5007_v34 = vmul.f32 -1.442695, %v515_v35 }
 0x158   :  { %6699 = vpow2.f32 %v5006_v22  ;;  %v107_v22 = vld [vmem:[%s9072_s2] sm:$0x3] }
 0x159   :  { %6701 = vpow2.f32 %v5007_v34  ;;  %v108_v30 = vsel %vm105_vm1, %v107_v22, 0.0  ;;  %v9428_v22 = vld [vmem:[#allocation65_spill] sm:$0xff] }
 0x15e   :  { %v509_v62 = vpop.f32.mrb[8].mxu1 }
 0x15f   :  { %v516_v6 = vadd.f32 %v509_v62, %v7625_v28  ;;  %v511_v46 = vpop.f32.mrb[9].mxu1 }
 0x160   :  { %v517_v40 = vadd.f32 %v511_v46, %v7627_v32 }
 0x161   :  { %v5008_v14 = vmul.f32 -1.442695, %v516_v6 }
 0x162   :  { %v6700_v55 = vpop.eup %6699 }
 0x163   :  { %v6702_v8 = vpop.eup %6701  ;;  %v527_v15 = vadd.f32 1.0, %v6700_v55  ;;  %6703 = vpow2.f32 %v5008_v14  ;;  %v9425_v14 = vld [vmem:[#allocation62_spill] sm:$0xff] }
 0x164   :  { %v528_v0 = vadd.f32 1.0, %v6702_v8  ;;  %6705 = vtanh.f32 %v517_v40  ;;  %v9382_v40 = vmov 0.0   ;;  %v9426_v8 = vld [vmem:[#allocation63_spill] sm:$0xff] }
 0x165   :  { %6707 = vrcp.f32 %v527_v15 }
 0x166   :  { %6709 = vrcp.f32 %v528_v0  ;;  %v9427_v0 = vld [vmem:[#allocation64_spill] sm:$0xff] }
 0x16d   :  { %v6704_v35 = vpop.eup %6703 }
 0x16e   :  { %v6706_v58 = vpop.eup %6705  ;;  %v529_v34 = vadd.f32 1.0, %v6704_v35  ;;  %v9429_v35 = vld [vmem:[#allocation66_spill] sm:$0xff] }
 0x16f   :  { %v6708_v52 = vpop.eup %6707 }
 0x170   :  { %v6710_v3 = vpop.eup %6709  ;;  %v538_v4 = vmul.f32 %v6708_v52, %v6706_v58  ;;  %6711 = vrcp.f32 %v529_v34  ;;  %v9430_v58 = vld [vmem:[#allocation67_spill] sm:$0xff]  ;;  %v9432_v52 = vld [vmem:[#allocation69_spill] sm:$0xff] }
 0x171   :  { %v537_v62 = vmul.f32 %v6710_v3, %v108_v30  ;;  %v9431_v30 = vld [vmem:[#allocation68_spill] sm:$0xff]  ;;  %v9433_v3 = vld [vmem:[#allocation70_spill] sm:$0xff]  ;;  %v9434_v34 = vld [vmem:[#allocation71_spill] sm:$0xff] }
 0x173   :  { %v7635_v6 = vadd.f32 %v538_v4, %v537_v62  ;;  %v1433_v4 = vld [vmem:[#allocation3 + $0x8] sm:$0xff] }
 0x174   :  { %v1437_v62 = vld [vmem:[#allocation3 + $0x28] sm:$0xff] }
 0x175   :  { %6713 = vtanh.f32 %v7635_v6 }
 0x17a   :  { %v6712_v55 = vpop.eup %6711 }
 0x17f   :  { %v6714_v15 = vpop.eup %6713 }
 0x180   :  { %v541_v46 = vmul.f32 %v6714_v15, %v6712_v55  ;;  %v1435_v55 = vld [vmem:[#allocation3 + $0x18] sm:$0xff]  ;;  %v7734_v15 = vpack.c.bf16 %v1437_v62, %v1433_v4 }
 0x182   :  { %757 = vmatmul.mubr.f32.vlgmr.msra.gmra.mrb[2].mxu0 %v541_v46  ;;  %828 = vmatmul.mubr.f32.vlgmr.msra.gmra.mrb[10].mxu1 %v541_v46 }
 0x183   :  { %5313 = vmatpush1.bf16.msra.mxu0 %v7278_v13  ;;  %5345 = vmatpush1.bf16.msra.mxu1 %v7317_v47  ;;  %v9383_v13 = vld [vmem:[#allocation20_spill] sm:$0xff]  ;;  %v9389_v47 = vld [vmem:[#allocation26_spill] sm:$0xff] }
 0x184   :  { %5315 = vmatprep.subr.bf16.mxu0 %v7281_v17  ;;  %5347 = vmatprep.subr.bf16.mxu1 %v7322_v49  ;;  %v9384_v17 = vld [vmem:[#allocation21_spill] sm:$0xff]  ;;  %v9391_v49 = vld [vmem:[#allocation28_spill] sm:$0xff] }
 0x185   :  { %987 = vmatprep.mubr.f32.mxu0 %v9382_v40  ;;  %1058 = vmatprep.mubr.f32.mxu1 %v9382_v40 }
 0x187   :  { %5317 = vmatpush1.bf16.msra.mxu0 %v7290_v21  ;;  %5349 = vmatpush1.bf16.msra.mxu1 %v7329_v59  ;;  %v9385_v21 = vld [vmem:[#allocation22_spill] sm:$0xff] }
 0x188   :  { %5319 = vmatprep.subr.bf16.mxu0 %v7300_v29  ;;  %5351 = vmatprep.subr.bf16.mxu1 %v7336_v61  ;;  %v9386_v29 = vld [vmem:[#allocation23_spill] sm:$0xff]  ;;  %v9393_v59 = vld [vmem:[#allocation30_spill] sm:$0xff]  ;;  %v9395_v61 = vld [vmem:[#allocation32_spill] sm:$0xff] }
 0x18b   :  { %5321 = vmatpush1.bf16.msra.mxu0 %v7309_v37  ;;  %5353 = vmatpush1.bf16.msra.mxu1 %v7343_v9  ;;  %v9387_v37 = vld [vmem:[#allocation24_spill] sm:$0xff]  ;;  %v9397_v9 = vld [vmem:[#allocation34_spill] sm:$0xff] }
 0x18c   :  { %5323 = vmatprep.subr.bf16.mxu0 %v7313_v41  ;;  %5355 = vmatprep.subr.bf16.mxu1 %v7350_v11  ;;  %v9388_v41 = vld [vmem:[#allocation25_spill] sm:$0xff]  ;;  %v9399_v11 = vld [vmem:[#allocation36_spill] sm:$0xff] }
 0x18f   :  { %5325 = vmatpush1.bf16.msra.mxu0 %v7320_v48  ;;  %5357 = vmatpush1.bf16.msra.mxu1 %v7356_v24  ;;  %v9390_v48 = vld [vmem:[#allocation27_spill] sm:$0xff]  ;;  %v9401_v24 = vld [vmem:[#allocation38_spill] sm:$0xff] }
 0x190   :  { %5327 = vmatprep.subr.bf16.mxu0 %v7325_v53  ;;  %5359 = vmatprep.subr.bf16.mxu1 %v7362_v26  ;;  %v9392_v53 = vld [vmem:[#allocation29_spill] sm:$0xff]  ;;  %v9403_v26 = vld [vmem:[#allocation40_spill] sm:$0xff] }
 0x193   :  { %5329 = vmatpush1.bf16.msra.mxu0 %v7334_v60  ;;  %5361 = vmatpush1.bf16.msra.mxu1 %v7368_v36  ;;  %v9394_v60 = vld [vmem:[#allocation31_spill] sm:$0xff]  ;;  %v9405_v36 = vld [vmem:[#allocation42_spill] sm:$0xff] }
 0x194   :  { %5331 = vmatprep.subr.bf16.mxu0 %v7339_v2  ;;  %5363 = vmatprep.subr.bf16.mxu1 %v7374_v39  ;;  %v9396_v2 = vld [vmem:[#allocation33_spill] sm:$0xff]  ;;  %v9407_v39 = vld [vmem:[#allocation44_spill] sm:$0xff] }
 0x197   :  { %5333 = vmatpush1.bf16.msra.mxu0 %v7348_v10  ;;  %5365 = vmatpush1.bf16.msra.mxu1 %v7378_v45  ;;  %v9398_v10 = vld [vmem:[#allocation35_spill] sm:$0xff]  ;;  %v9408_v45 = vld [vmem:[#allocation45_spill] sm:$0xff] }
 0x198   :  { %5335 = vmatprep.subr.bf16.mxu0 %v7353_v16  ;;  %5367 = vmatprep.subr.bf16.mxu1 %v7385_v50  ;;  %v9400_v16 = vld [vmem:[#allocation37_spill] sm:$0xff]  ;;  %v9409_v50 = vld [vmem:[#allocation46_spill] sm:$0xff] }
 0x19b   :  { %5337 = vmatpush1.bf16.msra.mxu0 %v7360_v25  ;;  %5369 = vmatpush1.bf16.msra.mxu1 %v7389_v56  ;;  %v9402_v25 = vld [vmem:[#allocation39_spill] sm:$0xff] }
 0x19c   :  { %5339 = vmatprep.subr.bf16.mxu0 %v7365_v31  ;;  %5371 = vmatprep.subr.bf16.mxu1 %v7392_v57  ;;  %v9404_v31 = vld [vmem:[#allocation41_spill] sm:$0xff]  ;;  %v9410_v56 = vld [vmem:[#allocation47_spill] sm:$0xff]  ;;  %v9411_v57 = vld [vmem:[#allocation48_spill] sm:$0xff] }
 0x19f   :  { %5341 = vmatpush1.bf16.msra.mxu0 %v7372_v38  ;;  %5373 = vmatpush1.bf16.msra.mxu1 %v7395_v63  ;;  %v9406_v38 = vld [vmem:[#allocation43_spill] sm:$0xff]  ;;  %v9412_v63 = vld [vmem:[#allocation49_spill] sm:$0xff] }
 0x1a0   :  { %5375 = vmatprep.subr.bf16.mxu0 %v7400_v5  ;;  %5439 = vmatprep.subr.bf16.mxu1 %v7402_v7  ;;  %v9413_v5 = vld [vmem:[#allocation50_spill] sm:$0xff]  ;;  %v9414_v7 = vld [vmem:[#allocation51_spill] sm:$0xff] }
 0x1a2   :  { %988 = vmatmul.mubr.f32.vlgmr.msra.gmra.mrb[4].mxu0 %v541_v46  ;;  %1059 = vmatmul.mubr.f32.vlgmr.msra.gmra.mrb[12].mxu1 %v541_v46  ;;  %v1439_v46 = vld [vmem:[#allocation3 + $0x38] sm:$0xff] }
 0x1a3   :  { %5377 = vmatpush1.bf16.msra.mxu0 %v7406_v18  ;;  %5441 = vmatpush1.bf16.msra.mxu1 %v7408_v23  ;;  %v9415_v18 = vld [vmem:[#allocation52_spill] sm:$0xff]  ;;  %v9416_v23 = vld [vmem:[#allocation53_spill] sm:$0xff] }
 0x1a4   :  { %5379 = vmatprep.subr.bf16.mxu0 %v7410_v27  ;;  %5443 = vmatprep.subr.bf16.mxu1 %v7413_v33  ;;  %v9417_v27 = vld [vmem:[#allocation54_spill] sm:$0xff]  ;;  %v9418_v33 = vld [vmem:[#allocation55_spill] sm:$0xff] }
 0x1a7   :  { %5381 = vmatpush1.bf16.msra.mxu0 %v7417_v43  ;;  %5445 = vmatpush1.bf16.msra.mxu1 %v7419_v44  ;;  %v9419_v43 = vld [vmem:[#allocation56_spill] sm:$0xff]  ;;  %v9420_v44 = vld [vmem:[#allocation57_spill] sm:$0xff] }
 0x1a8   :  { %5383 = vmatprep.subr.bf16.mxu0 %v7422_v54  ;;  %5447 = vmatprep.subr.bf16.mxu1 %v7424_v1  ;;  %v9421_v54 = vld [vmem:[#allocation58_spill] sm:$0xff]  ;;  %v9422_v1 = vld [vmem:[#allocation59_spill] sm:$0xff] }
 0x1ab   :  { %5385 = vmatpush1.bf16.msra.mxu0 %v7427_v12  ;;  %5449 = vmatpush1.bf16.msra.mxu1 %v7431_v20  ;;  %v9423_v12 = vld [vmem:[#allocation60_spill] sm:$0xff]  ;;  %v9424_v20 = vld [vmem:[#allocation61_spill] sm:$0xff] }
 0x1ac   :  { %5387 = vmatprep.subr.bf16.mxu0 %v9383_v13  ;;  %5451 = vmatprep.subr.bf16.mxu1 %v9384_v17  ;;  %v7736_v13 = vpack.c.bf16 %v1439_v46, %v1435_v55  ;;  %v670_v17 = vld [vmem:[#allocation9] sm:$0xf] }
 0x1af   :  { %5389 = vmatpush1.bf16.msra.mxu0 %v9385_v21  ;;  %5453 = vmatpush1.bf16.msra.mxu1 %v9386_v29  ;;  %v9435_v21 = vld [vmem:[#allocation72_spill] sm:$0xff] }
 0x1b0   :  { %5391 = vmatprep.subr.bf16.mxu0 %v9387_v37  ;;  %5455 = vmatprep.subr.bf16.mxu1 %v9388_v41  ;;  %v675_v29 = vrot.slane %v670_v17, %v9435_v21  ;;  %v9436_v37 = vld [vmem:[#allocation73_spill] sm:$0xff] }
 0x1b1   :  { %v679_v41 = vrot.slane %v670_v17, %v9436_v37 }
 0x1b3   :  { %5393 = vmatpush1.bf16.msra.mxu0 %v9389_v47  ;;  %5457 = vmatpush1.bf16.msra.mxu1 %v9390_v48 }
 0x1b4   :  { %5395 = vmatprep.subr.bf16.mxu0 %v9391_v49  ;;  %5459 = vmatprep.subr.bf16.mxu1 %v9392_v53 }
 0x1b7   :  { %5397 = vmatpush1.bf16.msra.mxu0 %v9393_v59  ;;  %5461 = vmatpush1.bf16.msra.mxu1 %v9394_v60 }
 0x1b8   :  { %5399 = vmatprep.subr.bf16.mxu0 %v9395_v61  ;;  %5463 = vmatprep.subr.bf16.mxu1 %v9396_v2 }
 0x1bb   :  { %5401 = vmatpush1.bf16.msra.mxu0 %v9397_v9  ;;  %5465 = vmatpush1.bf16.msra.mxu1 %v9398_v10  ;;  %v9437_v9 = vld [vmem:[#allocation76_spill] sm:$0xff] }
 0x1bc   :  { %5403 = vmatprep.subr.bf16.mxu0 %v9399_v11  ;;  %5467 = vmatprep.subr.bf16.mxu1 %v9400_v16  ;;  %v683_v10 = vrot.slane %v670_v17, %v9437_v9  ;;  %v687_v11 = vrot.slane %v670_v17, %v7611_v19 }
 0x1bf   :  { %5405 = vmatpush1.bf16.msra.mxu0 %v9401_v24  ;;  %5469 = vmatpush1.bf16.msra.mxu1 %v9402_v25 }
 0x1c0   :  { %5407 = vmatprep.subr.bf16.mxu0 %v9403_v26  ;;  %5471 = vmatprep.subr.bf16.mxu1 %v9404_v31 }
 0x1c3   :  { %5409 = vmatpush1.bf16.msra.mxu0 %v9405_v36  ;;  %5473 = vmatpush1.bf16.msra.mxu1 %v9406_v38 }
 0x1c4   :  { %5411 = vmatprep.subr.bf16.mxu0 %v9407_v39  ;;  %5475 = vmatprep.subr.bf16.mxu1 %v9408_v45  ;;  %v4999_v39 = vld [vmem:[%s9072_s2 + $0x2] sm:$0x3]  ;;  %s7129_s2 = smov [#allocation12]  }
 0x1c5   :  { %s4966_s13 = sshll.u32 %s7129_s2, 4  ;;  %s4967_s13 = int_to_ptr.vmem [resolvable:$true] %s4966_s13 }
 0x1c6   :  { %s7065_s14 = scalar_lea.vmem %s4967_s13, 64  ;;  %p7070_p13 = scmp.lt.s32.totalorder %s4967_s13, %s4967_s13 }
 0x1c7   :  { %5413 = vmatpush1.bf16.msra.mxu0 %v9409_v50  ;;  %5477 = vmatpush1.bf16.msra.mxu1 %v9410_v56  ;;  %p7066_p12 = scmp.ne.s32.totalorder %s4967_s13, %s7065_s14  ;;  %p7071_p0 = scmp.lt.s32.totalorder %s7065_s14, %s7065_s14 }
 0x1c8   :  { %5415 = vmatprep.subr.bf16.mxu0 %v9411_v57  ;;  %5479 = vmatprep.subr.bf16.mxu1 %v9412_v63  ;;  %v114_v57 = vsel %vm105_vm1, %v4999_v39, 0.0  ;;  %v1447_v39 = vld [vmem:[#allocation3 + $0x78] sm:$0xff] }
 0x1c9   :  { %p7072_p1 = por %p7071_p0, %p7070_p13 }
 0x1cb   :  { %5417 = vmatpush1.bf16.msra.mxu0 %v9413_v5  ;;  %5481 = vmatpush1.bf16.msra.mxu1 %v9414_v7  ;;  %p7073_p2 = pnand %p7072_p1, %p7066_p12 }
 0x1cc   :  { %5419 = vmatprep.subr.bf16.mxu0 %v9415_v18  ;;  %5483 = vmatprep.subr.bf16.mxu1 %v9416_v23 }
 0x1cf   :  { %5421 = vmatpush1.bf16.msra.mxu0 %v9417_v27  ;;  %5485 = vmatpush1.bf16.msra.mxu1 %v9418_v33 }
 0x1d0   :  { %5423 = vmatprep.subr.bf16.mxu0 %v9419_v43  ;;  %5487 = vmatprep.subr.bf16.mxu1 %v9420_v44 }
 0x1d3   :  { %5425 = vmatpush1.bf16.msra.mxu0 %v9421_v54  ;;  %5489 = vmatpush1.bf16.msra.mxu1 %v9422_v1 }
 0x1d4   :  { %5427 = vmatprep.subr.bf16.mxu0 %v9423_v12  ;;  %5491 = vmatprep.subr.bf16.mxu1 %v9424_v20 }
 0x1d7   :  { %5429 = vmatpush1.bf16.msra.mxu0 %v9425_v14  ;;  %5493 = vmatpush1.bf16.msra.mxu1 %v9426_v8 }
 0x1d8   :  { %5431 = vmatprep.subr.bf16.mxu0 %v9427_v0  ;;  %5495 = vmatprep.subr.bf16.mxu1 %v9428_v22 }
 0x1db   :  { %5433 = vmatpush1.bf16.msra.mxu0 %v9429_v35  ;;  %5497 = vmatpush1.bf16.msra.mxu1 %v9430_v58 }
 0x1dc   :  { %5435 = vmatprep.subr.bf16.mxu0 %v9431_v30  ;;  %5499 = vmatprep.subr.bf16.mxu1 %v9432_v52 }
 0x1df   :  { %5437 = vmatpush1.bf16.msra.mxu0 %v9433_v3  ;;  %5501 = vmatpush1.bf16.msra.mxu1 %v9434_v34 }
 0x1e0   :  { %5503 = vmatprep.subr.bf16.mxu0 %v7734_v15  ;;  %5535 = vmatprep.subr.bf16.mxu1 %v7736_v13 }
 0x255   :  { %v758_v47 = vpop.f32.mrb[2].mxu0  ;;  %v829_v48 = vpop.f32.mrb[10].mxu1 }
 0x256   :  { %v759_v49 = vadd.f32 %v758_v47, %v675_v29  ;;  %v760_v53 = vpop.f32.mrb[3].mxu0  ;;  %v831_v59 = vpop.f32.mrb[11].mxu1  ;;  %v830_v16 = vadd.f32 %v829_v48, %v683_v10  ;;  %v1432_v10 = vld [vmem:[#allocation3] sm:$0xff] }
 0x257   :  { %v761_v60 = vadd.f32 %v760_v53, %v679_v41  ;;  %v832_v24 = vadd.f32 %v831_v59, %v687_v11  ;;  %v1436_v11 = vld [vmem:[#allocation3 + $0x20] sm:$0xff] }
 0x258   :  { %v5011_v61 = vmul.f32 -1.442695, %v759_v49  ;;  %v5013_v25 = vmul.f32 -1.442695, %v830_v16  ;;  %v1101_v49 = vrot.slane %v7635_v6, 6 }
 0x259   :  { %v5012_v2 = vmul.f32 -1.442695, %v761_v60 }
 0x25a   :  { %6715 = vpow2.f32 %v5011_v61 }
 0x25b   :  { %6717 = vpow2.f32 %v5012_v2 }
 0x25c   :  { %6719 = vtanh.f32 %v832_v24  ;;  %v1434_v24 = vld [vmem:[#allocation3 + $0x10] sm:$0xff] }
 0x25d   :  { %6721 = vpow2.f32 %v5013_v25  ;;  %v1438_v25 = vld [vmem:[#allocation3 + $0x30] sm:$0xff] }
 0x264   :  { %v6716_v26 = vpop.eup %6715 }
 0x265   :  { %v843_v31 = vadd.f32 1.0, %v6716_v26  ;;  %v6718_v36 = vpop.eup %6717  ;;  %v1441_v26 = vld [vmem:[#allocation3 + $0x48] sm:$0xff] }
 0x266   :  { %v844_v38 = vadd.f32 1.0, %v6718_v36  ;;  %v6720_v45 = vpop.eup %6719  ;;  %v1445_v36 = vld [vmem:[#allocation3 + $0x68] sm:$0xff] }
 0x267   :  { %6723 = vrcp.f32 %v843_v31  ;;  %v6722_v50 = vpop.eup %6721 }
 0x268   :  { %6725 = vrcp.f32 %v844_v38  ;;  %v845_v7 = vadd.f32 1.0, %v6722_v50  ;;  %v1443_v38 = vld [vmem:[#allocation3 + $0x58] sm:$0xff]  ;;  %v7761_v50 = vpack.c.bf16 %v1438_v25, %v1434_v24  ;;  %v1466_v24 = vld [vmem:[#allocation3 + $0x110] sm:$0xff] }
 0x269   :  { %v1470_v25 = vld [vmem:[#allocation3 + $0x130] sm:$0xff] }
 0x26a   :  { %6727 = vrcp.f32 %v845_v7  ;;  %v7767_v7 = vpack.c.bf16 %v1447_v39, %v1443_v38  ;;  %v1479_v38 = vld [vmem:[#allocation3 + $0x178] sm:$0xff] }
 0x271   :  { %v6724_v56 = vpop.eup %6723 }
 0x272   :  { %v854_v63 = vmul.f32 %v6724_v56, %v6720_v45  ;;  %v6726_v5 = vpop.eup %6725  ;;  %v7759_v45 = vpack.c.bf16 %v1436_v11, %v1432_v10  ;;  %v1440_v56 = vld [vmem:[#allocation3 + $0x40] sm:$0xff] }
 0x273   :  { %v853_v18 = vmul.f32 %v6726_v5, %v114_v57  ;;  %v1444_v57 = vld [vmem:[#allocation3 + $0x60] sm:$0xff]  ;;  %v7765_v5 = vpack.c.bf16 %v1445_v36, %v1441_v26  ;;  %v1473_v26 = vld [vmem:[#allocation3 + $0x148] sm:$0xff]  ;;  %v1475_v36 = vld [vmem:[#allocation3 + $0x158] sm:$0xff] }
 0x274   :  { %v6728_v58 = vpop.eup %6727  ;;  %v1468_v10 = vld [vmem:[#allocation3 + $0x120] sm:$0xff] }
 0x275   :  { %v989_v23 = vpop.f32.mrb[4].mxu0  ;;  %v1060_v27 = vpop.f32.mrb[12].mxu1  ;;  %v7748_v33 = vadd.f32 %v854_v63, %v853_v18  ;;  %v1442_v18 = vld [vmem:[#allocation3 + $0x50] sm:$0xff] }
 0x276   :  { %v1069_v43 = vrot.slane %v989_v23, 6  ;;  %v991_v44 = vpop.f32.mrb[5].mxu0  ;;  %v1062_v54 = vpop.f32.mrb[13].mxu1  ;;  %v1071_v0 = vrot.slane %v1060_v27, 6  ;;  %v1446_v23 = vld [vmem:[#allocation3 + $0x70] sm:$0xff]  ;;  %v1449_v27 = vld [vmem:[#allocation3 + $0x88] sm:$0xff] }
 0x277   :  { %v1070_v1 = vrot.slane %v991_v44, 6  ;;  %6729 = vtanh.f32 %v7748_v33  ;;  %v1072_v22 = vrot.slane %v1062_v54, 6  ;;  %v1451_v44 = vld [vmem:[#allocation3 + $0x98] sm:$0xff] }
 0x278   :  { %v1077_v12 = vadd.f32 %v1069_v43, %v7619_v51  ;;  %v1079_v35 = vadd.f32 %v1071_v0, %v7625_v28  ;;  %v1453_v43 = vld [vmem:[#allocation3 + $0xa8] sm:$0xff]  ;;  %v1455_v54 = vld [vmem:[#allocation3 + $0xb8] sm:$0xff] }
 0x279   :  { %v1078_v20 = vadd.f32 %v1070_v1, %v7621_v42  ;;  %v1080_v52 = vadd.f32 %v1072_v22, %v7627_v32  ;;  %v7773_v1 = vpack.c.bf16 %v1444_v57, %v1440_v56  ;;  %v7781_v0 = vpack.c.bf16 %v1455_v54, %v1451_v44  ;;  %v1450_v22 = vld [vmem:[#allocation3 + $0x90] sm:$0xff]  ;;  %v1472_v56 = vld [vmem:[#allocation3 + $0x140] sm:$0xff]  ;;  %v1481_v44 = vld [vmem:[#allocation3 + $0x188] sm:$0xff] }
 0x27a   :  { %v5014_v14 = vmul.f32 -1.442695, %v1077_v12  ;;  %v5016_v34 = vmul.f32 -1.442695, %v1079_v35  ;;  %v7775_v12 = vpack.c.bf16 %v1446_v23, %v1442_v18  ;;  %v1454_v35 = vld [vmem:[#allocation3 + $0xb0] sm:$0xff]  ;;  %v1476_v57 = vld [vmem:[#allocation3 + $0x160] sm:$0xff]  ;;  %v7819_v23 = vpack.c.bf16 %v1479_v38, %v1475_v36 }
 0x27b   :  { %v5015_v8 = vmul.f32 -1.442695, %v1078_v20  ;;  %v1448_v20 = vld [vmem:[#allocation3 + $0x80] sm:$0xff]  ;;  %v1485_v54 = vld [vmem:[#allocation3 + $0x1a8] sm:$0xff] }
 0x27c   :  { %6731 = vpow2.f32 %v5014_v14  ;;  %v1452_v14 = vld [vmem:[#allocation3 + $0xa0] sm:$0xff] }
 0x27d   :  { %6733 = vpow2.f32 %v5015_v8  ;;  %v7779_v8 = vpack.c.bf16 %v1453_v43, %v1449_v27  ;;  %v1474_v27 = vld [vmem:[#allocation3 + $0x150] sm:$0xff] }
 0x27e   :  { %6735 = vtanh.f32 %v1080_v52  ;;  %v1459_v52 = vld [vmem:[#allocation3 + $0xd8] sm:$0xff]  ;;  %v1478_v43 = vld [vmem:[#allocation3 + $0x170] sm:$0xff] }
 0x27f   :  { %6737 = vpow2.f32 %v5016_v34  ;;  %v7787_v34 = vpack.c.bf16 %v1452_v14, %v1448_v20  ;;  %v1483_v20 = vld [vmem:[#allocation3 + $0x198] sm:$0xff] }
 0x280   :  { %v1487_v14 = vld [vmem:[#allocation3 + $0x1b8] sm:$0xff] }
 0x281   :  { %v6730_v30 = vpop.eup %6729 }
 0x282   :  { %v857_v3 = vmul.f32 %v6730_v30, %v6728_v58  ;;  %v1457_v58 = vld [vmem:[#allocation3 + $0xc8] sm:$0xff] }
 0x283   :  { %v1461_v30 = vld [vmem:[#allocation3 + $0xe8] sm:$0xff] }
 0x284   :  { %858 = vst [vmem:[#allocation2] sm:$0x3] %v857_v3  ;;  %v1109_v4 = vrot.slane %v857_v3, 6  ;;  %v1463_v3 = vld [vmem:[#allocation3 + $0xf8] sm:$0xff] }
 0x286   :  { %v6732_v62 = vpop.eup %6731  ;;  %v1262_v46 = vrot.slane %v1109_v4, 2  ;;  %v7789_v4 = vpack.c.bf16 %v1454_v35, %v1450_v22  ;;  %v7823_v22 = vpack.c.bf16 %v1476_v57, %v1472_v56  ;;  %v7825_v35 = vpack.c.bf16 %v1478_v43, %v1474_v27  ;;  %v1684_v56 = vld [vmem:[#allocation8 + $0x8] sm:$0xff]  ;;  %v1686_v27 = vld [vmem:[#allocation8 + $0x18] sm:$0xff] }
 0x287   :  { %v1090_v55 = vadd.f32 1.0, %v6732_v62  ;;  %v6734_v17 = vpop.eup %6733  ;;  %v1456_v62 = vld [vmem:[#allocation3 + $0xc0] sm:$0xff]  ;;  %v1688_v57 = vld [vmem:[#allocation8 + $0x28] sm:$0xff] }
 0x288   :  { %v1091_v29 = vadd.f32 1.0, %v6734_v17  ;;  %1329 = vmatprep.mubr.f32.mxu0 %v1262_v46  ;;  %1400 = vmatprep.mubr.f32.mxu1 %v1262_v46  ;;  %v6736_v41 = vpop.eup %6735  ;;  %v7793_v46 = vpack.c.bf16 %v1461_v30, %v1457_v58  ;;  %v7795_v17 = vpack.c.bf16 %v1463_v3, %v1459_v52  ;;  %v1480_v58 = vld [vmem:[#allocation3 + $0x180] sm:$0xff]  ;;  %v7829_v52 = vpack.c.bf16 %v1485_v54, %v1481_v44 }
 0x289   :  { %6739 = vrcp.f32 %v1090_v55  ;;  %v6738_v47 = vpop.eup %6737  ;;  %v1460_v55 = vld [vmem:[#allocation3 + $0xe0] sm:$0xff]  ;;  %v7831_v3 = vpack.c.bf16 %v1487_v14, %v1483_v20  ;;  %v7857_v43 = vpack.c.bf16 %v1688_v57, %v1684_v56  ;;  %v1693_v56 = vld [vmem:[#allocation8 + $0x50] sm:$0xff] }
 0x28a   :  { %6741 = vrcp.f32 %v1091_v29  ;;  %v1092_v60 = vadd.f32 1.0, %v6738_v47  ;;  %v1458_v29 = vld [vmem:[#allocation3 + $0xd0] sm:$0xff]  ;;  %v1465_v47 = vld [vmem:[#allocation3 + $0x108] sm:$0xff]  ;;  %v1484_v30 = vld [vmem:[#allocation3 + $0x1a0] sm:$0xff] }
 0x28b   :  { %v1690_v44 = vld [vmem:[#allocation8 + $0x38] sm:$0xff]  ;;  %v1683_v54 = vld [vmem:[#allocation8] sm:$0xff]  ;;  %v1697_v57 = vld [vmem:[#allocation8 + $0x70] sm:$0xff] }
 0x28c   :  { %6743 = vrcp.f32 %v1092_v60  ;;  %v1687_v20 = vld [vmem:[#allocation8 + $0x20] sm:$0xff]  ;;  %v7859_v14 = vpack.c.bf16 %v1690_v44, %v1686_v27  ;;  %v7876_v27 = vpack.c.bf16 %v1697_v57, %v1693_v56  ;;  %v1700_v44 = vld [vmem:[#allocation8 + $0x88] sm:$0xff] }
 0x28d   :  { %v1708_v57 = vld [vmem:[#allocation8 + $0xc8] sm:$0xff] }
 0x28e   :  { %9441 = vst [vmem:[#allocation23_spill] sm:$0xff] %v7876_v27 }
 0x293   :  { %v6740_v48 = vpop.eup %6739 }
 0x294   :  { %v1104_v53 = vmul.f32 %v6740_v48, %v6736_v41  ;;  %v6742_v59 = vpop.eup %6741  ;;  %v1462_v41 = vld [vmem:[#allocation3 + $0xf0] sm:$0xff]  ;;  %v1469_v48 = vld [vmem:[#allocation3 + $0x128] sm:$0xff] }
 0x295   :  { %v1103_v61 = vmul.f32 %v6742_v59, %v1101_v49  ;;  %v1467_v49 = vld [vmem:[#allocation3 + $0x118] sm:$0xff]  ;;  %v7799_v59 = vpack.c.bf16 %v1460_v55, %v1456_v62  ;;  %v7801_v60 = vpack.c.bf16 %v1462_v41, %v1458_v29  ;;  %v7805_v11 = vpack.c.bf16 %v1469_v48, %v1465_v47  ;;  %v1482_v62 = vld [vmem:[#allocation3 + $0x190] sm:$0xff]  ;;  %v1489_v29 = vld [vmem:[#allocation3 + $0x1c8] sm:$0xff] }
 0x296   :  { %v6744_v16 = vpop.eup %6743  ;;  %v1486_v55 = vld [vmem:[#allocation3 + $0x1b0] sm:$0xff]  ;;  %v1493_v41 = vld [vmem:[#allocation3 + $0x1e8] sm:$0xff]  ;;  %v1491_v47 = vld [vmem:[#allocation3 + $0x1d8] sm:$0xff] }
 0x297   :  { %v7756_v2 = vadd.f32 %v1104_v53, %v1103_v61  ;;  %v1471_v53 = vld [vmem:[#allocation3 + $0x138] sm:$0xff]  ;;  %v1464_v61 = vld [vmem:[#allocation3 + $0x100] sm:$0xff] }
 0x298   :  { %v7811_v39 = vpack.c.bf16 %v1468_v10, %v1464_v61  ;;  %v1495_v48 = vld [vmem:[#allocation3 + $0x1f8] sm:$0xff]  ;;  %v1488_v61 = vld [vmem:[#allocation3 + $0x1c0] sm:$0xff]  ;;  %v7841_v10 = vpack.c.bf16 %v1493_v41, %v1489_v29  ;;  %v1696_v29 = vld [vmem:[#allocation8 + $0x68] sm:$0xff] }
 0x299   :  { %6745 = vtanh.f32 %v7756_v2  ;;  %v1694_v41 = vld [vmem:[#allocation8 + $0x58] sm:$0xff] }
 0x2a3   :  { %v6746_v31 = vpop.eup %6745 }
 0x2a4   :  { %v1107_v6 = vmul.f32 %v6746_v31, %v6744_v16  ;;  %v7807_v16 = vpack.c.bf16 %v1471_v53, %v1467_v49  ;;  %v1477_v31 = vld [vmem:[#allocation3 + $0x168] sm:$0xff]  ;;  %v7835_v49 = vpack.c.bf16 %v1484_v30, %v1480_v58  ;;  %v7837_v53 = vpack.c.bf16 %v1486_v55, %v1482_v62  ;;  %v1685_v30 = vld [vmem:[#allocation8 + $0x10] sm:$0xff] }
 0x2a5   :  { %v7817_v18 = vpack.c.bf16 %v1477_v31, %v1473_v26  ;;  %v1490_v26 = vld [vmem:[#allocation3 + $0x1d0] sm:$0xff]  ;;  %v7861_v58 = vpack.c.bf16 %v1687_v20, %v1683_v54  ;;  %v1702_v20 = vld [vmem:[#allocation8 + $0x98] sm:$0xff] }
 0x2a6   :  { %v7763_v63 = vrot.slane %v1107_v6, 2  ;;  %v7813_v6 = vpack.c.bf16 %v1470_v25, %v1466_v24  ;;  %v7843_v24 = vpack.c.bf16 %v1495_v48, %v1491_v47  ;;  %v1492_v25 = vld [vmem:[#allocation3 + $0x1e0] sm:$0xff]  ;;  %v1494_v31 = vld [vmem:[#allocation3 + $0x1f0] sm:$0xff] }
 0x2a7   :  { %v7847_v36 = vpack.c.bf16 %v1492_v25, %v1488_v61  ;;  %v7849_v38 = vpack.c.bf16 %v1494_v31, %v1490_v26  ;;  %v1689_v62 = vld [vmem:[#allocation8 + $0x30] sm:$0xff]  ;;  %v1698_v48 = vld [vmem:[#allocation8 + $0x78] sm:$0xff]  ;;  %v1691_v61 = vld [vmem:[#allocation8 + $0x40] sm:$0xff] }
 0x2a8   :  { %1330 = vmatmul.mubr.f32.vlgmr.msra.gmra.mrb[6].mxu0 %v7763_v63  ;;  %1401 = vmatmul.mubr.f32.vlgmr.msra.gmra.mrb[14].mxu1 %v7763_v63  ;;  %v7864_v55 = vpack.c.bf16 %v1689_v62, %v1685_v30  ;;  %v1695_v25 = vld [vmem:[#allocation8 + $0x60] sm:$0xff]  ;;  %v7871_v26 = vpack.c.bf16 %v1698_v48, %v1694_v41  ;;  %v1704_v54 = vld [vmem:[#allocation8 + $0xa8] sm:$0xff]  ;;  %v1706_v62 = vld [vmem:[#allocation8 + $0xb8] sm:$0xff] }
 0x2a9   :  { %5505 = vmatpush1.bf16.msra.mxu0 %v7759_v45  ;;  %5537 = vmatpush1.bf16.msra.mxu1 %v7761_v50  ;;  %v7873_v31 = vpack.c.bf16 %v1695_v25, %v1691_v61  ;;  %v7881_v30 = vpack.c.bf16 %v1704_v54, %v1700_v44  ;;  %v7883_v41 = vpack.c.bf16 %v1706_v62, %v1702_v20  ;;  %v1701_v61 = vld [vmem:[#allocation8 + $0x90] sm:$0xff]  ;;  %v1712_v44 = vld [vmem:[#allocation8 + $0xe8] sm:$0xff]  ;;  %v1710_v54 = vld [vmem:[#allocation8 + $0xd8] sm:$0xff] }
 0x2aa   :  { %5507 = vmatprep.subr.bf16.mxu0 %v7765_v5  ;;  %5539 = vmatprep.subr.bf16.mxu1 %v7767_v7  ;;  %9439 = vst [vmem:[#allocation21_spill] sm:$0xff] %v7871_v26  ;;  %v1705_v25 = vld [vmem:[#allocation8 + $0xb0] sm:$0xff]  ;;  %v1714_v20 = vld [vmem:[#allocation8 + $0xf8] sm:$0xff]  ;;  %v1707_v62 = vld [vmem:[#allocation8 + $0xc0] sm:$0xff] }
 0x2ab   :  { %1560 = vmatprep.mubr.f32.mxu0 %v9382_v40  ;;  %1631 = vmatprep.mubr.f32.mxu1 %v9382_v40  ;;  %9440 = vst [vmem:[#allocation22_spill] sm:$0xff] %v7873_v31  ;;  %9442 = vst [vmem:[#allocation24_spill] sm:$0xff] %v7881_v30  ;;  %v7888_v56 = vpack.c.bf16 %v1705_v25, %v1701_v61  ;;  %v1709_v61 = vld [vmem:[#allocation8 + $0xd0] sm:$0xff] }
 0x2ac   :  { %9443 = vst [vmem:[#allocation25_spill] sm:$0xff] %v7883_v41  ;;  %v1713_v25 = vld [vmem:[#allocation8 + $0xf0] sm:$0xff] }
 0x2ad   :  { %5509 = vmatpush1.bf16.msra.mxu0 %v7773_v1  ;;  %5541 = vmatpush1.bf16.msra.mxu1 %v7775_v12  ;;  %9445 = vst [vmem:[#allocation27_spill] sm:$0xff] %v7888_v56 }
 0x2ae   :  { %5511 = vmatprep.subr.bf16.mxu0 %v7779_v8  ;;  %5543 = vmatprep.subr.bf16.mxu1 %v7781_v0 }
 0x2b1   :  { %5513 = vmatpush1.bf16.msra.mxu0 %v7787_v34  ;;  %5545 = vmatpush1.bf16.msra.mxu1 %v7789_v4 }
 0x2b2   :  { %5515 = vmatprep.subr.bf16.mxu0 %v7793_v46  ;;  %5547 = vmatprep.subr.bf16.mxu1 %v7795_v17 }
 0x2b5   :  { %5517 = vmatpush1.bf16.msra.mxu0 %v7799_v59  ;;  %5549 = vmatpush1.bf16.msra.mxu1 %v7801_v60 }
 0x2b6   :  { %5519 = vmatprep.subr.bf16.mxu0 %v7805_v11  ;;  %5551 = vmatprep.subr.bf16.mxu1 %v7807_v16 }
 0x2b9   :  { %5521 = vmatpush1.bf16.msra.mxu0 %v7811_v39  ;;  %5553 = vmatpush1.bf16.msra.mxu1 %v7813_v6 }
 0x2ba   :  { %5523 = vmatprep.subr.bf16.mxu0 %v7817_v18  ;;  %5555 = vmatprep.subr.bf16.mxu1 %v7819_v23 }
 0x2bd   :  { %5525 = vmatpush1.bf16.msra.mxu0 %v7823_v22  ;;  %5557 = vmatpush1.bf16.msra.mxu1 %v7825_v35 }
 0x2be   :  { %5527 = vmatprep.subr.bf16.mxu0 %v7829_v52  ;;  %5559 = vmatprep.subr.bf16.mxu1 %v7831_v3 }
 0x2c1   :  { %5529 = vmatpush1.bf16.msra.mxu0 %v7835_v49  ;;  %5561 = vmatpush1.bf16.msra.mxu1 %v7837_v53 }
 0x2c2   :  { %5531 = vmatprep.subr.bf16.mxu0 %v7841_v10  ;;  %5563 = vmatprep.subr.bf16.mxu1 %v7843_v24 }
 0x2c5   :  { %5533 = vmatpush1.bf16.msra.mxu0 %v7847_v36  ;;  %5565 = vmatpush1.bf16.msra.mxu1 %v7849_v38 }
 0x2c6   :  { %5567 = vmatprep.subr.bf16.mxu0 %v7857_v43  ;;  %5631 = vmatprep.subr.bf16.mxu1 %v7859_v14 }
 0x2c8   :  { %1561 = vmatmul.mubr.f32.vlgmr.msra.gmra.mrb[8].mxu0 %v7763_v63  ;;  %1632 = vmatmul.mubr.f32.vlgmr.msra.gmra.mrb[16].mxu1 %v7763_v63  ;;  %v1692_v63 = vld [vmem:[#allocation8 + $0x48] sm:$0xff] }
 0x2c9   :  { %5569 = vmatpush1.bf16.msra.mxu0 %v7861_v58  ;;  %5633 = vmatpush1.bf16.msra.mxu1 %v7864_v55  ;;  %v7869_v47 = vpack.c.bf16 %v1696_v29, %v1692_v63  ;;  %v1699_v63 = vld [vmem:[#allocation8 + $0x80] sm:$0xff] }
 0x2ca   :  { %5635 = vmatprep.subr.bf16.mxu1 %v7871_v26  ;;  %v1703_v29 = vld [vmem:[#allocation8 + $0xa0] sm:$0xff]  ;;  %v1798_v26 = vld [vmem:[#allocation8 + $0x398] sm:$0xff] }
 0x2cb   :  { %9438 = vst [vmem:[#allocation20_spill] sm:$0xff] %v7869_v47  ;;  %5571 = vmatprep.subr.bf16.mxu0 %v7869_v47  ;;  %v7885_v48 = vpack.c.bf16 %v1703_v29, %v1699_v63  ;;  %v1711_v63 = vld [vmem:[#allocation8 + $0xe0] sm:$0xff]  ;;  %v7895_v29 = vpack.c.bf16 %v1714_v20, %v1710_v54  ;;  %v1722_v54 = vld [vmem:[#allocation8 + $0x138] sm:$0xff] }
 0x2cc   :  { %v1715_v20 = vld [vmem:[#allocation8 + $0x100] sm:$0xff]  ;;  %v1802_v47 = vld [vmem:[#allocation8 + $0x3b8] sm:$0xff] }
 0x2cd   :  { %5573 = vmatpush1.bf16.msra.mxu0 %v7873_v31  ;;  %5637 = vmatpush1.bf16.msra.mxu1 %v7876_v27  ;;  %9444 = vst [vmem:[#allocation26_spill] sm:$0xff] %v7885_v48  ;;  %v7893_v27 = vpack.c.bf16 %v1712_v44, %v1708_v57  ;;  %9447 = vst [vmem:[#allocation29_spill] sm:$0xff] %v7895_v29  ;;  %v7897_v31 = vpack.c.bf16 %v1711_v63, %v1707_v62  ;;  %v1716_v57 = vld [vmem:[#allocation8 + $0x108] sm:$0xff]  ;;  %v1719_v62 = vld [vmem:[#allocation8 + $0x120] sm:$0xff] }
 0x2ce   :  { %5575 = vmatprep.subr.bf16.mxu0 %v7881_v30  ;;  %5639 = vmatprep.subr.bf16.mxu1 %v7883_v41  ;;  %v7900_v41 = vpack.c.bf16 %v1713_v25, %v1709_v61  ;;  %v1720_v44 = vld [vmem:[#allocation8 + $0x128] sm:$0xff]  ;;  %v7909_v30 = vpack.c.bf16 %v1719_v62, %v1715_v20  ;;  %v1717_v61 = vld [vmem:[#allocation8 + $0x110] sm:$0xff]  ;;  %v1727_v20 = vld [vmem:[#allocation8 + $0x160] sm:$0xff] }
 0x2cf   :  { %9446 = vst [vmem:[#allocation28_spill] sm:$0xff] %v7893_v27  ;;  %9448 = vst [vmem:[#allocation30_spill] sm:$0xff] %v7897_v31  ;;  %v1721_v25 = vld [vmem:[#allocation8 + $0x130] sm:$0xff] }
 0x2d0   :  { %9449 = vst [vmem:[#allocation31_spill] sm:$0xff] %v7900_v41  ;;  %9452 = vst [vmem:[#allocation34_spill] sm:$0xff] %v7909_v30 }
 0x2d1   :  { %5577 = vmatpush1.bf16.msra.mxu0 %v7885_v48  ;;  %5641 = vmatpush1.bf16.msra.mxu1 %v7888_v56  ;;  %v1718_v56 = vld [vmem:[#allocation8 + $0x118] sm:$0xff]  ;;  %v7905_v48 = vpack.c.bf16 %v1720_v44, %v1716_v57  ;;  %v1728_v57 = vld [vmem:[#allocation8 + $0x168] sm:$0xff] }
 0x2d2   :  { %5579 = vmatprep.subr.bf16.mxu0 %v7893_v27  ;;  %5643 = vmatprep.subr.bf16.mxu1 %v7895_v29  ;;  %v7907_v63 = vpack.c.bf16 %v1722_v54, %v1718_v56  ;;  %v7912_v29 = vpack.c.bf16 %v1721_v25, %v1717_v61  ;;  %v1726_v44 = vld [vmem:[#allocation8 + $0x158] sm:$0xff]  ;;  %v1723_v54 = vld [vmem:[#allocation8 + $0x140] sm:$0xff]  ;;  %v1725_v61 = vld [vmem:[#allocation8 + $0x150] sm:$0xff] }
 0x2d3   :  { %9450 = vst [vmem:[#allocation32_spill] sm:$0xff] %v7905_v48  ;;  %v1730_v56 = vld [vmem:[#allocation8 + $0x178] sm:$0xff]  ;;  %v7921_v27 = vpack.c.bf16 %v1727_v20, %v1723_v54  ;;  %v1729_v25 = vld [vmem:[#allocation8 + $0x170] sm:$0xff]  ;;  %v1735_v54 = vld [vmem:[#allocation8 + $0x1a0] sm:$0xff] }
 0x2d4   :  { %9451 = vst [vmem:[#allocation33_spill] sm:$0xff] %v7907_v63  ;;  %9453 = vst [vmem:[#allocation35_spill] sm:$0xff] %v7912_v29  ;;  %v7919_v62 = vpack.c.bf16 %v1730_v56, %v1726_v44  ;;  %v1738_v44 = vld [vmem:[#allocation8 + $0x1b8] sm:$0xff]  ;;  %v1731_v56 = vld [vmem:[#allocation8 + $0x180] sm:$0xff] }
 0x2d5   :  { %5581 = vmatpush1.bf16.msra.mxu0 %v7897_v31  ;;  %5645 = vmatpush1.bf16.msra.mxu1 %v7900_v41  ;;  %v1724_v41 = vld [vmem:[#allocation8 + $0x148] sm:$0xff]  ;;  %9456 = vst [vmem:[#allocation38_spill] sm:$0xff] %v7921_v27 }
 0x2d6   :  { %5583 = vmatprep.subr.bf16.mxu0 %v7905_v48  ;;  %5647 = vmatprep.subr.bf16.mxu1 %v7907_v63  ;;  %v7917_v31 = vpack.c.bf16 %v1728_v57, %v1724_v41  ;;  %9455 = vst [vmem:[#allocation37_spill] sm:$0xff] %v7919_v62  ;;  %v7924_v63 = vpack.c.bf16 %v1729_v25, %v1725_v61  ;;  %v1736_v41 = vld [vmem:[#allocation8 + $0x1a8] sm:$0xff]  ;;  %v1734_v57 = vld [vmem:[#allocation8 + $0x198] sm:$0xff]  ;;  %v1733_v61 = vld [vmem:[#allocation8 + $0x190] sm:$0xff] }
 0x2d7   :  { %v7931_v20 = vpack.c.bf16 %v1738_v44, %v1734_v57  ;;  %v7933_v48 = vpack.c.bf16 %v1735_v54, %v1731_v56  ;;  %v1737_v25 = vld [vmem:[#allocation8 + $0x1b0] sm:$0xff]  ;;  %v1746_v57 = vld [vmem:[#allocation8 + $0x1f8] sm:$0xff]  ;;  %v1739_v44 = vld [vmem:[#allocation8 + $0x1c0] sm:$0xff] }
 0x2d8   :  { %9454 = vst [vmem:[#allocation36_spill] sm:$0xff] %v7917_v31  ;;  %9457 = vst [vmem:[#allocation39_spill] sm:$0xff] %v7924_v63  ;;  %v1743_v56 = vld [vmem:[#allocation8 + $0x1e0] sm:$0xff] }
 0x2d9   :  { %5585 = vmatpush1.bf16.msra.mxu0 %v7909_v30  ;;  %5649 = vmatpush1.bf16.msra.mxu1 %v7912_v29  ;;  %v1732_v29 = vld [vmem:[#allocation8 + $0x188] sm:$0xff]  ;;  %9459 = vst [vmem:[#allocation41_spill] sm:$0xff] %v7931_v20  ;;  %9460 = vst [vmem:[#allocation42_spill] sm:$0xff] %v7933_v48 }
 0x2da   :  { %5587 = vmatprep.subr.bf16.mxu0 %v7917_v31  ;;  %5651 = vmatprep.subr.bf16.mxu1 %v7919_v62  ;;  %v7929_v30 = vpack.c.bf16 %v1736_v41, %v1732_v29  ;;  %v7936_v62 = vpack.c.bf16 %v1737_v25, %v1733_v61  ;;  %v1744_v29 = vld [vmem:[#allocation8 + $0x1e8] sm:$0xff]  ;;  %v1742_v41 = vld [vmem:[#allocation8 + $0x1d8] sm:$0xff]  ;;  %v7945_v31 = vpack.c.bf16 %v1743_v56, %v1739_v44  ;;  %v1741_v61 = vld [vmem:[#allocation8 + $0x1d0] sm:$0xff] }
 0x2db   :  { %v7943_v54 = vpack.c.bf16 %v1746_v57, %v1742_v41  ;;  %v1745_v25 = vld [vmem:[#allocation8 + $0x1f0] sm:$0xff]  ;;  %v1754_v41 = vld [vmem:[#allocation8 + $0x238] sm:$0xff]  ;;  %v1747_v57 = vld [vmem:[#allocation8 + $0x200] sm:$0xff] }
 0x2dc   :  { %9458 = vst [vmem:[#allocation40_spill] sm:$0xff] %v7929_v30  ;;  %9461 = vst [vmem:[#allocation43_spill] sm:$0xff] %v7936_v62  ;;  %v1751_v44 = vld [vmem:[#allocation8 + $0x220] sm:$0xff] }
 0x2dd   :  { %5589 = vmatpush1.bf16.msra.mxu0 %v7921_v27  ;;  %5653 = vmatpush1.bf16.msra.mxu1 %v7924_v63  ;;  %v1740_v63 = vld [vmem:[#allocation8 + $0x1c8] sm:$0xff]  ;;  %9463 = vst [vmem:[#allocation45_spill] sm:$0xff] %v7943_v54  ;;  %9464 = vst [vmem:[#allocation46_spill] sm:$0xff] %v7945_v31 }
 0x2de   :  { %5591 = vmatprep.subr.bf16.mxu0 %v7929_v30  ;;  %5655 = vmatprep.subr.bf16.mxu1 %v7931_v20  ;;  %v7941_v27 = vpack.c.bf16 %v1744_v29, %v1740_v63  ;;  %v7948_v20 = vpack.c.bf16 %v1745_v25, %v1741_v61  ;;  %v1752_v63 = vld [vmem:[#allocation8 + $0x228] sm:$0xff]  ;;  %v1750_v29 = vld [vmem:[#allocation8 + $0x218] sm:$0xff]  ;;  %v7957_v30 = vpack.c.bf16 %v1751_v44, %v1747_v57  ;;  %v1749_v61 = vld [vmem:[#allocation8 + $0x210] sm:$0xff] }
 0x2df   :  { %v7955_v56 = vpack.c.bf16 %v1754_v41, %v1750_v29  ;;  %v1753_v25 = vld [vmem:[#allocation8 + $0x230] sm:$0xff]  ;;  %v1762_v29 = vld [vmem:[#allocation8 + $0x278] sm:$0xff]  ;;  %v1755_v41 = vld [vmem:[#allocation8 + $0x240] sm:$0xff] }
 0x2e0   :  { %9462 = vst [vmem:[#allocation44_spill] sm:$0xff] %v7941_v27  ;;  %9465 = vst [vmem:[#allocation47_spill] sm:$0xff] %v7948_v20  ;;  %v1759_v57 = vld [vmem:[#allocation8 + $0x260] sm:$0xff] }
 0x2e1   :  { %5593 = vmatpush1.bf16.msra.mxu0 %v7933_v48  ;;  %5657 = vmatpush1.bf16.msra.mxu1 %v7936_v62  ;;  %v1748_v62 = vld [vmem:[#allocation8 + $0x208] sm:$0xff]  ;;  %9467 = vst [vmem:[#allocation49_spill] sm:$0xff] %v7955_v56  ;;  %9468 = vst [vmem:[#allocation50_spill] sm:$0xff] %v7957_v30 }
 0x2e2   :  { %5595 = vmatprep.subr.bf16.mxu0 %v7941_v27  ;;  %5659 = vmatprep.subr.bf16.mxu1 %v7943_v54  ;;  %v7953_v48 = vpack.c.bf16 %v1752_v63, %v1748_v62  ;;  %v7960_v54 = vpack.c.bf16 %v1753_v25, %v1749_v61  ;;  %v1760_v62 = vld [vmem:[#allocation8 + $0x268] sm:$0xff]  ;;  %v1758_v63 = vld [vmem:[#allocation8 + $0x258] sm:$0xff]  ;;  %v7969_v27 = vpack.c.bf16 %v1759_v57, %v1755_v41  ;;  %v1757_v61 = vld [vmem:[#allocation8 + $0x250] sm:$0xff] }
 0x2e3   :  { %v7967_v44 = vpack.c.bf16 %v1762_v29, %v1758_v63  ;;  %v1761_v25 = vld [vmem:[#allocation8 + $0x270] sm:$0xff]  ;;  %v1770_v63 = vld [vmem:[#allocation8 + $0x2b8] sm:$0xff]  ;;  %v1763_v29 = vld [vmem:[#allocation8 + $0x280] sm:$0xff] }
 0x2e4   :  { %9466 = vst [vmem:[#allocation48_spill] sm:$0xff] %v7953_v48  ;;  %9469 = vst [vmem:[#allocation51_spill] sm:$0xff] %v7960_v54  ;;  %v1767_v41 = vld [vmem:[#allocation8 + $0x2a0] sm:$0xff] }
 0x2e5   :  { %5597 = vmatpush1.bf16.msra.mxu0 %v7945_v31  ;;  %5661 = vmatpush1.bf16.msra.mxu1 %v7948_v20  ;;  %v1756_v20 = vld [vmem:[#allocation8 + $0x248] sm:$0xff]  ;;  %9471 = vst [vmem:[#allocation53_spill] sm:$0xff] %v7967_v44  ;;  %9472 = vst [vmem:[#allocation54_spill] sm:$0xff] %v7969_v27 }
 0x2e6   :  { %5599 = vmatprep.subr.bf16.mxu0 %v7953_v48  ;;  %5663 = vmatprep.subr.bf16.mxu1 %v7955_v56  ;;  %v7965_v31 = vpack.c.bf16 %v1760_v62, %v1756_v20  ;;  %v7972_v56 = vpack.c.bf16 %v1761_v25, %v1757_v61  ;;  %v1768_v20 = vld [vmem:[#allocation8 + $0x2a8] sm:$0xff]  ;;  %v1766_v62 = vld [vmem:[#allocation8 + $0x298] sm:$0xff]  ;;  %v7981_v48 = vpack.c.bf16 %v1767_v41, %v1763_v29  ;;  %v1765_v61 = vld [vmem:[#allocation8 + $0x290] sm:$0xff] }
 0x2e7   :  { %v7979_v57 = vpack.c.bf16 %v1770_v63, %v1766_v62  ;;  %v1769_v25 = vld [vmem:[#allocation8 + $0x2b0] sm:$0xff]  ;;  %v1778_v62 = vld [vmem:[#allocation8 + $0x2f8] sm:$0xff]  ;;  %v1771_v63 = vld [vmem:[#allocation8 + $0x2c0] sm:$0xff] }
 0x2e8   :  { %9470 = vst [vmem:[#allocation52_spill] sm:$0xff] %v7965_v31  ;;  %9473 = vst [vmem:[#allocation55_spill] sm:$0xff] %v7972_v56  ;;  %v1775_v29 = vld [vmem:[#allocation8 + $0x2e0] sm:$0xff] }
 0x2e9   :  { %5601 = vmatpush1.bf16.msra.mxu0 %v7957_v30  ;;  %5665 = vmatpush1.bf16.msra.mxu1 %v7960_v54  ;;  %v1764_v54 = vld [vmem:[#allocation8 + $0x288] sm:$0xff]  ;;  %9475 = vst [vmem:[#allocation57_spill] sm:$0xff] %v7979_v57  ;;  %9476 = vst [vmem:[#allocation58_spill] sm:$0xff] %v7981_v48 }
 0x2ea   :  { %5603 = vmatprep.subr.bf16.mxu0 %v7965_v31  ;;  %5667 = vmatprep.subr.bf16.mxu1 %v7967_v44  ;;  %v7977_v30 = vpack.c.bf16 %v1768_v20, %v1764_v54  ;;  %v7984_v44 = vpack.c.bf16 %v1769_v25, %v1765_v61  ;;  %v1776_v54 = vld [vmem:[#allocation8 + $0x2e8] sm:$0xff]  ;;  %v1774_v20 = vld [vmem:[#allocation8 + $0x2d8] sm:$0xff]  ;;  %v7993_v31 = vpack.c.bf16 %v1775_v29, %v1771_v63  ;;  %v1773_v61 = vld [vmem:[#allocation8 + $0x2d0] sm:$0xff] }
 0x2eb   :  { %v7991_v41 = vpack.c.bf16 %v1778_v62, %v1774_v20  ;;  %v1777_v25 = vld [vmem:[#allocation8 + $0x2f0] sm:$0xff]  ;;  %v1786_v20 = vld [vmem:[#allocation8 + $0x338] sm:$0xff]  ;;  %v1779_v62 = vld [vmem:[#allocation8 + $0x300] sm:$0xff] }
 0x2ec   :  { %9474 = vst [vmem:[#allocation56_spill] sm:$0xff] %v7977_v30  ;;  %9477 = vst [vmem:[#allocation59_spill] sm:$0xff] %v7984_v44  ;;  %v1783_v63 = vld [vmem:[#allocation8 + $0x320] sm:$0xff] }
 0x2ed   :  { %5605 = vmatpush1.bf16.msra.mxu0 %v7969_v27  ;;  %5669 = vmatpush1.bf16.msra.mxu1 %v7972_v56  ;;  %v1772_v56 = vld [vmem:[#allocation8 + $0x2c8] sm:$0xff]  ;;  %9479 = vst [vmem:[#allocation61_spill] sm:$0xff] %v7991_v41  ;;  %9480 = vst [vmem:[#allocation62_spill] sm:$0xff] %v7993_v31 }
 0x2ee   :  { %5607 = vmatprep.subr.bf16.mxu0 %v7977_v30  ;;  %5671 = vmatprep.subr.bf16.mxu1 %v7979_v57  ;;  %v7989_v27 = vpack.c.bf16 %v1776_v54, %v1772_v56  ;;  %v7996_v57 = vpack.c.bf16 %v1777_v25, %v1773_v61  ;;  %v1784_v56 = vld [vmem:[#allocation8 + $0x328] sm:$0xff]  ;;  %v1782_v54 = vld [vmem:[#allocation8 + $0x318] sm:$0xff]  ;;  %v8005_v30 = vpack.c.bf16 %v1783_v63, %v1779_v62  ;;  %v1781_v61 = vld [vmem:[#allocation8 + $0x310] sm:$0xff] }
 0x2ef   :  { %v8003_v29 = vpack.c.bf16 %v1786_v20, %v1782_v54  ;;  %v1785_v25 = vld [vmem:[#allocation8 + $0x330] sm:$0xff]  ;;  %v1794_v54 = vld [vmem:[#allocation8 + $0x378] sm:$0xff]  ;;  %v1787_v20 = vld [vmem:[#allocation8 + $0x340] sm:$0xff] }
 0x2f0   :  { %9478 = vst [vmem:[#allocation60_spill] sm:$0xff] %v7989_v27  ;;  %9481 = vst [vmem:[#allocation63_spill] sm:$0xff] %v7996_v57  ;;  %v1791_v62 = vld [vmem:[#allocation8 + $0x360] sm:$0xff] }
 0x2f1   :  { %5609 = vmatpush1.bf16.msra.mxu0 %v7981_v48  ;;  %5673 = vmatpush1.bf16.msra.mxu1 %v7984_v44  ;;  %v1780_v44 = vld [vmem:[#allocation8 + $0x308] sm:$0xff]  ;;  %9483 = vst [vmem:[#allocation65_spill] sm:$0xff] %v8003_v29  ;;  %9484 = vst [vmem:[#allocation66_spill] sm:$0xff] %v8005_v30 }
 0x2f2   :  { %5611 = vmatprep.subr.bf16.mxu0 %v7989_v27  ;;  %5675 = vmatprep.subr.bf16.mxu1 %v7991_v41  ;;  %v8001_v48 = vpack.c.bf16 %v1784_v56, %v1780_v44  ;;  %v8008_v41 = vpack.c.bf16 %v1785_v25, %v1781_v61  ;;  %v1792_v44 = vld [vmem:[#allocation8 + $0x368] sm:$0xff]  ;;  %v1790_v56 = vld [vmem:[#allocation8 + $0x358] sm:$0xff]  ;;  %v8017_v27 = vpack.c.bf16 %v1791_v62, %v1787_v20  ;;  %v1789_v61 = vld [vmem:[#allocation8 + $0x350] sm:$0xff] }
 0x2f3   :  { %v8015_v63 = vpack.c.bf16 %v1794_v54, %v1790_v56  ;;  %v1793_v25 = vld [vmem:[#allocation8 + $0x370] sm:$0xff]  ;;  %v1795_v56 = vld [vmem:[#allocation8 + $0x380] sm:$0xff] }
 0x2f4   :  { %9482 = vst [vmem:[#allocation64_spill] sm:$0xff] %v8001_v48  ;;  %9485 = vst [vmem:[#allocation67_spill] sm:$0xff] %v8008_v41  ;;  %v1799_v54 = vld [vmem:[#allocation8 + $0x3a0] sm:$0xff]  ;;  %v1797_v20 = vld [vmem:[#allocation8 + $0x390] sm:$0xff] }
 0x2f5   :  { %5613 = vmatpush1.bf16.msra.mxu0 %v7993_v31  ;;  %5677 = vmatpush1.bf16.msra.mxu1 %v7996_v57  ;;  %v1788_v57 = vld [vmem:[#allocation8 + $0x348] sm:$0xff]  ;;  %9487 = vst [vmem:[#allocation69_spill] sm:$0xff] %v8015_v63  ;;  %9488 = vst [vmem:[#allocation70_spill] sm:$0xff] %v8017_v27  ;;  %v8029_v62 = vpack.c.bf16 %v1799_v54, %v1795_v56  ;;  %v1809_v56 = vld [vmem:[#allocation8 + $0x3f0] sm:$0xff] }
 0x2f6   :  { %5615 = vmatprep.subr.bf16.mxu0 %v8001_v48  ;;  %5679 = vmatprep.subr.bf16.mxu1 %v8003_v29  ;;  %v8013_v31 = vpack.c.bf16 %v1792_v44, %v1788_v57  ;;  %v1796_v48 = vld [vmem:[#allocation8 + $0x388] sm:$0xff]  ;;  %v8026_v44 = vpack.c.bf16 %v1802_v47, %v1798_v26  ;;  %v1806_v47 = vld [vmem:[#allocation8 + $0x3d8] sm:$0xff] }
 0x2f7   :  { %v1800_v29 = vld [vmem:[#allocation8 + $0x3a8] sm:$0xff]  ;;  %9490 = vst [vmem:[#allocation76_spill] sm:$0xff] %v8029_v62  ;;  %v1810_v26 = vld [vmem:[#allocation8 + $0x3f8] sm:$0xff] }
 0x2f8   :  { %9486 = vst [vmem:[#allocation68_spill] sm:$0xff] %v8013_v31  ;;  %v8024_v57 = vpack.c.bf16 %v1800_v29, %v1796_v48  ;;  %v1803_v29 = vld [vmem:[#allocation8 + $0x3c0] sm:$0xff] }
 0x2f9   :  { %5617 = vmatpush1.bf16.msra.mxu0 %v8005_v30  ;;  %5681 = vmatpush1.bf16.msra.mxu1 %v8008_v41  ;;  %v8020_v30 = vpack.c.bf16 %v1793_v25, %v1789_v61  ;;  %v1801_v61 = vld [vmem:[#allocation8 + $0x3b0] sm:$0xff]  ;;  %v1804_v25 = vld [vmem:[#allocation8 + $0x3c8] sm:$0xff]  ;;  %v1807_v41 = vld [vmem:[#allocation8 + $0x3e0] sm:$0xff] }
 0x2fa   :  { %5619 = vmatprep.subr.bf16.mxu0 %v8013_v31  ;;  %5683 = vmatprep.subr.bf16.mxu1 %v8015_v63  ;;  %v1808_v31 = vld [vmem:[#allocation8 + $0x3e8] sm:$0xff]  ;;  %v8033_v63 = vpack.c.bf16 %v1801_v61, %v1797_v20  ;;  %v8040_v54 = vpack.c.bf16 %v1807_v41, %v1803_v29 }
 0x2fb   :  { %9489 = vst [vmem:[#allocation71_spill] sm:$0xff] %v8020_v30  ;;  %v8035_v48 = vpack.c.bf16 %v1808_v31, %v1804_v25  ;;  %v1238_v31 = vld [vmem:[#allocation9] sm:$0xf] }
 0x2fc   :  { %9491 = vst [vmem:[#allocation79_spill] sm:$0xff] %v8033_v63  ;;  %9494 = vst [vmem:[#allocation82_spill] sm:$0xff] %v8040_v54  ;;  %v1243_v41 = vrot.slane %v1238_v31, %v9435_v21  ;;  %v1247_v61 = vrot.slane %v1238_v31, %v9436_v37 }
 0x2fd   :  { %5621 = vmatpush1.bf16.msra.mxu0 %v8017_v27  ;;  %5685 = vmatpush1.bf16.msra.mxu1 %v8020_v30  ;;  %9492 = vst [vmem:[#allocation80_spill] sm:$0xff] %v8035_v48  ;;  %v8037_v27 = vpack.c.bf16 %v1810_v26, %v1806_v47  ;;  %v1805_v30 = vld [vmem:[#allocation8 + $0x3d0] sm:$0xff] }
 0x2fe   :  { %5623 = vmatprep.subr.bf16.mxu0 %v8024_v57  ;;  %5687 = vmatprep.subr.bf16.mxu1 %v8026_v44  ;;  %v8044_v20 = vpack.c.bf16 %v1809_v56, %v1805_v30 }
 0x2ff   :  { %9493 = vst [vmem:[#allocation81_spill] sm:$0xff] %v8037_v27 }
 0x300   :  { %9495 = vst [vmem:[#allocation83_spill] sm:$0xff] %v8044_v20 }
 0x301   :  { %5625 = vmatpush1.bf16.msra.mxu0 %v8029_v62  ;;  %5689 = vmatpush1.bf16.msra.mxu1 %v8033_v63 }
 0x302   :  { %5627 = vmatprep.subr.bf16.mxu0 %v8035_v48  ;;  %5691 = vmatprep.subr.bf16.mxu1 %v8037_v27 }
 0x305   :  { %5629 = vmatpush1.bf16.msra.mxu0 %v8040_v54  ;;  %5693 = vmatpush1.bf16.msra.mxu1 %v8044_v20  ;;  %v1251_v20 = vrot.slane %v1238_v31, %v9437_v9 }
 0x306   :  { %5695 = vmatprep.subr.bf16.mxu0 %v7734_v15  ;;  %5727 = vmatprep.subr.bf16.mxu1 %v7736_v13  ;;  %v1255_v15 = vrot.slane %v1238_v31, %v7611_v19 }
 0x37b   :  { %v1331_v25 = vpop.f32.mrb[6].mxu0  ;;  %v1402_v47 = vpop.f32.mrb[14].mxu1 }
 0x37c   :  { %v1332_v26 = vadd.f32 %v1331_v25, %v1243_v41  ;;  %v1333_v30 = vpop.f32.mrb[7].mxu0  ;;  %v1404_v29 = vpop.f32.mrb[15].mxu1  ;;  %v1403_v13 = vadd.f32 %v1402_v47, %v1251_v20 }
 0x37d   :  { %v1334_v56 = vadd.f32 %v1333_v30, %v1247_v61  ;;  %v1405_v54 = vadd.f32 %v1404_v29, %v1255_v15 }
 0x37e   :  { %v5017_v27 = vmul.f32 -1.442695, %v1332_v26  ;;  %v5019_v63 = vmul.f32 -1.442695, %v1403_v13 }
 0x37f   :  { %v5018_v48 = vmul.f32 -1.442695, %v1334_v56 }
 0x380   :  { %6747 = vpow2.f32 %v5017_v27 }
 0x381   :  { %6749 = vpow2.f32 %v5018_v48 }
 0x382   :  { %6751 = vtanh.f32 %v1405_v54 }
 0x383   :  { %6753 = vpow2.f32 %v5019_v63 }
 0x38a   :  { %v6748_v21 = vpop.eup %6747 }
 0x38b   :  { %v1416_v62 = vadd.f32 1.0, %v6748_v21  ;;  %v6750_v37 = vpop.eup %6749 }
 0x38c   :  { %v1417_v41 = vadd.f32 1.0, %v6750_v37  ;;  %v6752_v61 = vpop.eup %6751 }
 0x38d   :  { %6755 = vrcp.f32 %v1416_v62  ;;  %v6754_v25 = vpop.eup %6753 }
 0x38e   :  { %6757 = vrcp.f32 %v1417_v41  ;;  %v1418_v56 = vadd.f32 1.0, %v6754_v25 }
 0x390   :  { %6759 = vrcp.f32 %v1418_v56 }
 0x397   :  { %v6756_v26 = vpop.eup %6755 }
 0x398   :  { %v1427_v27 = vmul.f32 %v6756_v26, %v6752_v61  ;;  %v6758_v30 = vpop.eup %6757 }
 0x399   :  { %v1426_v48 = vmul.f32 %v6758_v30, %v7748_v33 }
 0x39a   :  { %v6760_v25 = vpop.eup %6759 }
 0x39b   :  { %v1562_v31 = vpop.f32.mrb[8].mxu0  ;;  %v1633_v20 = vpop.f32.mrb[16].mxu1  ;;  %v8056_v47 = vadd.f32 %v1427_v27, %v1426_v48 }
 0x39c   :  { %v1642_v29 = vrot.slane %v1562_v31, 4  ;;  %v1564_v21 = vpop.f32.mrb[9].mxu0  ;;  %v1635_v54 = vpop.f32.mrb[17].mxu1  ;;  %v1644_v41 = vrot.slane %v1633_v20, 4 }
 0x39d   :  { %v1643_v63 = vrot.slane %v1564_v21, 4  ;;  %6761 = vtanh.f32 %v8056_v47  ;;  %v1645_v33 = vrot.slane %v1635_v54, 4 }
 0x39e   :  { %v1650_v37 = vadd.f32 %v1642_v29, %v7619_v51  ;;  %v1652_v61 = vadd.f32 %v1644_v41, %v7625_v28 }
 0x39f   :  { %v1651_v62 = vadd.f32 %v1643_v63, %v7621_v42  ;;  %v1653_v27 = vadd.f32 %v1645_v33, %v7627_v32 }
 0x3a0   :  { %v5020_v15 = vmul.f32 -1.442695, %v1650_v37  ;;  %v5022_v56 = vmul.f32 -1.442695, %v1652_v61 }
 0x3a1   :  { %v5021_v13 = vmul.f32 -1.442695, %v1651_v62 }
 0x3a2   :  { %6763 = vpow2.f32 %v5020_v15  ;;  %v1674_v15 = vrot.slane %v7756_v2, 6  ;;  %v9496_v2 = vld [vmem:[#allocation20_spill] sm:$0xff] }
 0x3a3   :  { %6765 = vpow2.f32 %v5021_v13 }
 0x3a4   :  { %6767 = vtanh.f32 %v1653_v27 }
 0x3a5   :  { %6769 = vpow2.f32 %v5022_v56 }
 0x3a7   :  { %v6762_v26 = vpop.eup %6761 }
 0x3a8   :  { %v1430_v30 = vmul.f32 %v6762_v26, %v6760_v25 }
 0x3aa   :  { %1431 = vst [vmem:[#allocation2 + $0x2] sm:$0x3] %v1430_v30  ;;  %v1682_v48 = vrot.slane %v1430_v30, 4 }
 0x3ac   :  { %v6764_v31 = vpop.eup %6763  ;;  %v1835_v21 = vrot.slane %v1682_v48, 4  ;;  %v9531_v48 = vld [vmem:[#allocation55_spill] sm:$0xff] }
 0x3ad   :  { %v1663_v29 = vadd.f32 1.0, %v6764_v31  ;;  %v6766_v63 = vpop.eup %6765  ;;  %v9532_v31 = vld [vmem:[#allocation56_spill] sm:$0xff] }
 0x3ae   :  { %v1664_v20 = vadd.f32 1.0, %v6766_v63  ;;  %1902 = vmatprep.mubr.f32.mxu0 %v1835_v21  ;;  %1973 = vmatprep.mubr.f32.mxu1 %v1835_v21  ;;  %v6768_v54 = vpop.eup %6767  ;;  %v9534_v21 = vld [vmem:[#allocation58_spill] sm:$0xff]  ;;  %v9535_v63 = vld [vmem:[#allocation59_spill] sm:$0xff] }
 0x3af   :  { %6771 = vrcp.f32 %v1663_v29  ;;  %v6770_v37 = vpop.eup %6769  ;;  %v9533_v29 = vld [vmem:[#allocation57_spill] sm:$0xff] }
 0x3b0   :  { %6773 = vrcp.f32 %v1664_v20  ;;  %v1665_v33 = vadd.f32 1.0, %v6770_v37  ;;  %v9536_v20 = vld [vmem:[#allocation60_spill] sm:$0xff]  ;;  %v9538_v37 = vld [vmem:[#allocation62_spill] sm:$0xff] }
 0x3b2   :  { %6775 = vrcp.f32 %v1665_v33  ;;  %v9543_v33 = vld [vmem:[#allocation67_spill] sm:$0xff] }
 0x3b9   :  { %v6772_v62 = vpop.eup %6771 }
 0x3ba   :  { %v1677_v13 = vmul.f32 %v6772_v62, %v6768_v54  ;;  %v6774_v41 = vpop.eup %6773  ;;  %v9537_v54 = vld [vmem:[#allocation61_spill] sm:$0xff]  ;;  %v9539_v62 = vld [vmem:[#allocation63_spill] sm:$0xff] }
 0x3bb   :  { %v1676_v61 = vmul.f32 %v6774_v41, %v1674_v15  ;;  %v9540_v15 = vld [vmem:[#allocation64_spill] sm:$0xff]  ;;  %v9542_v41 = vld [vmem:[#allocation66_spill] sm:$0xff] }
 0x3bc   :  { %v6776_v26 = vpop.eup %6775 }
 0x3bd   :  { %v8064_v25 = vadd.f32 %v1677_v13, %v1676_v61  ;;  %v9541_v13 = vld [vmem:[#allocation65_spill] sm:$0xff]  ;;  %v9544_v61 = vld [vmem:[#allocation68_spill] sm:$0xff] }
 0x3bf   :  { %6777 = vtanh.f32 %v8064_v25 }
 0x3c9   :  { %v6778_v27 = vpop.eup %6777 }
 0x3ca   :  { %v1680_v30 = vmul.f32 %v6778_v27, %v6776_v26  ;;  %v9545_v26 = vld [vmem:[#allocation69_spill] sm:$0xff]  ;;  %v9546_v27 = vld [vmem:[#allocation70_spill] sm:$0xff] }
 0x3cc   :  { %v1834_v56 = vrot.slane %v1680_v30, 4  ;;  %v9547_v30 = vld [vmem:[#allocation71_spill] sm:$0xff] }
 0x3ce   :  { %1903 = vmatmul.mubr.f32.vlgmr.msra.gmra.mrb[10].mxu0 %v1834_v56  ;;  %1974 = vmatmul.mubr.f32.vlgmr.msra.gmra.mrb[18].mxu1 %v1834_v56 }
 0x3cf   :  { %5697 = vmatpush1.bf16.msra.mxu0 %v7759_v45  ;;  %5729 = vmatpush1.bf16.msra.mxu1 %v7761_v50  ;;  %v9497_v45 = vld [vmem:[#allocation21_spill] sm:$0xff]  ;;  %v9498_v50 = vld [vmem:[#allocation22_spill] sm:$0xff] }
 0x3d0   :  { %5699 = vmatprep.subr.bf16.mxu0 %v7765_v5  ;;  %5731 = vmatprep.subr.bf16.mxu1 %v7767_v7  ;;  %v9499_v5 = vld [vmem:[#allocation23_spill] sm:$0xff]  ;;  %v9500_v7 = vld [vmem:[#allocation24_spill] sm:$0xff] }
 0x3d1   :  { %2133 = vmatprep.mubr.f32.mxu0 %v9382_v40  ;;  %2204 = vmatprep.mubr.f32.mxu1 %v9382_v40 }
 0x3d3   :  { %5701 = vmatpush1.bf16.msra.mxu0 %v7773_v1  ;;  %5733 = vmatpush1.bf16.msra.mxu1 %v7775_v12  ;;  %v9501_v1 = vld [vmem:[#allocation25_spill] sm:$0xff]  ;;  %v9502_v12 = vld [vmem:[#allocation26_spill] sm:$0xff] }
 0x3d4   :  { %5703 = vmatprep.subr.bf16.mxu0 %v7779_v8  ;;  %5735 = vmatprep.subr.bf16.mxu1 %v7781_v0  ;;  %v9503_v8 = vld [vmem:[#allocation27_spill] sm:$0xff]  ;;  %v9504_v0 = vld [vmem:[#allocation28_spill] sm:$0xff] }
 0x3d7   :  { %5705 = vmatpush1.bf16.msra.mxu0 %v7787_v34  ;;  %5737 = vmatpush1.bf16.msra.mxu1 %v7789_v4  ;;  %v9505_v34 = vld [vmem:[#allocation29_spill] sm:$0xff]  ;;  %v9506_v4 = vld [vmem:[#allocation30_spill] sm:$0xff] }
 0x3d8   :  { %5707 = vmatprep.subr.bf16.mxu0 %v7793_v46  ;;  %5739 = vmatprep.subr.bf16.mxu1 %v7795_v17  ;;  %v9507_v46 = vld [vmem:[#allocation31_spill] sm:$0xff]  ;;  %v9508_v17 = vld [vmem:[#allocation32_spill] sm:$0xff] }
 0x3db   :  { %5709 = vmatpush1.bf16.msra.mxu0 %v7799_v59  ;;  %5741 = vmatpush1.bf16.msra.mxu1 %v7801_v60  ;;  %v9509_v59 = vld [vmem:[#allocation33_spill] sm:$0xff]  ;;  %v9510_v60 = vld [vmem:[#allocation34_spill] sm:$0xff] }
 0x3dc   :  { %5711 = vmatprep.subr.bf16.mxu0 %v7805_v11  ;;  %5743 = vmatprep.subr.bf16.mxu1 %v7807_v16  ;;  %v9511_v11 = vld [vmem:[#allocation35_spill] sm:$0xff]  ;;  %v9512_v16 = vld [vmem:[#allocation36_spill] sm:$0xff] }
 0x3df   :  { %5713 = vmatpush1.bf16.msra.mxu0 %v7811_v39  ;;  %5745 = vmatpush1.bf16.msra.mxu1 %v7813_v6  ;;  %v9513_v39 = vld [vmem:[#allocation37_spill] sm:$0xff]  ;;  %v9514_v6 = vld [vmem:[#allocation38_spill] sm:$0xff] }
 0x3e0   :  { %5715 = vmatprep.subr.bf16.mxu0 %v7817_v18  ;;  %5747 = vmatprep.subr.bf16.mxu1 %v7819_v23  ;;  %v9515_v18 = vld [vmem:[#allocation39_spill] sm:$0xff]  ;;  %v9516_v23 = vld [vmem:[#allocation40_spill] sm:$0xff] }
 0x3e3   :  { %5717 = vmatpush1.bf16.msra.mxu0 %v7823_v22  ;;  %5749 = vmatpush1.bf16.msra.mxu1 %v7825_v35  ;;  %v9517_v22 = vld [vmem:[#allocation41_spill] sm:$0xff]  ;;  %v9518_v35 = vld [vmem:[#allocation42_spill] sm:$0xff] }
 0x3e4   :  { %5719 = vmatprep.subr.bf16.mxu0 %v7829_v52  ;;  %5751 = vmatprep.subr.bf16.mxu1 %v7831_v3  ;;  %v9519_v52 = vld [vmem:[#allocation43_spill] sm:$0xff]  ;;  %v9520_v3 = vld [vmem:[#allocation44_spill] sm:$0xff] }
 0x3e7   :  { %5721 = vmatpush1.bf16.msra.mxu0 %v7835_v49  ;;  %5753 = vmatpush1.bf16.msra.mxu1 %v7837_v53  ;;  %v9521_v49 = vld [vmem:[#allocation45_spill] sm:$0xff]  ;;  %v9522_v53 = vld [vmem:[#allocation46_spill] sm:$0xff] }
 0x3e8   :  { %5723 = vmatprep.subr.bf16.mxu0 %v7841_v10  ;;  %5755 = vmatprep.subr.bf16.mxu1 %v7843_v24  ;;  %v9523_v10 = vld [vmem:[#allocation47_spill] sm:$0xff]  ;;  %v9524_v24 = vld [vmem:[#allocation48_spill] sm:$0xff] }
 0x3eb   :  { %5725 = vmatpush1.bf16.msra.mxu0 %v7847_v36  ;;  %5757 = vmatpush1.bf16.msra.mxu1 %v7849_v38  ;;  %v9525_v36 = vld [vmem:[#allocation49_spill] sm:$0xff]  ;;  %v9526_v38 = vld [vmem:[#allocation50_spill] sm:$0xff] }
 0x3ec   :  { %5759 = vmatprep.subr.bf16.mxu0 %v7857_v43  ;;  %5823 = vmatprep.subr.bf16.mxu1 %v7859_v14  ;;  %v9527_v43 = vld [vmem:[#allocation51_spill] sm:$0xff]  ;;  %v9528_v14 = vld [vmem:[#allocation52_spill] sm:$0xff] }
 0x3ee   :  { %2134 = vmatmul.mubr.f32.vlgmr.msra.gmra.mrb[12].mxu0 %v1834_v56  ;;  %2205 = vmatmul.mubr.f32.vlgmr.msra.gmra.mrb[20].mxu1 %v1834_v56  ;;  %v9548_v56 = vld [vmem:[#allocation76_spill] sm:$0xff] }
 0x3ef   :  { %5761 = vmatpush1.bf16.msra.mxu0 %v7861_v58  ;;  %5825 = vmatpush1.bf16.msra.mxu1 %v7864_v55  ;;  %v9529_v58 = vld [vmem:[#allocation53_spill] sm:$0xff]  ;;  %v9530_v55 = vld [vmem:[#allocation54_spill] sm:$0xff] }
 0x3f0   :  { %5763 = vmatprep.subr.bf16.mxu0 %v9496_v2  ;;  %5827 = vmatprep.subr.bf16.mxu1 %v9497_v45  ;;  %v9549_v2 = vld [vmem:[#allocation79_spill] sm:$0xff]  ;;  %v9550_v45 = vld [vmem:[#allocation80_spill] sm:$0xff] }
 0x3f3   :  { %5765 = vmatpush1.bf16.msra.mxu0 %v9498_v50  ;;  %5829 = vmatpush1.bf16.msra.mxu1 %v9499_v5  ;;  %v9551_v50 = vld [vmem:[#allocation81_spill] sm:$0xff]  ;;  %v9552_v5 = vld [vmem:[#allocation82_spill] sm:$0xff] }
 0x3f4   :  { %5767 = vmatprep.subr.bf16.mxu0 %v9500_v7  ;;  %5831 = vmatprep.subr.bf16.mxu1 %v9501_v1  ;;  %v9553_v7 = vld [vmem:[#allocation83_spill] sm:$0xff] }
 0x3f5   :  { %v2579_v1 = vld [vmem:[#allocation3 + $0x8] sm:$0xff] }
 0x3f7   :  { %5769 = vmatpush1.bf16.msra.mxu0 %v9502_v12  ;;  %5833 = vmatpush1.bf16.msra.mxu1 %v9503_v8  ;;  %v2583_v12 = vld [vmem:[#allocation3 + $0x28] sm:$0xff]  ;;  %v2581_v8 = vld [vmem:[#allocation3 + $0x18] sm:$0xff] }
 0x3f8   :  { %5771 = vmatprep.subr.bf16.mxu0 %v9504_v0  ;;  %5835 = vmatprep.subr.bf16.mxu1 %v9505_v34  ;;  %v8163_v0 = vpack.c.bf16 %v2583_v12, %v2579_v1 }
 0x3fb   :  { %5773 = vmatpush1.bf16.msra.mxu0 %v9506_v4  ;;  %5837 = vmatpush1.bf16.msra.mxu1 %v9507_v46  ;;  %v9554_v4 = vld [vmem:[#allocation72_spill] sm:$0xff] }
 0x3fc   :  { %5775 = vmatprep.subr.bf16.mxu0 %v9508_v17  ;;  %5839 = vmatprep.subr.bf16.mxu1 %v9509_v59  ;;  %v9555_v17 = vld [vmem:[#allocation73_spill] sm:$0xff] }
 0x3ff   :  { %5777 = vmatpush1.bf16.msra.mxu0 %v9510_v60  ;;  %5841 = vmatpush1.bf16.msra.mxu1 %v9511_v11 }
 0x400   :  { %5779 = vmatprep.subr.bf16.mxu0 %v9512_v16  ;;  %5843 = vmatprep.subr.bf16.mxu1 %v9513_v39 }
 0x403   :  { %5781 = vmatpush1.bf16.msra.mxu0 %v9514_v6  ;;  %5845 = vmatpush1.bf16.msra.mxu1 %v9515_v18 }
 0x404   :  { %5783 = vmatprep.subr.bf16.mxu0 %v9516_v23  ;;  %5847 = vmatprep.subr.bf16.mxu1 %v9517_v22 }
 0x407   :  { %5785 = vmatpush1.bf16.msra.mxu0 %v9518_v35  ;;  %5849 = vmatpush1.bf16.msra.mxu1 %v9519_v52 }
 0x408   :  { %5787 = vmatprep.subr.bf16.mxu0 %v9520_v3  ;;  %5851 = vmatprep.subr.bf16.mxu1 %v9521_v49 }
 0x40b   :  { %5789 = vmatpush1.bf16.msra.mxu0 %v9522_v53  ;;  %5853 = vmatpush1.bf16.msra.mxu1 %v9523_v10 }
 0x40c   :  { %5791 = vmatprep.subr.bf16.mxu0 %v9524_v24  ;;  %5855 = vmatprep.subr.bf16.mxu1 %v9525_v36 }
 0x40f   :  { %5793 = vmatpush1.bf16.msra.mxu0 %v9526_v38  ;;  %5857 = vmatpush1.bf16.msra.mxu1 %v9527_v43 }
 0x410   :  { %5795 = vmatprep.subr.bf16.mxu0 %v9528_v14  ;;  %5859 = vmatprep.subr.bf16.mxu1 %v9529_v58 }
 0x413   :  { %5797 = vmatpush1.bf16.msra.mxu0 %v9530_v55  ;;  %5861 = vmatpush1.bf16.msra.mxu1 %v9531_v48 }
 0x414   :  { %5799 = vmatprep.subr.bf16.mxu0 %v9532_v31  ;;  %5863 = vmatprep.subr.bf16.mxu1 %v9533_v29 }
 0x417   :  { %5801 = vmatpush1.bf16.msra.mxu0 %v9534_v21  ;;  %5865 = vmatpush1.bf16.msra.mxu1 %v9535_v63 }
 0x418   :  { %5803 = vmatprep.subr.bf16.mxu0 %v9536_v20  ;;  %5867 = vmatprep.subr.bf16.mxu1 %v9537_v54 }
 0x41b   :  { %5805 = vmatpush1.bf16.msra.mxu0 %v9538_v37  ;;  %5869 = vmatpush1.bf16.msra.mxu1 %v9539_v62 }
 0x41c   :  { %5807 = vmatprep.subr.bf16.mxu0 %v9540_v15  ;;  %5871 = vmatprep.subr.bf16.mxu1 %v9541_v13 }
 0x41f   :  { %5809 = vmatpush1.bf16.msra.mxu0 %v9542_v41  ;;  %5873 = vmatpush1.bf16.msra.mxu1 %v9543_v33 }
 0x420   :  { %5811 = vmatprep.subr.bf16.mxu0 %v9544_v61  ;;  %5875 = vmatprep.subr.bf16.mxu1 %v9545_v26 }
 0x423   :  { %5813 = vmatpush1.bf16.msra.mxu0 %v9546_v27  ;;  %5877 = vmatpush1.bf16.msra.mxu1 %v9547_v30 }
 0x424   :  { %5815 = vmatprep.subr.bf16.mxu0 %v8024_v57  ;;  %5879 = vmatprep.subr.bf16.mxu1 %v8026_v44  ;;  %v2585_v57 = vld [vmem:[#allocation3 + $0x38] sm:$0xff]  ;;  %v1811_v44 = vld [vmem:[#allocation9] sm:$0xf] }
 0x425   :  { %v8165_v34 = vpack.c.bf16 %v2585_v57, %v2581_v8  ;;  %v1816_v46 = vrot.slane %v1811_v44, %v9554_v4  ;;  %v1820_v59 = vrot.slane %v1811_v44, %v9555_v17  ;;  %v1824_v35 = vrot.slane %v1811_v44, %v9437_v9 }
 0x426   :  { %v1828_v52 = vrot.slane %v1811_v44, %v7611_v19 }
 0x427   :  { %5817 = vmatpush1.bf16.msra.mxu0 %v9548_v56  ;;  %5881 = vmatpush1.bf16.msra.mxu1 %v9549_v2 }
 0x428   :  { %5819 = vmatprep.subr.bf16.mxu0 %v9550_v45  ;;  %5883 = vmatprep.subr.bf16.mxu1 %v9551_v50 }
 0x42b   :  { %5821 = vmatpush1.bf16.msra.mxu0 %v9552_v5  ;;  %5885 = vmatpush1.bf16.msra.mxu1 %v9553_v7 }
 0x42c   :  { %5887 = vmatprep.subr.bf16.mxu0 %v8163_v0  ;;  %5919 = vmatprep.subr.bf16.mxu1 %v8165_v34 }
 0x4a1   :  { %v1904_v60 = vpop.f32.mrb[10].mxu0  ;;  %v1975_v11 = vpop.f32.mrb[18].mxu1 }
 0x4a2   :  { %v1905_v16 = vadd.f32 %v1904_v60, %v1816_v46  ;;  %v1906_v39 = vpop.f32.mrb[11].mxu0  ;;  %v1977_v6 = vpop.f32.mrb[19].mxu1  ;;  %v1976_v3 = vadd.f32 %v1975_v11, %v1824_v35 }
 0x4a3   :  { %v1907_v18 = vadd.f32 %v1906_v39, %v1820_v59  ;;  %v1978_v49 = vadd.f32 %v1977_v6, %v1828_v52  ;;  %v2582_v39 = vld [vmem:[#allocation3 + $0x20] sm:$0xff]  ;;  %v2591_v52 = vld [vmem:[#allocation3 + $0x68] sm:$0xff] }
 0x4a4   :  { %v5023_v23 = vmul.f32 -1.442695, %v1905_v16  ;;  %v5025_v53 = vmul.f32 -1.442695, %v1976_v3  ;;  %v2578_v16 = vld [vmem:[#allocation3] sm:$0xff]  ;;  %v2589_v3 = vld [vmem:[#allocation3 + $0x58] sm:$0xff] }
 0x4a5   :  { %v5024_v22 = vmul.f32 -1.442695, %v1907_v18  ;;  %v2580_v18 = vld [vmem:[#allocation3 + $0x10] sm:$0xff] }
 0x4a6   :  { %6779 = vpow2.f32 %v5023_v23  ;;  %v2584_v23 = vld [vmem:[#allocation3 + $0x30] sm:$0xff] }
 0x4a7   :  { %6781 = vpow2.f32 %v5024_v22  ;;  %v2587_v22 = vld [vmem:[#allocation3 + $0x48] sm:$0xff] }
 0x4a8   :  { %6783 = vtanh.f32 %v1978_v49  ;;  %v2593_v49 = vld [vmem:[#allocation3 + $0x78] sm:$0xff] }
 0x4a9   :  { %6785 = vpow2.f32 %v5025_v53  ;;  %v8185_v53 = vpack.c.bf16 %v2582_v39, %v2578_v16  ;;  %v2616_v16 = vld [vmem:[#allocation3 + $0x130] sm:$0xff]  ;;  %v2619_v39 = vld [vmem:[#allocation3 + $0x148] sm:$0xff] }
 0x4b0   :  { %v6780_v10 = vpop.eup %6779 }
 0x4b1   :  { %v1989_v24 = vadd.f32 1.0, %v6780_v10  ;;  %v6782_v36 = vpop.eup %6781  ;;  %v8187_v10 = vpack.c.bf16 %v2584_v23, %v2580_v18  ;;  %v2621_v18 = vld [vmem:[#allocation3 + $0x158] sm:$0xff] }
 0x4b2   :  { %v1990_v38 = vadd.f32 1.0, %v6782_v36  ;;  %v6784_v43 = vpop.eup %6783  ;;  %v2590_v36 = vld [vmem:[#allocation3 + $0x60] sm:$0xff]  ;;  %v2625_v23 = vld [vmem:[#allocation3 + $0x178] sm:$0xff] }
 0x4b3   :  { %6787 = vrcp.f32 %v1989_v24  ;;  %v6786_v14 = vpop.eup %6785  ;;  %v2586_v24 = vld [vmem:[#allocation3 + $0x40] sm:$0xff] }
 0x4b4   :  { %6789 = vrcp.f32 %v1990_v38  ;;  %v1991_v31 = vadd.f32 1.0, %v6786_v14  ;;  %v8193_v14 = vpack.c.bf16 %v2593_v49, %v2589_v3  ;;  %v2622_v3 = vld [vmem:[#allocation3 + $0x160] sm:$0xff] }
 0x4b6   :  { %6791 = vrcp.f32 %v1991_v31  ;;  %v2599_v31 = vld [vmem:[#allocation3 + $0xa8] sm:$0xff] }
 0x4bd   :  { %v6788_v58 = vpop.eup %6787 }
 0x4be   :  { %v2000_v55 = vmul.f32 %v6788_v58, %v6784_v43  ;;  %v6790_v48 = vpop.eup %6789  ;;  %v8191_v43 = vpack.c.bf16 %v2591_v52, %v2587_v22  ;;  %v2588_v58 = vld [vmem:[#allocation3 + $0x50] sm:$0xff]  ;;  %v2618_v52 = vld [vmem:[#allocation3 + $0x140] sm:$0xff] }
 0x4bf   :  { %v1999_v29 = vmul.f32 %v6790_v48, %v8056_v47  ;;  %v2595_v48 = vld [vmem:[#allocation3 + $0x88] sm:$0xff] }
 0x4c0   :  { %v6792_v30 = vpop.eup %6791 }
 0x4c1   :  { %v2135_v21 = vpop.f32.mrb[12].mxu0  ;;  %v2206_v63 = vpop.f32.mrb[20].mxu1  ;;  %v8174_v20 = vadd.f32 %v2000_v55, %v1999_v29  ;;  %v2592_v55 = vld [vmem:[#allocation3 + $0x70] sm:$0xff]  ;;  %v2597_v29 = vld [vmem:[#allocation3 + $0x98] sm:$0xff] }
 0x4c2   :  { %v2215_v54 = vrot.slane %v2135_v21, 2  ;;  %v2137_v37 = vpop.f32.mrb[13].mxu0  ;;  %v2208_v62 = vpop.f32.mrb[21].mxu1  ;;  %v2217_v26 = vrot.slane %v2206_v63, 2  ;;  %v2601_v21 = vld [vmem:[#allocation3 + $0xb8] sm:$0xff]  ;;  %v8199_v63 = vpack.c.bf16 %v2590_v36, %v2586_v24  ;;  %v2620_v24 = vld [vmem:[#allocation3 + $0x150] sm:$0xff] }
 0x4c3   :  { %v2216_v15 = vrot.slane %v2137_v37, 2  ;;  %6793 = vtanh.f32 %v8174_v20  ;;  %v2218_v47 = vrot.slane %v2208_v62, 2  ;;  %v2594_v37 = vld [vmem:[#allocation3 + $0x80] sm:$0xff]  ;;  %v2624_v36 = vld [vmem:[#allocation3 + $0x170] sm:$0xff] }
 0x4c4   :  { %v2223_v13 = vadd.f32 %v2215_v54, %v7619_v51  ;;  %v2225_v27 = vadd.f32 %v2217_v26, %v7625_v28  ;;  %v8201_v54 = vpack.c.bf16 %v2592_v55, %v2588_v58  ;;  %v2598_v62 = vld [vmem:[#allocation3 + $0xa0] sm:$0xff]  ;;  %v2607_v26 = vld [vmem:[#allocation3 + $0xe8] sm:$0xff] }
 0x4c5   :  { %v2224_v41 = vadd.f32 %v2216_v15, %v7621_v42  ;;  %v2226_v2 = vadd.f32 %v2218_v47, %v7627_v32  ;;  %v2247_v32 = vrot.slane %v8064_v25, 6  ;;  %v8205_v15 = vpack.c.bf16 %v2599_v31, %v2595_v48  ;;  %v2605_v47 = vld [vmem:[#allocation3 + $0xd8] sm:$0xff]  ;;  %v2627_v58 = vld [vmem:[#allocation3 + $0x188] sm:$0xff] }
 0x4c6   :  { %v5026_v33 = vmul.f32 -1.442695, %v2223_v13  ;;  %v5028_v50 = vmul.f32 -1.442695, %v2225_v27  ;;  %v8207_v13 = vpack.c.bf16 %v2601_v21, %v2597_v29  ;;  %v2609_v27 = vld [vmem:[#allocation3 + $0xf8] sm:$0xff]  ;;  %v2631_v55 = vld [vmem:[#allocation3 + $0x1a8] sm:$0xff]  ;;  %v8249_v29 = vpack.c.bf16 %v2622_v3, %v2618_v52 }
 0x4c7   :  { %v5027_v61 = vmul.f32 -1.442695, %v2224_v41  ;;  %v2596_v41 = vld [vmem:[#allocation3 + $0x90] sm:$0xff]  ;;  %v2629_v48 = vld [vmem:[#allocation3 + $0x198] sm:$0xff]  ;;  %v8251_v21 = vpack.c.bf16 %v2624_v36, %v2620_v24  ;;  %v2815_v3 = vld [vmem:[#allocation8] sm:$0xff] }
 0x4c8   :  { %6795 = vpow2.f32 %v5026_v33  ;;  %v2600_v33 = vld [vmem:[#allocation3 + $0xb0] sm:$0xff]  ;;  %v2633_v31 = vld [vmem:[#allocation3 + $0x1b8] sm:$0xff]  ;;  %v2819_v24 = vld [vmem:[#allocation8 + $0x20] sm:$0xff] }
 0x4c9   :  { %6797 = vpow2.f32 %v5027_v61  ;;  %v2603_v61 = vld [vmem:[#allocation3 + $0xc8] sm:$0xff]  ;;  %v2822_v52 = vld [vmem:[#allocation8 + $0x38] sm:$0xff] }
 0x4ca   :  { %6799 = vtanh.f32 %v2226_v2  ;;  %v2602_v2 = vld [vmem:[#allocation3 + $0xc0] sm:$0xff] }
 0x4cb   :  { %6801 = vpow2.f32 %v5028_v50  ;;  %v8219_v50 = vpack.c.bf16 %v2607_v26, %v2603_v61  ;;  %v2628_v61 = vld [vmem:[#allocation3 + $0x190] sm:$0xff] }
 0x4cc   :  { %v2632_v26 = vld [vmem:[#allocation3 + $0x1b0] sm:$0xff] }
 0x4cd   :  { %v6794_v56 = vpop.eup %6793 }
 0x4ce   :  { %v2003_v45 = vmul.f32 %v6794_v56, %v6792_v30  ;;  %v8213_v30 = vpack.c.bf16 %v2598_v62, %v2594_v37  ;;  %v8215_v56 = vpack.c.bf16 %v2600_v33, %v2596_v41  ;;  %v2626_v37 = vld [vmem:[#allocation3 + $0x180] sm:$0xff]  ;;  %v8255_v41 = vpack.c.bf16 %v2631_v55, %v2627_v58  ;;  %v2817_v55 = vld [vmem:[#allocation8 + $0x10] sm:$0xff] }
 0x4cf   :  { %v2630_v62 = vld [vmem:[#allocation3 + $0x1a0] sm:$0xff]  ;;  %v8257_v33 = vpack.c.bf16 %v2633_v31, %v2629_v48  ;;  %v8287_v58 = vpack.c.bf16 %v2819_v24, %v2815_v3  ;;  %v2821_v48 = vld [vmem:[#allocation8 + $0x30] sm:$0xff] }
 0x4d0   :  { %2004 = vst [vmem:[#allocation2 + $0x4] sm:$0x3] %v2003_v45  ;;  %v2255_v5 = vrot.slane %v2003_v45, 2  ;;  %v2606_v45 = vld [vmem:[#allocation3 + $0xe0] sm:$0xff]  ;;  %v8290_v31 = vpack.c.bf16 %v2821_v48, %v2817_v55 }
 0x4d1   :  { %v2831_v3 = vld [vmem:[#allocation8 + $0x80] sm:$0xff] }
 0x4d2   :  { %v6796_v7 = vpop.eup %6795  ;;  %v2408_v42 = vrot.slane %v2255_v5, 6  ;;  %v8221_v5 = vpack.c.bf16 %v2609_v27, %v2605_v47  ;;  %v2635_v47 = vld [vmem:[#allocation3 + $0x1c8] sm:$0xff] }
 0x4d3   :  { %v2236_v51 = vadd.f32 1.0, %v6796_v7  ;;  %v6798_v1 = vpop.eup %6797  ;;  %v2604_v7 = vld [vmem:[#allocation3 + $0xd0] sm:$0xff]  ;;  %v2639_v27 = vld [vmem:[#allocation3 + $0x1e8] sm:$0xff] }
 0x4d4   :  { %v2237_v12 = vadd.f32 1.0, %v6798_v1  ;;  %2475 = vmatprep.mubr.f32.mxu0 %v2408_v42  ;;  %2546 = vmatprep.mubr.f32.mxu1 %v2408_v42  ;;  %v6800_v28 = vpop.eup %6799  ;;  %v2611_v42 = vld [vmem:[#allocation3 + $0x108] sm:$0xff] }
 0x4d5   :  { %6803 = vrcp.f32 %v2236_v51  ;;  %v6802_v8 = vpop.eup %6801  ;;  %v2608_v51 = vld [vmem:[#allocation3 + $0xf0] sm:$0xff]  ;;  %v2615_v1 = vld [vmem:[#allocation3 + $0x128] sm:$0xff] }
 0x4d6   :  { %6805 = vrcp.f32 %v2237_v12  ;;  %v2238_v59 = vadd.f32 1.0, %v6802_v8  ;;  %v2613_v12 = vld [vmem:[#allocation3 + $0x118] sm:$0xff]  ;;  %v8225_v8 = vpack.c.bf16 %v2606_v45, %v2602_v2  ;;  %v2835_v24 = vld [vmem:[#allocation8 + $0xa0] sm:$0xff] }
 0x4d7   :  { %v2637_v2 = vld [vmem:[#allocation3 + $0x1d8] sm:$0xff]  ;;  %v8311_v48 = vpack.c.bf16 %v2835_v24, %v2831_v3 }
 0x4d8   :  { %6807 = vrcp.f32 %v2238_v59  ;;  %v2641_v45 = vld [vmem:[#allocation3 + $0x1f8] sm:$0xff] }
 0x4d9   :  { %9558 = vst [vmem:[#allocation22_spill] sm:$0xff] %v8311_v48  ;;  %v2841_v3 = vld [vmem:[#allocation8 + $0xd0] sm:$0xff] }
 0x4da   :  { %v2845_v24 = vld [vmem:[#allocation8 + $0xf0] sm:$0xff] }
 0x4df   :  { %v6804_v57 = vpop.eup %6803 }
 0x4e0   :  { %v2250_v44 = vmul.f32 %v6804_v57, %v6800_v28  ;;  %v6806_v46 = vpop.eup %6805  ;;  %v2617_v28 = vld [vmem:[#allocation3 + $0x138] sm:$0xff]  ;;  %v8227_v57 = vpack.c.bf16 %v2608_v51, %v2604_v7  ;;  %v8261_v7 = vpack.c.bf16 %v2630_v62, %v2626_v37  ;;  %v8263_v51 = vpack.c.bf16 %v2632_v26, %v2628_v61  ;;  %v2828_v37 = vld [vmem:[#allocation8 + $0x68] sm:$0xff] }
 0x4e1   :  { %v2249_v60 = vmul.f32 %v6806_v46, %v2247_v32  ;;  %v2610_v32 = vld [vmem:[#allocation3 + $0x100] sm:$0xff]  ;;  %v8231_v46 = vpack.c.bf16 %v2615_v1, %v2611_v42  ;;  %v8233_v59 = vpack.c.bf16 %v2617_v28, %v2613_v12  ;;  %v8267_v1 = vpack.c.bf16 %v2639_v27, %v2635_v47 }
 0x4e2   :  { %v6808_v6 = vpop.eup %6807  ;;  %v2634_v42 = vld [vmem:[#allocation3 + $0x1c0] sm:$0xff]  ;;  %v8269_v12 = vpack.c.bf16 %v2641_v45, %v2637_v2 }
 0x4e3   :  { %v8182_v11 = vadd.f32 %v2250_v44, %v2249_v60  ;;  %v2614_v44 = vld [vmem:[#allocation3 + $0x120] sm:$0xff]  ;;  %v2612_v60 = vld [vmem:[#allocation3 + $0x110] sm:$0xff] }
 0x4e4   :  { %v8237_v22 = vpack.c.bf16 %v2614_v44, %v2610_v32  ;;  %v2638_v28 = vld [vmem:[#allocation3 + $0x1e0] sm:$0xff]  ;;  %v2636_v32 = vld [vmem:[#allocation3 + $0x1d0] sm:$0xff] }
 0x4e5   :  { %6809 = vtanh.f32 %v8182_v11  ;;  %v2640_v44 = vld [vmem:[#allocation3 + $0x1f0] sm:$0xff]  ;;  %v2826_v62 = vld [vmem:[#allocation8 + $0x58] sm:$0xff]  ;;  %v2823_v47 = vld [vmem:[#allocation8 + $0x40] sm:$0xff] }
 0x4e6   :  { %v2830_v26 = vld [vmem:[#allocation8 + $0x78] sm:$0xff]  ;;  %v2827_v27 = vld [vmem:[#allocation8 + $0x60] sm:$0xff] }
 0x4e7   :  { %v8297_v2 = vpack.c.bf16 %v2830_v26, %v2826_v62  ;;  %v8299_v45 = vpack.c.bf16 %v2827_v27, %v2823_v47  ;;  %v2840_v26 = vld [vmem:[#allocation8 + $0xc8] sm:$0xff]  ;;  %v2842_v27 = vld [vmem:[#allocation8 + $0xd8] sm:$0xff] }
 0x4e8   :  { %v2844_v47 = vld [vmem:[#allocation8 + $0xe8] sm:$0xff] }
 0x4ef   :  { %v6810_v35 = vpop.eup %6809 }
 0x4f0   :  { %v2253_v25 = vmul.f32 %v6810_v35, %v6808_v6  ;;  %v2623_v6 = vld [vmem:[#allocation3 + $0x168] sm:$0xff]  ;;  %v8239_v35 = vpack.c.bf16 %v2616_v16, %v2612_v60  ;;  %v8273_v60 = vpack.c.bf16 %v2638_v28, %v2634_v42  ;;  %v8275_v16 = vpack.c.bf16 %v2640_v44, %v2636_v32  ;;  %v2825_v42 = vld [vmem:[#allocation8 + $0x50] sm:$0xff] }
 0x4f1   :  { %v8243_v49 = vpack.c.bf16 %v2623_v6, %v2619_v39  ;;  %v2816_v39 = vld [vmem:[#allocation8 + $0x8] sm:$0xff]  ;;  %v2829_v28 = vld [vmem:[#allocation8 + $0x70] sm:$0xff] }
 0x4f2   :  { %v8189_v38 = vrot.slane %v2253_v25, 6  ;;  %v8245_v25 = vpack.c.bf16 %v2625_v23, %v2621_v18  ;;  %v2820_v6 = vld [vmem:[#allocation8 + $0x28] sm:$0xff]  ;;  %v2818_v18 = vld [vmem:[#allocation8 + $0x18] sm:$0xff]  ;;  %v8302_v32 = vpack.c.bf16 %v2829_v28, %v2825_v42  ;;  %v8319_v42 = vpack.c.bf16 %v2844_v47, %v2840_v26 }
 0x4f3   :  { %v8283_v23 = vpack.c.bf16 %v2820_v6, %v2816_v39  ;;  %v8285_v36 = vpack.c.bf16 %v2822_v52, %v2818_v18  ;;  %v2832_v44 = vld [vmem:[#allocation8 + $0x88] sm:$0xff]  ;;  %v2834_v6 = vld [vmem:[#allocation8 + $0x98] sm:$0xff] }
 0x4f4   :  { %2476 = vmatmul.mubr.f32.vlgmr.msra.gmra.mrb[14].mxu0 %v8189_v38  ;;  %2547 = vmatmul.mubr.f32.vlgmr.msra.gmra.mrb[22].mxu1 %v8189_v38  ;;  %v2836_v39 = vld [vmem:[#allocation8 + $0xa8] sm:$0xff]  ;;  %v2838_v52 = vld [vmem:[#allocation8 + $0xb8] sm:$0xff]  ;;  %9560 = vst [vmem:[#allocation24_spill] sm:$0xff] %v8319_v42 }
 0x4f5   :  { %5889 = vmatpush1.bf16.msra.mxu0 %v8185_v53  ;;  %5921 = vmatpush1.bf16.msra.mxu1 %v8187_v10  ;;  %v8307_v18 = vpack.c.bf16 %v2836_v39, %v2832_v44  ;;  %v8309_v55 = vpack.c.bf16 %v2838_v52, %v2834_v6  ;;  %v2846_v28 = vld [vmem:[#allocation8 + $0xf8] sm:$0xff]  ;;  %v2839_v44 = vld [vmem:[#allocation8 + $0xc0] sm:$0xff]  ;;  %v2852_v26 = vld [vmem:[#allocation8 + $0x128] sm:$0xff] }
 0x4f6   :  { %5891 = vmatprep.subr.bf16.mxu0 %v8191_v43  ;;  %5923 = vmatprep.subr.bf16.mxu1 %v8193_v14  ;;  %v2843_v39 = vld [vmem:[#allocation8 + $0xe0] sm:$0xff]  ;;  %v8321_v6 = vpack.c.bf16 %v2846_v28, %v2842_v27  ;;  %v2850_v47 = vld [vmem:[#allocation8 + $0x118] sm:$0xff] }
 0x4f7   :  { %2706 = vmatprep.mubr.f32.mxu0 %v9382_v40  ;;  %2777 = vmatprep.mubr.f32.mxu1 %v9382_v40  ;;  %9556 = vst [vmem:[#allocation20_spill] sm:$0xff] %v8307_v18  ;;  %9557 = vst [vmem:[#allocation21_spill] sm:$0xff] %v8309_v55  ;;  %v8323_v52 = vpack.c.bf16 %v2843_v39, %v2839_v44  ;;  %v2854_v27 = vld [vmem:[#allocation8 + $0x138] sm:$0xff]  ;;  %v2847_v28 = vld [vmem:[#allocation8 + $0x100] sm:$0xff] }
 0x4f8   :  { %9561 = vst [vmem:[#allocation25_spill] sm:$0xff] %v8321_v6  ;;  %v2851_v44 = vld [vmem:[#allocation8 + $0x120] sm:$0xff]  ;;  %v8333_v39 = vpack.c.bf16 %v2854_v27, %v2850_v47  ;;  %v2862_v47 = vld [vmem:[#allocation8 + $0x178] sm:$0xff] }
 0x4f9   :  { %5893 = vmatpush1.bf16.msra.mxu0 %v8199_v63  ;;  %5925 = vmatpush1.bf16.msra.mxu1 %v8201_v54  ;;  %9562 = vst [vmem:[#allocation26_spill] sm:$0xff] %v8323_v52  ;;  %v2855_v27 = vld [vmem:[#allocation8 + $0x140] sm:$0xff] }
 0x4fa   :  { %5895 = vmatprep.subr.bf16.mxu0 %v8205_v15  ;;  %5927 = vmatprep.subr.bf16.mxu1 %v8207_v13  ;;  %9565 = vst [vmem:[#allocation29_spill] sm:$0xff] %v8333_v39 }
 0x4fd   :  { %5897 = vmatpush1.bf16.msra.mxu0 %v8213_v30  ;;  %5929 = vmatpush1.bf16.msra.mxu1 %v8215_v56 }
 0x4fe   :  { %5899 = vmatprep.subr.bf16.mxu0 %v8219_v50  ;;  %5931 = vmatprep.subr.bf16.mxu1 %v8221_v5 }
 0x501   :  { %5901 = vmatpush1.bf16.msra.mxu0 %v8225_v8  ;;  %5933 = vmatpush1.bf16.msra.mxu1 %v8227_v57 }
 0x502   :  { %5903 = vmatprep.subr.bf16.mxu0 %v8231_v46  ;;  %5935 = vmatprep.subr.bf16.mxu1 %v8233_v59 }
 0x505   :  { %5905 = vmatpush1.bf16.msra.mxu0 %v8237_v22  ;;  %5937 = vmatpush1.bf16.msra.mxu1 %v8239_v35 }
 0x506   :  { %5907 = vmatprep.subr.bf16.mxu0 %v8243_v49  ;;  %5939 = vmatprep.subr.bf16.mxu1 %v8245_v25 }
 0x509   :  { %5909 = vmatpush1.bf16.msra.mxu0 %v8249_v29  ;;  %5941 = vmatpush1.bf16.msra.mxu1 %v8251_v21 }
 0x50a   :  { %5911 = vmatprep.subr.bf16.mxu0 %v8255_v41  ;;  %5943 = vmatprep.subr.bf16.mxu1 %v8257_v33 }
 0x50d   :  { %5913 = vmatpush1.bf16.msra.mxu0 %v8261_v7  ;;  %5945 = vmatpush1.bf16.msra.mxu1 %v8263_v51 }
 0x50e   :  { %5915 = vmatprep.subr.bf16.mxu0 %v8267_v1  ;;  %5947 = vmatprep.subr.bf16.mxu1 %v8269_v12 }
 0x511   :  { %5917 = vmatpush1.bf16.msra.mxu0 %v8273_v60  ;;  %5949 = vmatpush1.bf16.msra.mxu1 %v8275_v16 }
 0x512   :  { %5951 = vmatprep.subr.bf16.mxu0 %v8283_v23  ;;  %6015 = vmatprep.subr.bf16.mxu1 %v8285_v36 }
 0x514   :  { %2707 = vmatmul.mubr.f32.vlgmr.msra.gmra.mrb[16].mxu0 %v8189_v38  ;;  %2778 = vmatmul.mubr.f32.vlgmr.msra.gmra.mrb[24].mxu1 %v8189_v38  ;;  %v2824_v38 = vld [vmem:[#allocation8 + $0x48] sm:$0xff] }
 0x515   :  { %5953 = vmatpush1.bf16.msra.mxu0 %v8287_v58  ;;  %6017 = vmatpush1.bf16.msra.mxu1 %v8290_v31  ;;  %v8295_v61 = vpack.c.bf16 %v2828_v37, %v2824_v38  ;;  %v2833_v38 = vld [vmem:[#allocation8 + $0x90] sm:$0xff] }
 0x516   :  { %6019 = vmatprep.subr.bf16.mxu1 %v8297_v2  ;;  %v2837_v37 = vld [vmem:[#allocation8 + $0xb0] sm:$0xff] }
 0x517   :  { %5955 = vmatprep.subr.bf16.mxu0 %v8295_v61  ;;  %v8314_v62 = vpack.c.bf16 %v2837_v37, %v2833_v38  ;;  %v8326_v38 = vpack.c.bf16 %v2845_v24, %v2841_v3  ;;  %v2848_v37 = vld [vmem:[#allocation8 + $0x108] sm:$0xff]  ;;  %v2849_v3 = vld [vmem:[#allocation8 + $0x110] sm:$0xff] }
 0x518   :  { %v2853_v24 = vld [vmem:[#allocation8 + $0x130] sm:$0xff] }
 0x519   :  { %5957 = vmatpush1.bf16.msra.mxu0 %v8299_v45  ;;  %6021 = vmatpush1.bf16.msra.mxu1 %v8302_v32  ;;  %9559 = vst [vmem:[#allocation23_spill] sm:$0xff] %v8314_v62  ;;  %9563 = vst [vmem:[#allocation27_spill] sm:$0xff] %v8326_v38 }
 0x51a   :  { %5959 = vmatprep.subr.bf16.mxu0 %v8307_v18  ;;  %6023 = vmatprep.subr.bf16.mxu1 %v8309_v55  ;;  %v2930_v55 = vld [vmem:[#allocation8 + $0x398] sm:$0xff] }
 0x51d   :  { %5961 = vmatpush1.bf16.msra.mxu0 %v8311_v48  ;;  %6025 = vmatpush1.bf16.msra.mxu1 %v8314_v62  ;;  %v8331_v62 = vpack.c.bf16 %v2852_v26, %v2848_v37  ;;  %v8335_v48 = vpack.c.bf16 %v2851_v44, %v2847_v28  ;;  %v2856_v37 = vld [vmem:[#allocation8 + $0x148] sm:$0xff]  ;;  %v2859_v28 = vld [vmem:[#allocation8 + $0x160] sm:$0xff] }
 0x51e   :  { %5963 = vmatprep.subr.bf16.mxu0 %v8319_v42  ;;  %6027 = vmatprep.subr.bf16.mxu1 %v8321_v6  ;;  %v8338_v6 = vpack.c.bf16 %v2853_v24, %v2849_v3  ;;  %v2860_v26 = vld [vmem:[#allocation8 + $0x168] sm:$0xff]  ;;  %v8347_v42 = vpack.c.bf16 %v2859_v28, %v2855_v27  ;;  %v2857_v3 = vld [vmem:[#allocation8 + $0x150] sm:$0xff]  ;;  %v2867_v27 = vld [vmem:[#allocation8 + $0x1a0] sm:$0xff] }
 0x51f   :  { %9564 = vst [vmem:[#allocation28_spill] sm:$0xff] %v8331_v62  ;;  %9566 = vst [vmem:[#allocation30_spill] sm:$0xff] %v8335_v48  ;;  %v2861_v24 = vld [vmem:[#allocation8 + $0x170] sm:$0xff] }
 0x520   :  { %9567 = vst [vmem:[#allocation31_spill] sm:$0xff] %v8338_v6  ;;  %9570 = vst [vmem:[#allocation34_spill] sm:$0xff] %v8347_v42 }
 0x521   :  { %5965 = vmatpush1.bf16.msra.mxu0 %v8323_v52  ;;  %6029 = vmatpush1.bf16.msra.mxu1 %v8326_v38  ;;  %v2858_v38 = vld [vmem:[#allocation8 + $0x158] sm:$0xff]  ;;  %v8343_v52 = vpack.c.bf16 %v2860_v26, %v2856_v37  ;;  %v2868_v37 = vld [vmem:[#allocation8 + $0x1a8] sm:$0xff] }
 0x522   :  { %5967 = vmatprep.subr.bf16.mxu0 %v8331_v62  ;;  %6031 = vmatprep.subr.bf16.mxu1 %v8333_v39  ;;  %v8345_v44 = vpack.c.bf16 %v2862_v47, %v2858_v38  ;;  %v8350_v39 = vpack.c.bf16 %v2861_v24, %v2857_v3  ;;  %v2866_v26 = vld [vmem:[#allocation8 + $0x198] sm:$0xff]  ;;  %v2863_v47 = vld [vmem:[#allocation8 + $0x180] sm:$0xff]  ;;  %v2865_v3 = vld [vmem:[#allocation8 + $0x190] sm:$0xff] }
 0x523   :  { %9568 = vst [vmem:[#allocation32_spill] sm:$0xff] %v8343_v52  ;;  %v2870_v38 = vld [vmem:[#allocation8 + $0x1b8] sm:$0xff]  ;;  %v8359_v62 = vpack.c.bf16 %v2867_v27, %v2863_v47  ;;  %v2869_v24 = vld [vmem:[#allocation8 + $0x1b0] sm:$0xff]  ;;  %v2875_v47 = vld [vmem:[#allocation8 + $0x1e0] sm:$0xff] }
 0x524   :  { %9569 = vst [vmem:[#allocation33_spill] sm:$0xff] %v8345_v44  ;;  %9571 = vst [vmem:[#allocation35_spill] sm:$0xff] %v8350_v39  ;;  %v8357_v28 = vpack.c.bf16 %v2870_v38, %v2866_v26  ;;  %v2878_v26 = vld [vmem:[#allocation8 + $0x1f8] sm:$0xff]  ;;  %v2871_v38 = vld [vmem:[#allocation8 + $0x1c0] sm:$0xff] }
 0x525   :  { %5969 = vmatpush1.bf16.msra.mxu0 %v8335_v48  ;;  %6033 = vmatpush1.bf16.msra.mxu1 %v8338_v6  ;;  %v2864_v6 = vld [vmem:[#allocation8 + $0x188] sm:$0xff]  ;;  %9574 = vst [vmem:[#allocation38_spill] sm:$0xff] %v8359_v62 }
 0x526   :  { %5971 = vmatprep.subr.bf16.mxu0 %v8343_v52  ;;  %6035 = vmatprep.subr.bf16.mxu1 %v8345_v44  ;;  %v8355_v48 = vpack.c.bf16 %v2868_v37, %v2864_v6  ;;  %9573 = vst [vmem:[#allocation37_spill] sm:$0xff] %v8357_v28  ;;  %v8362_v44 = vpack.c.bf16 %v2869_v24, %v2865_v3  ;;  %v2876_v6 = vld [vmem:[#allocation8 + $0x1e8] sm:$0xff]  ;;  %v2874_v37 = vld [vmem:[#allocation8 + $0x1d8] sm:$0xff]  ;;  %v2873_v3 = vld [vmem:[#allocation8 + $0x1d0] sm:$0xff] }
 0x527   :  { %v8369_v27 = vpack.c.bf16 %v2878_v26, %v2874_v37  ;;  %v8371_v52 = vpack.c.bf16 %v2875_v47, %v2871_v38  ;;  %v2877_v24 = vld [vmem:[#allocation8 + $0x1f0] sm:$0xff]  ;;  %v2886_v37 = vld [vmem:[#allocation8 + $0x238] sm:$0xff]  ;;  %v2879_v26 = vld [vmem:[#allocation8 + $0x200] sm:$0xff] }
 0x528   :  { %9572 = vst [vmem:[#allocation36_spill] sm:$0xff] %v8355_v48  ;;  %9575 = vst [vmem:[#allocation39_spill] sm:$0xff] %v8362_v44  ;;  %v2883_v38 = vld [vmem:[#allocation8 + $0x220] sm:$0xff] }
 0x529   :  { %5973 = vmatpush1.bf16.msra.mxu0 %v8347_v42  ;;  %6037 = vmatpush1.bf16.msra.mxu1 %v8350_v39  ;;  %v2872_v39 = vld [vmem:[#allocation8 + $0x1c8] sm:$0xff]  ;;  %9577 = vst [vmem:[#allocation41_spill] sm:$0xff] %v8369_v27  ;;  %9578 = vst [vmem:[#allocation42_spill] sm:$0xff] %v8371_v52 }
 0x52a   :  { %5975 = vmatprep.subr.bf16.mxu0 %v8355_v48  ;;  %6039 = vmatprep.subr.bf16.mxu1 %v8357_v28  ;;  %v8367_v42 = vpack.c.bf16 %v2876_v6, %v2872_v39  ;;  %v8374_v28 = vpack.c.bf16 %v2877_v24, %v2873_v3  ;;  %v2884_v39 = vld [vmem:[#allocation8 + $0x228] sm:$0xff]  ;;  %v2882_v6 = vld [vmem:[#allocation8 + $0x218] sm:$0xff]  ;;  %v8383_v48 = vpack.c.bf16 %v2883_v38, %v2879_v26  ;;  %v2881_v3 = vld [vmem:[#allocation8 + $0x210] sm:$0xff] }
 0x52b   :  { %v8381_v47 = vpack.c.bf16 %v2886_v37, %v2882_v6  ;;  %v2885_v24 = vld [vmem:[#allocation8 + $0x230] sm:$0xff]  ;;  %v2894_v6 = vld [vmem:[#allocation8 + $0x278] sm:$0xff]  ;;  %v2887_v37 = vld [vmem:[#allocation8 + $0x240] sm:$0xff] }
 0x52c   :  { %9576 = vst [vmem:[#allocation40_spill] sm:$0xff] %v8367_v42  ;;  %9579 = vst [vmem:[#allocation43_spill] sm:$0xff] %v8374_v28  ;;  %v2891_v26 = vld [vmem:[#allocation8 + $0x260] sm:$0xff] }
 0x52d   :  { %5977 = vmatpush1.bf16.msra.mxu0 %v8359_v62  ;;  %6041 = vmatpush1.bf16.msra.mxu1 %v8362_v44  ;;  %v2880_v44 = vld [vmem:[#allocation8 + $0x208] sm:$0xff]  ;;  %9581 = vst [vmem:[#allocation45_spill] sm:$0xff] %v8381_v47  ;;  %9582 = vst [vmem:[#allocation46_spill] sm:$0xff] %v8383_v48 }
 0x52e   :  { %5979 = vmatprep.subr.bf16.mxu0 %v8367_v42  ;;  %6043 = vmatprep.subr.bf16.mxu1 %v8369_v27  ;;  %v8379_v62 = vpack.c.bf16 %v2884_v39, %v2880_v44  ;;  %v8386_v27 = vpack.c.bf16 %v2885_v24, %v2881_v3  ;;  %v2892_v44 = vld [vmem:[#allocation8 + $0x268] sm:$0xff]  ;;  %v2890_v39 = vld [vmem:[#allocation8 + $0x258] sm:$0xff]  ;;  %v8395_v42 = vpack.c.bf16 %v2891_v26, %v2887_v37  ;;  %v2889_v3 = vld [vmem:[#allocation8 + $0x250] sm:$0xff] }
 0x52f   :  { %v8393_v38 = vpack.c.bf16 %v2894_v6, %v2890_v39  ;;  %v2893_v24 = vld [vmem:[#allocation8 + $0x270] sm:$0xff]  ;;  %v2902_v39 = vld [vmem:[#allocation8 + $0x2b8] sm:$0xff]  ;;  %v2895_v6 = vld [vmem:[#allocation8 + $0x280] sm:$0xff] }
 0x530   :  { %9580 = vst [vmem:[#allocation44_spill] sm:$0xff] %v8379_v62  ;;  %9583 = vst [vmem:[#allocation47_spill] sm:$0xff] %v8386_v27  ;;  %v2899_v37 = vld [vmem:[#allocation8 + $0x2a0] sm:$0xff] }
 0x531   :  { %5981 = vmatpush1.bf16.msra.mxu0 %v8371_v52  ;;  %6045 = vmatpush1.bf16.msra.mxu1 %v8374_v28  ;;  %v2888_v28 = vld [vmem:[#allocation8 + $0x248] sm:$0xff]  ;;  %9585 = vst [vmem:[#allocation49_spill] sm:$0xff] %v8393_v38  ;;  %9586 = vst [vmem:[#allocation50_spill] sm:$0xff] %v8395_v42 }
 0x532   :  { %5983 = vmatprep.subr.bf16.mxu0 %v8379_v62  ;;  %6047 = vmatprep.subr.bf16.mxu1 %v8381_v47  ;;  %v8391_v52 = vpack.c.bf16 %v2892_v44, %v2888_v28  ;;  %v8398_v47 = vpack.c.bf16 %v2893_v24, %v2889_v3  ;;  %v2900_v28 = vld [vmem:[#allocation8 + $0x2a8] sm:$0xff]  ;;  %v2898_v44 = vld [vmem:[#allocation8 + $0x298] sm:$0xff]  ;;  %v8407_v62 = vpack.c.bf16 %v2899_v37, %v2895_v6  ;;  %v2897_v3 = vld [vmem:[#allocation8 + $0x290] sm:$0xff] }
 0x533   :  { %v8405_v26 = vpack.c.bf16 %v2902_v39, %v2898_v44  ;;  %v2901_v24 = vld [vmem:[#allocation8 + $0x2b0] sm:$0xff]  ;;  %v2910_v44 = vld [vmem:[#allocation8 + $0x2f8] sm:$0xff]  ;;  %v2903_v39 = vld [vmem:[#allocation8 + $0x2c0] sm:$0xff] }
 0x534   :  { %9584 = vst [vmem:[#allocation48_spill] sm:$0xff] %v8391_v52  ;;  %9587 = vst [vmem:[#allocation51_spill] sm:$0xff] %v8398_v47  ;;  %v2907_v6 = vld [vmem:[#allocation8 + $0x2e0] sm:$0xff] }
 0x535   :  { %5985 = vmatpush1.bf16.msra.mxu0 %v8383_v48  ;;  %6049 = vmatpush1.bf16.msra.mxu1 %v8386_v27  ;;  %v2896_v27 = vld [vmem:[#allocation8 + $0x288] sm:$0xff]  ;;  %9589 = vst [vmem:[#allocation53_spill] sm:$0xff] %v8405_v26  ;;  %9590 = vst [vmem:[#allocation54_spill] sm:$0xff] %v8407_v62 }
 0x536   :  { %5987 = vmatprep.subr.bf16.mxu0 %v8391_v52  ;;  %6051 = vmatprep.subr.bf16.mxu1 %v8393_v38  ;;  %v8403_v48 = vpack.c.bf16 %v2900_v28, %v2896_v27  ;;  %v8410_v38 = vpack.c.bf16 %v2901_v24, %v2897_v3  ;;  %v2908_v27 = vld [vmem:[#allocation8 + $0x2e8] sm:$0xff]  ;;  %v2906_v28 = vld [vmem:[#allocation8 + $0x2d8] sm:$0xff]  ;;  %v8419_v52 = vpack.c.bf16 %v2907_v6, %v2903_v39  ;;  %v2905_v3 = vld [vmem:[#allocation8 + $0x2d0] sm:$0xff] }
 0x537   :  { %v8417_v37 = vpack.c.bf16 %v2910_v44, %v2906_v28  ;;  %v2909_v24 = vld [vmem:[#allocation8 + $0x2f0] sm:$0xff]  ;;  %v2918_v28 = vld [vmem:[#allocation8 + $0x338] sm:$0xff]  ;;  %v2911_v44 = vld [vmem:[#allocation8 + $0x300] sm:$0xff] }
 0x538   :  { %9588 = vst [vmem:[#allocation52_spill] sm:$0xff] %v8403_v48  ;;  %9591 = vst [vmem:[#allocation55_spill] sm:$0xff] %v8410_v38  ;;  %v2915_v39 = vld [vmem:[#allocation8 + $0x320] sm:$0xff] }
 0x539   :  { %5989 = vmatpush1.bf16.msra.mxu0 %v8395_v42  ;;  %6053 = vmatpush1.bf16.msra.mxu1 %v8398_v47  ;;  %v2904_v47 = vld [vmem:[#allocation8 + $0x2c8] sm:$0xff]  ;;  %9593 = vst [vmem:[#allocation57_spill] sm:$0xff] %v8417_v37  ;;  %9594 = vst [vmem:[#allocation58_spill] sm:$0xff] %v8419_v52 }
 0x53a   :  { %5991 = vmatprep.subr.bf16.mxu0 %v8403_v48  ;;  %6055 = vmatprep.subr.bf16.mxu1 %v8405_v26  ;;  %v8415_v42 = vpack.c.bf16 %v2908_v27, %v2904_v47  ;;  %v8422_v26 = vpack.c.bf16 %v2909_v24, %v2905_v3  ;;  %v2916_v47 = vld [vmem:[#allocation8 + $0x328] sm:$0xff]  ;;  %v2914_v27 = vld [vmem:[#allocation8 + $0x318] sm:$0xff]  ;;  %v8431_v48 = vpack.c.bf16 %v2915_v39, %v2911_v44  ;;  %v2913_v3 = vld [vmem:[#allocation8 + $0x310] sm:$0xff] }
 0x53b   :  { %v8429_v6 = vpack.c.bf16 %v2918_v28, %v2914_v27  ;;  %v2917_v24 = vld [vmem:[#allocation8 + $0x330] sm:$0xff]  ;;  %v2926_v27 = vld [vmem:[#allocation8 + $0x378] sm:$0xff]  ;;  %v2919_v28 = vld [vmem:[#allocation8 + $0x340] sm:$0xff] }
 0x53c   :  { %9592 = vst [vmem:[#allocation56_spill] sm:$0xff] %v8415_v42  ;;  %9595 = vst [vmem:[#allocation59_spill] sm:$0xff] %v8422_v26  ;;  %v2923_v44 = vld [vmem:[#allocation8 + $0x360] sm:$0xff] }
 0x53d   :  { %5993 = vmatpush1.bf16.msra.mxu0 %v8407_v62  ;;  %6057 = vmatpush1.bf16.msra.mxu1 %v8410_v38  ;;  %v2912_v38 = vld [vmem:[#allocation8 + $0x308] sm:$0xff]  ;;  %9597 = vst [vmem:[#allocation61_spill] sm:$0xff] %v8429_v6  ;;  %9598 = vst [vmem:[#allocation62_spill] sm:$0xff] %v8431_v48 }
 0x53e   :  { %5995 = vmatprep.subr.bf16.mxu0 %v8415_v42  ;;  %6059 = vmatprep.subr.bf16.mxu1 %v8417_v37  ;;  %v8427_v62 = vpack.c.bf16 %v2916_v47, %v2912_v38  ;;  %v8434_v37 = vpack.c.bf16 %v2917_v24, %v2913_v3  ;;  %v2924_v38 = vld [vmem:[#allocation8 + $0x368] sm:$0xff]  ;;  %v2922_v47 = vld [vmem:[#allocation8 + $0x358] sm:$0xff]  ;;  %v8443_v42 = vpack.c.bf16 %v2923_v44, %v2919_v28  ;;  %v2921_v3 = vld [vmem:[#allocation8 + $0x350] sm:$0xff] }
 0x53f   :  { %v8441_v39 = vpack.c.bf16 %v2926_v27, %v2922_v47  ;;  %v2925_v24 = vld [vmem:[#allocation8 + $0x370] sm:$0xff]  ;;  %v2927_v47 = vld [vmem:[#allocation8 + $0x380] sm:$0xff] }
 0x540   :  { %9596 = vst [vmem:[#allocation60_spill] sm:$0xff] %v8427_v62  ;;  %9599 = vst [vmem:[#allocation63_spill] sm:$0xff] %v8434_v37  ;;  %v2931_v27 = vld [vmem:[#allocation8 + $0x3a0] sm:$0xff] }
 0x541   :  { %5997 = vmatpush1.bf16.msra.mxu0 %v8419_v52  ;;  %6061 = vmatpush1.bf16.msra.mxu1 %v8422_v26  ;;  %v2920_v26 = vld [vmem:[#allocation8 + $0x348] sm:$0xff]  ;;  %9601 = vst [vmem:[#allocation65_spill] sm:$0xff] %v8441_v39  ;;  %9602 = vst [vmem:[#allocation66_spill] sm:$0xff] %v8443_v42  ;;  %v8455_v44 = vpack.c.bf16 %v2931_v27, %v2927_v47  ;;  %v2937_v47 = vld [vmem:[#allocation8 + $0x3d0] sm:$0xff] }
 0x542   :  { %5999 = vmatprep.subr.bf16.mxu0 %v8427_v62  ;;  %6063 = vmatprep.subr.bf16.mxu1 %v8429_v6  ;;  %v8439_v52 = vpack.c.bf16 %v2924_v38, %v2920_v26  ;;  %v8446_v6 = vpack.c.bf16 %v2925_v24, %v2921_v3  ;;  %v2932_v62 = vld [vmem:[#allocation8 + $0x3a8] sm:$0xff]  ;;  %v2934_v38 = vld [vmem:[#allocation8 + $0x3b8] sm:$0xff]  ;;  %v2929_v3 = vld [vmem:[#allocation8 + $0x390] sm:$0xff] }
 0x543   :  { %v8453_v28 = vpack.c.bf16 %v2934_v38, %v2930_v55  ;;  %9604 = vst [vmem:[#allocation68_spill] sm:$0xff] %v8455_v44  ;;  %v2933_v24 = vld [vmem:[#allocation8 + $0x3b0] sm:$0xff]  ;;  %v2935_v55 = vld [vmem:[#allocation8 + $0x3c0] sm:$0xff] }
 0x544   :  { %9600 = vst [vmem:[#allocation64_spill] sm:$0xff] %v8439_v52  ;;  %9603 = vst [vmem:[#allocation67_spill] sm:$0xff] %v8446_v6  ;;  %v2939_v38 = vld [vmem:[#allocation8 + $0x3e0] sm:$0xff] }
 0x545   :  { %6001 = vmatpush1.bf16.msra.mxu0 %v8431_v48  ;;  %6065 = vmatpush1.bf16.msra.mxu1 %v8434_v37  ;;  %v2928_v48 = vld [vmem:[#allocation8 + $0x388] sm:$0xff]  ;;  %v8458_v37 = vpack.c.bf16 %v2933_v24, %v2929_v3  ;;  %v8466_v27 = vpack.c.bf16 %v2939_v38, %v2935_v55 }
 0x546   :  { %6003 = vmatprep.subr.bf16.mxu0 %v8439_v52  ;;  %6067 = vmatprep.subr.bf16.mxu1 %v8441_v39  ;;  %v8450_v26 = vpack.c.bf16 %v2932_v62, %v2928_v48  ;;  %v2936_v52 = vld [vmem:[#allocation8 + $0x3c8] sm:$0xff]  ;;  %v2942_v48 = vld [vmem:[#allocation8 + $0x3f8] sm:$0xff] }
 0x547   :  { %9605 = vst [vmem:[#allocation69_spill] sm:$0xff] %v8458_v37  ;;  %v2940_v39 = vld [vmem:[#allocation8 + $0x3e8] sm:$0xff]  ;;  %9608 = vst [vmem:[#allocation76_spill] sm:$0xff] %v8466_v27 }
 0x548   :  { %v8461_v62 = vpack.c.bf16 %v2940_v39, %v2936_v52 }
 0x549   :  { %6005 = vmatpush1.bf16.msra.mxu0 %v8443_v42  ;;  %6069 = vmatpush1.bf16.msra.mxu1 %v8446_v6  ;;  %v2938_v42 = vld [vmem:[#allocation8 + $0x3d8] sm:$0xff]  ;;  %v2941_v6 = vld [vmem:[#allocation8 + $0x3f0] sm:$0xff] }
 0x54a   :  { %6007 = vmatprep.subr.bf16.mxu0 %v8450_v26  ;;  %6071 = vmatprep.subr.bf16.mxu1 %v8453_v28  ;;  %9606 = vst [vmem:[#allocation70_spill] sm:$0xff] %v8461_v62  ;;  %v8463_v18 = vpack.c.bf16 %v2942_v48, %v2938_v42  ;;  %v8470_v3 = vpack.c.bf16 %v2941_v6, %v2937_v47  ;;  %v2384_v42 = vld [vmem:[#allocation9] sm:$0xf] }
 0x54b   :  { %v2389_v52 = vrot.slane %v2384_v42, %v9554_v4  ;;  %v2393_v39 = vrot.slane %v2384_v42, %v9555_v17 }
 0x54c   :  { %9607 = vst [vmem:[#allocation71_spill] sm:$0xff] %v8463_v18  ;;  %9609 = vst [vmem:[#allocation79_spill] sm:$0xff] %v8470_v3 }
 0x54d   :  { %6009 = vmatpush1.bf16.msra.mxu0 %v8455_v44  ;;  %6073 = vmatpush1.bf16.msra.mxu1 %v8458_v37 }
 0x54e   :  { %6011 = vmatprep.subr.bf16.mxu0 %v8461_v62  ;;  %6075 = vmatprep.subr.bf16.mxu1 %v8463_v18 }
 0x551   :  { %6013 = vmatpush1.bf16.msra.mxu0 %v8466_v27  ;;  %6077 = vmatpush1.bf16.msra.mxu1 %v8470_v3  ;;  %v2397_v3 = vrot.slane %v2384_v42, %v9437_v9 }
 0x552   :  { %6079 = vmatprep.subr.bf16.mxu0 %v8163_v0  ;;  %6111 = vmatprep.subr.bf16.mxu1 %v8165_v34  ;;  %v2401_v0 = vrot.slane %v2384_v42, %v7611_v19 }
 0x5c7   :  { %v2477_v24 = vpop.f32.mrb[14].mxu0  ;;  %v2548_v48 = vpop.f32.mrb[22].mxu1 }
 0x5c8   :  { %v2478_v55 = vadd.f32 %v2477_v24, %v2389_v52  ;;  %v2479_v6 = vpop.f32.mrb[15].mxu0  ;;  %v2550_v38 = vpop.f32.mrb[23].mxu1  ;;  %v2549_v34 = vadd.f32 %v2548_v48, %v2397_v3 }
 0x5c9   :  { %v2480_v47 = vadd.f32 %v2479_v6, %v2393_v39  ;;  %v2551_v27 = vadd.f32 %v2550_v38, %v2401_v0  ;;  %v9610_v38 = vld [vmem:[#allocation74_spill] sm:$0xff] }
 0x5ca   :  { %v5029_v18 = vmul.f32 -1.442695, %v2478_v55  ;;  %v5031_v37 = vmul.f32 -1.442695, %v2549_v34 }
 0x5cb   :  { %v5030_v62 = vmul.f32 -1.442695, %v2480_v47 }
 0x5cc   :  { %6811 = vpow2.f32 %v5029_v18 }
 0x5cd   :  { %6813 = vpow2.f32 %v5030_v62 }
 0x5ce   :  { %6815 = vtanh.f32 %v2551_v27 }
 0x5cf   :  { %6817 = vpow2.f32 %v5031_v37  ;;  %v9611_v37 = vld [vmem:[#allocation75_spill] sm:$0xff] }
 0x5d6   :  { %v6812_v4 = vpop.eup %6811 }
 0x5d7   :  { %v2562_v44 = vadd.f32 1.0, %v6812_v4  ;;  %v6814_v17 = vpop.eup %6813 }
 0x5d8   :  { %v2563_v52 = vadd.f32 1.0, %v6814_v17  ;;  %v6816_v39 = vpop.eup %6815 }
 0x5d9   :  { %6819 = vrcp.f32 %v2562_v44  ;;  %v6818_v24 = vpop.eup %6817 }
 0x5da   :  { %6821 = vrcp.f32 %v2563_v52  ;;  %v2564_v47 = vadd.f32 1.0, %v6818_v24  ;;  %v9612_v52 = vld [vmem:[#allocation77_spill] sm:$0xff]  ;;  %v9613_v24 = vld [vmem:[#allocation78_spill] sm:$0xff] }
 0x5dc   :  { %6823 = vrcp.f32 %v2564_v47 }
 0x5e3   :  { %v6820_v55 = vpop.eup %6819 }
 0x5e4   :  { %v2573_v18 = vmul.f32 %v6820_v55, %v6816_v39  ;;  %v6822_v6 = vpop.eup %6821 }
 0x5e5   :  { %v2572_v62 = vmul.f32 %v6822_v6, %v8174_v20 }
 0x5e6   :  { %v6824_v20 = vpop.eup %6823 }
 0x5e7   :  { %v2708_v42 = vpop.f32.mrb[16].mxu0  ;;  %v2779_v3 = vpop.f32.mrb[24].mxu1  ;;  %v8482_v48 = vadd.f32 %v2573_v18, %v2572_v62 }
 0x5e8   :  { %v2784_v4 = vadd.f32 %v2708_v42, %v9610_v38  ;;  %v2710_v27 = vpop.f32.mrb[17].mxu0  ;;  %v2781_v0 = vpop.f32.mrb[25].mxu1  ;;  %v2786_v39 = vadd.f32 %v2779_v3, %v9612_v52 }
 0x5e9   :  { %v2785_v17 = vadd.f32 %v2710_v27, %v9611_v37  ;;  %6825 = vtanh.f32 %v8482_v48  ;;  %v2787_v55 = vadd.f32 %v2781_v0, %v9613_v24 }
 0x5ea   :  { %v5032_v44 = vmul.f32 -1.442695, %v2784_v4  ;;  %v5034_v6 = vmul.f32 -1.442695, %v2786_v39 }
 0x5eb   :  { %v5033_v34 = vmul.f32 -1.442695, %v2785_v17 }
 0x5ec   :  { %6827 = vpow2.f32 %v5032_v44  ;;  %v2808_v44 = vrot.slane %v8182_v11, 6  ;;  %v9614_v11 = vld [vmem:[#allocation20_spill] sm:$0xff] }
 0x5ed   :  { %6829 = vpow2.f32 %v5033_v34 }
 0x5ee   :  { %6831 = vtanh.f32 %v2787_v55 }
 0x5ef   :  { %6833 = vpow2.f32 %v5034_v6 }
 0x5f3   :  { %v6826_v18 = vpop.eup %6825 }
 0x5f4   :  { %v2576_v62 = vmul.f32 %v6826_v18, %v6824_v20 }
 0x5f6   :  { %v6828_v42 = vpop.eup %6827  ;;  %2577 = vst [vmem:[#allocation2 + $0x6] sm:$0x3] %v2576_v62  ;;  %3029 = vmatprep.mubr.f32.mxu0 %v2576_v62  ;;  %3100 = vmatprep.mubr.f32.mxu1 %v2576_v62 }
 0x5f7   :  { %v2797_v38 = vadd.f32 1.0, %v6828_v42  ;;  %v6830_v47 = vpop.eup %6829  ;;  %v9654_v42 = vld [vmem:[#allocation60_spill] sm:$0xff] }
 0x5f8   :  { %v2798_v4 = vadd.f32 1.0, %v6830_v47  ;;  %v6832_v27 = vpop.eup %6831  ;;  %v9655_v47 = vld [vmem:[#allocation61_spill] sm:$0xff] }
 0x5f9   :  { %6835 = vrcp.f32 %v2797_v38  ;;  %v6834_v17 = vpop.eup %6833  ;;  %v9653_v38 = vld [vmem:[#allocation59_spill] sm:$0xff] }
 0x5fa   :  { %6837 = vrcp.f32 %v2798_v4  ;;  %v2799_v39 = vadd.f32 1.0, %v6834_v17  ;;  %v9656_v4 = vld [vmem:[#allocation62_spill] sm:$0xff]  ;;  %v9658_v17 = vld [vmem:[#allocation64_spill] sm:$0xff] }
 0x5fc   :  { %6839 = vrcp.f32 %v2799_v39  ;;  %v9663_v39 = vld [vmem:[#allocation69_spill] sm:$0xff] }
 0x603   :  { %v6836_v3 = vpop.eup %6835 }
 0x604   :  { %v2811_v0 = vmul.f32 %v6836_v3, %v6832_v27  ;;  %v6838_v34 = vpop.eup %6837  ;;  %v9657_v27 = vld [vmem:[#allocation63_spill] sm:$0xff]  ;;  %v9659_v3 = vld [vmem:[#allocation65_spill] sm:$0xff] }
 0x605   :  { %v2810_v20 = vmul.f32 %v6838_v34, %v2808_v44  ;;  %v9660_v44 = vld [vmem:[#allocation66_spill] sm:$0xff]  ;;  %v9662_v34 = vld [vmem:[#allocation68_spill] sm:$0xff] }
 0x606   :  { %v6840_v55 = vpop.eup %6839 }
 0x607   :  { %v8490_v18 = vadd.f32 %v2811_v0, %v2810_v20  ;;  %v9661_v0 = vld [vmem:[#allocation67_spill] sm:$0xff]  ;;  %v9664_v20 = vld [vmem:[#allocation70_spill] sm:$0xff] }
 0x609   :  { %6841 = vtanh.f32 %v8490_v18 }
 0x613   :  { %v6842_v62 = vpop.eup %6841 }
 0x614   :  { %v2814_v6 = vmul.f32 %v6842_v62, %v6840_v55  ;;  %v9665_v55 = vld [vmem:[#allocation71_spill] sm:$0xff]  ;;  %v9666_v62 = vld [vmem:[#allocation76_spill] sm:$0xff] }
 0x616   :  { %3030 = vmatmul.mubr.f32.vlgmr.msra.gmra.mrb[18].mxu0 %v2814_v6  ;;  %3101 = vmatmul.mubr.f32.vlgmr.msra.gmra.mrb[26].mxu1 %v2814_v6 }
 0x617   :  { %6081 = vmatpush1.bf16.msra.mxu0 %v8185_v53  ;;  %6113 = vmatpush1.bf16.msra.mxu1 %v8187_v10  ;;  %v9615_v53 = vld [vmem:[#allocation21_spill] sm:$0xff]  ;;  %v9616_v10 = vld [vmem:[#allocation22_spill] sm:$0xff] }
 0x618   :  { %6083 = vmatprep.subr.bf16.mxu0 %v8191_v43  ;;  %6115 = vmatprep.subr.bf16.mxu1 %v8193_v14  ;;  %v9617_v43 = vld [vmem:[#allocation23_spill] sm:$0xff]  ;;  %v9618_v14 = vld [vmem:[#allocation24_spill] sm:$0xff] }
 0x619   :  { %3260 = vmatprep.mubr.f32.mxu0 %v9382_v40  ;;  %3331 = vmatprep.mubr.f32.mxu1 %v9382_v40 }
 0x61b   :  { %6085 = vmatpush1.bf16.msra.mxu0 %v8199_v63  ;;  %6117 = vmatpush1.bf16.msra.mxu1 %v8201_v54  ;;  %v9619_v63 = vld [vmem:[#allocation25_spill] sm:$0xff]  ;;  %v9620_v54 = vld [vmem:[#allocation26_spill] sm:$0xff] }
 0x61c   :  { %6087 = vmatprep.subr.bf16.mxu0 %v8205_v15  ;;  %6119 = vmatprep.subr.bf16.mxu1 %v8207_v13  ;;  %v9621_v15 = vld [vmem:[#allocation27_spill] sm:$0xff]  ;;  %v9622_v13 = vld [vmem:[#allocation28_spill] sm:$0xff] }
 0x61f   :  { %6089 = vmatpush1.bf16.msra.mxu0 %v8213_v30  ;;  %6121 = vmatpush1.bf16.msra.mxu1 %v8215_v56  ;;  %v9623_v30 = vld [vmem:[#allocation29_spill] sm:$0xff]  ;;  %v9624_v56 = vld [vmem:[#allocation30_spill] sm:$0xff] }
 0x620   :  { %6091 = vmatprep.subr.bf16.mxu0 %v8219_v50  ;;  %6123 = vmatprep.subr.bf16.mxu1 %v8221_v5  ;;  %v9625_v50 = vld [vmem:[#allocation31_spill] sm:$0xff]  ;;  %v9626_v5 = vld [vmem:[#allocation32_spill] sm:$0xff] }
 0x623   :  { %6093 = vmatpush1.bf16.msra.mxu0 %v8225_v8  ;;  %6125 = vmatpush1.bf16.msra.mxu1 %v8227_v57  ;;  %v9627_v8 = vld [vmem:[#allocation33_spill] sm:$0xff]  ;;  %v9628_v57 = vld [vmem:[#allocation34_spill] sm:$0xff] }
 0x624   :  { %6095 = vmatprep.subr.bf16.mxu0 %v8231_v46  ;;  %6127 = vmatprep.subr.bf16.mxu1 %v8233_v59  ;;  %v9629_v46 = vld [vmem:[#allocation35_spill] sm:$0xff]  ;;  %v9630_v59 = vld [vmem:[#allocation36_spill] sm:$0xff] }
 0x627   :  { %6097 = vmatpush1.bf16.msra.mxu0 %v8237_v22  ;;  %6129 = vmatpush1.bf16.msra.mxu1 %v8239_v35  ;;  %v9631_v22 = vld [vmem:[#allocation37_spill] sm:$0xff]  ;;  %v9632_v35 = vld [vmem:[#allocation38_spill] sm:$0xff] }
 0x628   :  { %6099 = vmatprep.subr.bf16.mxu0 %v8243_v49  ;;  %6131 = vmatprep.subr.bf16.mxu1 %v8245_v25  ;;  %v9633_v49 = vld [vmem:[#allocation39_spill] sm:$0xff]  ;;  %v9634_v25 = vld [vmem:[#allocation40_spill] sm:$0xff] }
 0x62b   :  { %6101 = vmatpush1.bf16.msra.mxu0 %v8249_v29  ;;  %6133 = vmatpush1.bf16.msra.mxu1 %v8251_v21  ;;  %v9635_v29 = vld [vmem:[#allocation41_spill] sm:$0xff]  ;;  %v9636_v21 = vld [vmem:[#allocation42_spill] sm:$0xff] }
 0x62c   :  { %6103 = vmatprep.subr.bf16.mxu0 %v8255_v41  ;;  %6135 = vmatprep.subr.bf16.mxu1 %v8257_v33  ;;  %v9637_v41 = vld [vmem:[#allocation43_spill] sm:$0xff]  ;;  %v9638_v33 = vld [vmem:[#allocation44_spill] sm:$0xff] }
 0x62f   :  { %6105 = vmatpush1.bf16.msra.mxu0 %v8261_v7  ;;  %6137 = vmatpush1.bf16.msra.mxu1 %v8263_v51  ;;  %v9639_v7 = vld [vmem:[#allocation45_spill] sm:$0xff]  ;;  %v9640_v51 = vld [vmem:[#allocation46_spill] sm:$0xff] }
 0x630   :  { %6107 = vmatprep.subr.bf16.mxu0 %v8267_v1  ;;  %6139 = vmatprep.subr.bf16.mxu1 %v8269_v12  ;;  %v9641_v1 = vld [vmem:[#allocation47_spill] sm:$0xff]  ;;  %v9642_v12 = vld [vmem:[#allocation48_spill] sm:$0xff] }
 0x633   :  { %6109 = vmatpush1.bf16.msra.mxu0 %v8273_v60  ;;  %6141 = vmatpush1.bf16.msra.mxu1 %v8275_v16  ;;  %v9643_v60 = vld [vmem:[#allocation49_spill] sm:$0xff]  ;;  %v9644_v16 = vld [vmem:[#allocation50_spill] sm:$0xff] }
 0x634   :  { %6143 = vmatprep.subr.bf16.mxu0 %v8283_v23  ;;  %6207 = vmatprep.subr.bf16.mxu1 %v8285_v36  ;;  %v9645_v23 = vld [vmem:[#allocation51_spill] sm:$0xff]  ;;  %v9646_v36 = vld [vmem:[#allocation52_spill] sm:$0xff] }
 0x636   :  { %3261 = vmatmul.mubr.f32.vlgmr.msra.gmra.mrb[20].mxu0 %v2814_v6  ;;  %3332 = vmatmul.mubr.f32.vlgmr.msra.gmra.mrb[28].mxu1 %v2814_v6  ;;  %v9667_v6 = vld [vmem:[#allocation79_spill] sm:$0xff] }
 0x637   :  { %6145 = vmatpush1.bf16.msra.mxu0 %v8287_v58  ;;  %6209 = vmatpush1.bf16.msra.mxu1 %v8290_v31  ;;  %v9647_v58 = vld [vmem:[#allocation53_spill] sm:$0xff]  ;;  %v9648_v31 = vld [vmem:[#allocation54_spill] sm:$0xff] }
 0x638   :  { %6147 = vmatprep.subr.bf16.mxu0 %v8295_v61  ;;  %6211 = vmatprep.subr.bf16.mxu1 %v8297_v2  ;;  %v9649_v61 = vld [vmem:[#allocation55_spill] sm:$0xff]  ;;  %v9650_v2 = vld [vmem:[#allocation56_spill] sm:$0xff] }
 0x63b   :  { %6149 = vmatpush1.bf16.msra.mxu0 %v8299_v45  ;;  %6213 = vmatpush1.bf16.msra.mxu1 %v8302_v32  ;;  %v9651_v45 = vld [vmem:[#allocation57_spill] sm:$0xff]  ;;  %v9652_v32 = vld [vmem:[#allocation58_spill] sm:$0xff] }
 0x63c   :  { %6151 = vmatprep.subr.bf16.mxu0 %v9614_v11  ;;  %6215 = vmatprep.subr.bf16.mxu1 %v9615_v53  ;;  %v3706_v11 = vld [vmem:[#allocation3 + $0x8] sm:$0xff] }
 0x63d   :  { %v3710_v53 = vld [vmem:[#allocation3 + $0x28] sm:$0xff] }
 0x63f   :  { %6153 = vmatpush1.bf16.msra.mxu0 %v9616_v10  ;;  %6217 = vmatpush1.bf16.msra.mxu1 %v9617_v43  ;;  %v3708_v10 = vld [vmem:[#allocation3 + $0x18] sm:$0xff]  ;;  %v8589_v43 = vpack.c.bf16 %v3710_v53, %v3706_v11 }
 0x640   :  { %6155 = vmatprep.subr.bf16.mxu0 %v9618_v14  ;;  %6219 = vmatprep.subr.bf16.mxu1 %v9619_v63  ;;  %v9668_v63 = vld [vmem:[#allocation72_spill] sm:$0xff] }
 0x643   :  { %6157 = vmatpush1.bf16.msra.mxu0 %v9620_v54  ;;  %6221 = vmatpush1.bf16.msra.mxu1 %v9621_v15  ;;  %v9669_v15 = vld [vmem:[#allocation73_spill] sm:$0xff] }
 0x644   :  { %6159 = vmatprep.subr.bf16.mxu0 %v9622_v13  ;;  %6223 = vmatprep.subr.bf16.mxu1 %v9623_v30 }
 0x647   :  { %6161 = vmatpush1.bf16.msra.mxu0 %v9624_v56  ;;  %6225 = vmatpush1.bf16.msra.mxu1 %v9625_v50 }
 0x648   :  { %6163 = vmatprep.subr.bf16.mxu0 %v9626_v5  ;;  %6227 = vmatprep.subr.bf16.mxu1 %v9627_v8 }
 0x64b   :  { %6165 = vmatpush1.bf16.msra.mxu0 %v9628_v57  ;;  %6229 = vmatpush1.bf16.msra.mxu1 %v9629_v46 }
 0x64c   :  { %6167 = vmatprep.subr.bf16.mxu0 %v9630_v59  ;;  %6231 = vmatprep.subr.bf16.mxu1 %v9631_v22 }
 0x64f   :  { %6169 = vmatpush1.bf16.msra.mxu0 %v9632_v35  ;;  %6233 = vmatpush1.bf16.msra.mxu1 %v9633_v49 }
 0x650   :  { %6171 = vmatprep.subr.bf16.mxu0 %v9634_v25  ;;  %6235 = vmatprep.subr.bf16.mxu1 %v9635_v29 }
 0x653   :  { %6173 = vmatpush1.bf16.msra.mxu0 %v9636_v21  ;;  %6237 = vmatpush1.bf16.msra.mxu1 %v9637_v41 }
 0x654   :  { %6175 = vmatprep.subr.bf16.mxu0 %v9638_v33  ;;  %6239 = vmatprep.subr.bf16.mxu1 %v9639_v7 }
 0x657   :  { %6177 = vmatpush1.bf16.msra.mxu0 %v9640_v51  ;;  %6241 = vmatpush1.bf16.msra.mxu1 %v9641_v1 }
 0x658   :  { %6179 = vmatprep.subr.bf16.mxu0 %v9642_v12  ;;  %6243 = vmatprep.subr.bf16.mxu1 %v9643_v60 }
 0x65b   :  { %6181 = vmatpush1.bf16.msra.mxu0 %v9644_v16  ;;  %6245 = vmatpush1.bf16.msra.mxu1 %v9645_v23 }
 0x65c   :  { %6183 = vmatprep.subr.bf16.mxu0 %v9646_v36  ;;  %6247 = vmatprep.subr.bf16.mxu1 %v9647_v58 }
 0x65f   :  { %6185 = vmatpush1.bf16.msra.mxu0 %v9648_v31  ;;  %6249 = vmatpush1.bf16.msra.mxu1 %v9649_v61 }
 0x660   :  { %6187 = vmatprep.subr.bf16.mxu0 %v9650_v2  ;;  %6251 = vmatprep.subr.bf16.mxu1 %v9651_v45 }
 0x663   :  { %6189 = vmatpush1.bf16.msra.mxu0 %v9652_v32  ;;  %6253 = vmatpush1.bf16.msra.mxu1 %v9653_v38 }
 0x664   :  { %6191 = vmatprep.subr.bf16.mxu0 %v9654_v42  ;;  %6255 = vmatprep.subr.bf16.mxu1 %v9655_v47  ;;  %v9670_v42 = vld [vmem:[#allocation74_spill] sm:$0xff] }
 0x667   :  { %6193 = vmatpush1.bf16.msra.mxu0 %v9656_v4  ;;  %6257 = vmatpush1.bf16.msra.mxu1 %v9657_v27 }
 0x668   :  { %6195 = vmatprep.subr.bf16.mxu0 %v9658_v17  ;;  %6259 = vmatprep.subr.bf16.mxu1 %v9659_v3 }
 0x66b   :  { %6197 = vmatpush1.bf16.msra.mxu0 %v9660_v44  ;;  %6261 = vmatpush1.bf16.msra.mxu1 %v9661_v0 }
 0x66c   :  { %6199 = vmatprep.subr.bf16.mxu0 %v8450_v26  ;;  %6263 = vmatprep.subr.bf16.mxu1 %v8453_v28  ;;  %v3712_v26 = vld [vmem:[#allocation3 + $0x38] sm:$0xff]  ;;  %v2943_v28 = vld [vmem:[#allocation9] sm:$0xf] }
 0x66d   :  { %v8591_v14 = vpack.c.bf16 %v3712_v26, %v3708_v10  ;;  %v2948_v54 = vrot.slane %v2943_v28, %v9668_v63  ;;  %v2952_v13 = vrot.slane %v2943_v28, %v9669_v15  ;;  %v2956_v22 = vrot.slane %v2943_v28, %v9437_v9 }
 0x66e   :  { %v2960_v35 = vrot.slane %v2943_v28, %v7611_v19 }
 0x66f   :  { %6201 = vmatpush1.bf16.msra.mxu0 %v9662_v34  ;;  %6265 = vmatpush1.bf16.msra.mxu1 %v9663_v39 }
 0x670   :  { %6203 = vmatprep.subr.bf16.mxu0 %v9664_v20  ;;  %6267 = vmatprep.subr.bf16.mxu1 %v9665_v55 }
 0x673   :  { %6205 = vmatpush1.bf16.msra.mxu0 %v9666_v62  ;;  %6269 = vmatpush1.bf16.msra.mxu1 %v9667_v6 }
 0x674   :  { %6271 = vmatprep.subr.bf16.mxu0 %v8589_v43  ;;  %6303 = vmatprep.subr.bf16.mxu1 %v8591_v14 }
 0x6e9   :  { %v3031_v30 = vpop.f32.mrb[18].mxu0  ;;  %v3102_v56 = vpop.f32.mrb[26].mxu1 }
 0x6ea   :  { %v3032_v50 = vadd.f32 %v3031_v30, %v2948_v54  ;;  %v3033_v5 = vpop.f32.mrb[19].mxu0  ;;  %v3104_v8 = vpop.f32.mrb[27].mxu1  ;;  %v3103_v49 = vadd.f32 %v3102_v56, %v2956_v22  ;;  %v3374_v30 = vrot.slane %v8490_v18, 6 }
 0x6eb   :  { %v3034_v57 = vadd.f32 %v3033_v5, %v2952_v13  ;;  %v3105_v25 = vadd.f32 %v3104_v8, %v2960_v35  ;;  %v3707_v35 = vld [vmem:[#allocation3 + $0x10] sm:$0xff] }
 0x6ec   :  { %v5035_v46 = vmul.f32 -1.442695, %v3032_v50  ;;  %v5037_v29 = vmul.f32 -1.442695, %v3103_v49  ;;  %v3711_v49 = vld [vmem:[#allocation3 + $0x30] sm:$0xff] }
 0x6ed   :  { %v5036_v59 = vmul.f32 -1.442695, %v3034_v57 }
 0x6ee   :  { %6843 = vpow2.f32 %v5035_v46  ;;  %v3705_v46 = vld [vmem:[#allocation3] sm:$0xff] }
 0x6ef   :  { %6845 = vpow2.f32 %v5036_v59  ;;  %v3709_v59 = vld [vmem:[#allocation3 + $0x20] sm:$0xff] }
 0x6f0   :  { %6847 = vtanh.f32 %v3105_v25  ;;  %v3714_v25 = vld [vmem:[#allocation3 + $0x48] sm:$0xff] }
 0x6f1   :  { %6849 = vpow2.f32 %v5037_v29 }
 0x6f8   :  { %v6844_v21 = vpop.eup %6843 }
 0x6f9   :  { %v3116_v41 = vadd.f32 1.0, %v6844_v21  ;;  %v6846_v33 = vpop.eup %6845  ;;  %v3718_v21 = vld [vmem:[#allocation3 + $0x68] sm:$0xff] }
 0x6fa   :  { %v3117_v7 = vadd.f32 1.0, %v6846_v33  ;;  %v6848_v51 = vpop.eup %6847  ;;  %v3720_v33 = vld [vmem:[#allocation3 + $0x78] sm:$0xff] }
 0x6fb   :  { %6851 = vrcp.f32 %v3116_v41  ;;  %v6850_v1 = vpop.eup %6849  ;;  %v3716_v41 = vld [vmem:[#allocation3 + $0x58] sm:$0xff] }
 0x6fc   :  { %6853 = vrcp.f32 %v3117_v7  ;;  %v3118_v23 = vadd.f32 1.0, %v6850_v1  ;;  %v8611_v7 = vpack.c.bf16 %v3709_v59, %v3705_v46  ;;  %v3713_v1 = vld [vmem:[#allocation3 + $0x40] sm:$0xff] }
 0x6fd   :  { %v3741_v46 = vld [vmem:[#allocation3 + $0x120] sm:$0xff] }
 0x6fe   :  { %6855 = vrcp.f32 %v3118_v23  ;;  %v8619_v23 = vpack.c.bf16 %v3720_v33, %v3716_v41  ;;  %v3752_v41 = vld [vmem:[#allocation3 + $0x178] sm:$0xff] }
 0x705   :  { %v6852_v12 = vpop.eup %6851 }
 0x706   :  { %v3127_v60 = vmul.f32 %v6852_v12, %v6848_v51  ;;  %v6854_v16 = vpop.eup %6853  ;;  %v8613_v51 = vpack.c.bf16 %v3711_v49, %v3707_v35  ;;  %v3717_v12 = vld [vmem:[#allocation3 + $0x60] sm:$0xff]  ;;  %v3739_v35 = vld [vmem:[#allocation3 + $0x110] sm:$0xff] }
 0x707   :  { %v3126_v36 = vmul.f32 %v6854_v16, %v8482_v48  ;;  %v8617_v16 = vpack.c.bf16 %v3718_v21, %v3714_v25  ;;  %v3743_v49 = vld [vmem:[#allocation3 + $0x130] sm:$0xff]  ;;  %v3746_v25 = vld [vmem:[#allocation3 + $0x148] sm:$0xff]  ;;  %v3748_v21 = vld [vmem:[#allocation3 + $0x158] sm:$0xff] }
 0x708   :  { %v6856_v0 = vpop.eup %6855 }
 0x709   :  { %v3262_v58 = vpop.f32.mrb[20].mxu0  ;;  %v3333_v31 = vpop.f32.mrb[28].mxu1  ;;  %v8600_v61 = vadd.f32 %v3127_v60, %v3126_v36  ;;  %v3715_v36 = vld [vmem:[#allocation3 + $0x50] sm:$0xff] }
 0x70a   :  { %v3342_v2 = vrot.slane %v3262_v58, 6  ;;  %v3264_v45 = vpop.f32.mrb[21].mxu0  ;;  %v3335_v32 = vpop.f32.mrb[29].mxu1  ;;  %v3344_v3 = vrot.slane %v3333_v31, 6  ;;  %v3719_v58 = vld [vmem:[#allocation3 + $0x70] sm:$0xff]  ;;  %v3722_v31 = vld [vmem:[#allocation3 + $0x88] sm:$0xff] }
 0x70b   :  { %v3343_v38 = vrot.slane %v3264_v45, 6  ;;  %6857 = vtanh.f32 %v8600_v61  ;;  %v3345_v48 = vrot.slane %v3335_v32, 6  ;;  %v3724_v45 = vld [vmem:[#allocation3 + $0x98] sm:$0xff] }
 0x70c   :  { %v3350_v47 = vadd.f32 %v3342_v2, %v9670_v42  ;;  %v3352_v44 = vadd.f32 %v3344_v3, %v9612_v52  ;;  %v3726_v2 = vld [vmem:[#allocation3 + $0xa8] sm:$0xff]  ;;  %v3728_v32 = vld [vmem:[#allocation3 + $0xb8] sm:$0xff] }
 0x70d   :  { %v3351_v4 = vadd.f32 %v3343_v38, %v9611_v37  ;;  %v3353_v39 = vadd.f32 %v3345_v48, %v9613_v24  ;;  %v8625_v38 = vpack.c.bf16 %v3717_v12, %v3713_v1  ;;  %v8633_v3 = vpack.c.bf16 %v3728_v32, %v3724_v45  ;;  %v3723_v48 = vld [vmem:[#allocation3 + $0x90] sm:$0xff]  ;;  %v3745_v1 = vld [vmem:[#allocation3 + $0x140] sm:$0xff]  ;;  %v3754_v45 = vld [vmem:[#allocation3 + $0x188] sm:$0xff] }
 0x70e   :  { %v5038_v27 = vmul.f32 -1.442695, %v3350_v47  ;;  %v5040_v55 = vmul.f32 -1.442695, %v3352_v44  ;;  %v8627_v47 = vpack.c.bf16 %v3719_v58, %v3715_v36  ;;  %v3727_v44 = vld [vmem:[#allocation3 + $0xb0] sm:$0xff]  ;;  %v3749_v12 = vld [vmem:[#allocation3 + $0x160] sm:$0xff]  ;;  %v8671_v58 = vpack.c.bf16 %v3752_v41, %v3748_v21 }
 0x70f   :  { %v5039_v17 = vmul.f32 -1.442695, %v3351_v4  ;;  %v3721_v4 = vld [vmem:[#allocation3 + $0x80] sm:$0xff]  ;;  %v3758_v32 = vld [vmem:[#allocation3 + $0x1a8] sm:$0xff] }
 0x710   :  { %6859 = vpow2.f32 %v5038_v27  ;;  %v3725_v27 = vld [vmem:[#allocation3 + $0xa0] sm:$0xff] }
 0x711   :  { %6861 = vpow2.f32 %v5039_v17  ;;  %v8631_v17 = vpack.c.bf16 %v3726_v2, %v3722_v31  ;;  %v3747_v31 = vld [vmem:[#allocation3 + $0x150] sm:$0xff] }
 0x712   :  { %6863 = vtanh.f32 %v3353_v39  ;;  %v3732_v39 = vld [vmem:[#allocation3 + $0xd8] sm:$0xff]  ;;  %v3751_v2 = vld [vmem:[#allocation3 + $0x170] sm:$0xff] }
 0x713   :  { %6865 = vpow2.f32 %v5040_v55  ;;  %v8639_v55 = vpack.c.bf16 %v3725_v27, %v3721_v4  ;;  %v3756_v4 = vld [vmem:[#allocation3 + $0x198] sm:$0xff] }
 0x714   :  { %v3760_v27 = vld [vmem:[#allocation3 + $0x1b8] sm:$0xff] }
 0x715   :  { %v6858_v34 = vpop.eup %6857 }
 0x716   :  { %v3130_v20 = vmul.f32 %v6858_v34, %v6856_v0  ;;  %v3730_v0 = vld [vmem:[#allocation3 + $0xc8] sm:$0xff] }
 0x717   :  { %v3734_v34 = vld [vmem:[#allocation3 + $0xe8] sm:$0xff] }
 0x718   :  { %3131 = vst [vmem:[#allocation2 + $0x8] sm:$0x3] %v3130_v20  ;;  %v3382_v62 = vrot.slane %v3130_v20, 6  ;;  %v3736_v20 = vld [vmem:[#allocation3 + $0xf8] sm:$0xff] }
 0x71a   :  { %v6860_v6 = vpop.eup %6859  ;;  %v3535_v53 = vrot.slane %v3382_v62, 2  ;;  %v8641_v62 = vpack.c.bf16 %v3727_v44, %v3723_v48  ;;  %v8675_v48 = vpack.c.bf16 %v3749_v12, %v3745_v1  ;;  %v8677_v44 = vpack.c.bf16 %v3751_v2, %v3747_v31  ;;  %v3957_v1 = vld [vmem:[#allocation8 + $0x8] sm:$0xff]  ;;  %v3959_v31 = vld [vmem:[#allocation8 + $0x18] sm:$0xff] }
 0x71b   :  { %v3363_v11 = vadd.f32 1.0, %v6860_v6  ;;  %v6862_v10 = vpop.eup %6861  ;;  %v3729_v6 = vld [vmem:[#allocation3 + $0xc0] sm:$0xff]  ;;  %v3961_v12 = vld [vmem:[#allocation8 + $0x28] sm:$0xff] }
 0x71c   :  { %v3364_v26 = vadd.f32 1.0, %v6862_v10  ;;  %3602 = vmatprep.mubr.f32.mxu0 %v3535_v53  ;;  %3673 = vmatprep.mubr.f32.mxu1 %v3535_v53  ;;  %v6864_v28 = vpop.eup %6863  ;;  %v8645_v53 = vpack.c.bf16 %v3734_v34, %v3730_v0  ;;  %v8647_v10 = vpack.c.bf16 %v3736_v20, %v3732_v39  ;;  %v3753_v0 = vld [vmem:[#allocation3 + $0x180] sm:$0xff]  ;;  %v8681_v39 = vpack.c.bf16 %v3758_v32, %v3754_v45 }
 0x71d   :  { %6867 = vrcp.f32 %v3363_v11  ;;  %v6866_v54 = vpop.eup %6865  ;;  %v3733_v11 = vld [vmem:[#allocation3 + $0xe0] sm:$0xff]  ;;  %v8683_v20 = vpack.c.bf16 %v3760_v27, %v3756_v4  ;;  %v8709_v2 = vpack.c.bf16 %v3961_v12, %v3957_v1  ;;  %v3966_v1 = vld [vmem:[#allocation8 + $0x50] sm:$0xff] }
 0x71e   :  { %6869 = vrcp.f32 %v3364_v26  ;;  %v3365_v5 = vadd.f32 1.0, %v6866_v54  ;;  %v3731_v26 = vld [vmem:[#allocation3 + $0xd0] sm:$0xff]  ;;  %v3738_v54 = vld [vmem:[#allocation3 + $0x108] sm:$0xff]  ;;  %v3757_v34 = vld [vmem:[#allocation3 + $0x1a0] sm:$0xff] }
 0x71f   :  { %v3963_v45 = vld [vmem:[#allocation8 + $0x38] sm:$0xff]  ;;  %v3956_v32 = vld [vmem:[#allocation8] sm:$0xff]  ;;  %v3970_v12 = vld [vmem:[#allocation8 + $0x70] sm:$0xff] }
 0x720   :  { %6871 = vrcp.f32 %v3365_v5  ;;  %v3960_v4 = vld [vmem:[#allocation8 + $0x20] sm:$0xff]  ;;  %v8711_v27 = vpack.c.bf16 %v3963_v45, %v3959_v31  ;;  %v8728_v31 = vpack.c.bf16 %v3970_v12, %v3966_v1  ;;  %v3973_v45 = vld [vmem:[#allocation8 + $0x88] sm:$0xff] }
 0x721   :  { %v3981_v12 = vld [vmem:[#allocation8 + $0xc8] sm:$0xff] }
 0x722   :  { %9674 = vst [vmem:[#allocation83_spill] sm:$0xff] %v8728_v31 }
 0x727   :  { %v6868_v13 = vpop.eup %6867 }
 0x728   :  { %v3377_v56 = vmul.f32 %v6868_v13, %v6864_v28  ;;  %v6870_v50 = vpop.eup %6869  ;;  %v3735_v28 = vld [vmem:[#allocation3 + $0xf0] sm:$0xff]  ;;  %v3742_v13 = vld [vmem:[#allocation3 + $0x128] sm:$0xff] }
 0x729   :  { %v3376_v8 = vmul.f32 %v6870_v50, %v3374_v30  ;;  %v3740_v30 = vld [vmem:[#allocation3 + $0x118] sm:$0xff]  ;;  %v8651_v50 = vpack.c.bf16 %v3733_v11, %v3729_v6  ;;  %v8653_v5 = vpack.c.bf16 %v3735_v28, %v3731_v26  ;;  %v8657_v59 = vpack.c.bf16 %v3742_v13, %v3738_v54  ;;  %v3755_v6 = vld [vmem:[#allocation3 + $0x190] sm:$0xff]  ;;  %v3762_v26 = vld [vmem:[#allocation3 + $0x1c8] sm:$0xff] }
 0x72a   :  { %v6872_v22 = vpop.eup %6871  ;;  %v3759_v11 = vld [vmem:[#allocation3 + $0x1b0] sm:$0xff]  ;;  %v3766_v28 = vld [vmem:[#allocation3 + $0x1e8] sm:$0xff]  ;;  %v3764_v54 = vld [vmem:[#allocation3 + $0x1d8] sm:$0xff] }
 0x72b   :  { %v8608_v57 = vadd.f32 %v3377_v56, %v3376_v8  ;;  %v3744_v56 = vld [vmem:[#allocation3 + $0x138] sm:$0xff]  ;;  %v3737_v8 = vld [vmem:[#allocation3 + $0x100] sm:$0xff] }
 0x72c   :  { %v8663_v33 = vpack.c.bf16 %v3741_v46, %v3737_v8  ;;  %v3768_v13 = vld [vmem:[#allocation3 + $0x1f8] sm:$0xff]  ;;  %v3761_v8 = vld [vmem:[#allocation3 + $0x1c0] sm:$0xff]  ;;  %v8693_v46 = vpack.c.bf16 %v3766_v28, %v3762_v26  ;;  %v3969_v26 = vld [vmem:[#allocation8 + $0x68] sm:$0xff] }
 0x72d   :  { %6873 = vtanh.f32 %v8608_v57  ;;  %v3967_v28 = vld [vmem:[#allocation8 + $0x58] sm:$0xff] }
 0x737   :  { %v6874_v29 = vpop.eup %6873 }
 0x738   :  { %v3380_v18 = vmul.f32 %v6874_v29, %v6872_v22  ;;  %v8659_v22 = vpack.c.bf16 %v3744_v56, %v3740_v30  ;;  %v3750_v29 = vld [vmem:[#allocation3 + $0x168] sm:$0xff]  ;;  %v8687_v30 = vpack.c.bf16 %v3757_v34, %v3753_v0  ;;  %v8689_v56 = vpack.c.bf16 %v3759_v11, %v3755_v6  ;;  %v3958_v34 = vld [vmem:[#allocation8 + $0x10] sm:$0xff] }
 0x739   :  { %v8669_v36 = vpack.c.bf16 %v3750_v29, %v3746_v25  ;;  %v3763_v25 = vld [vmem:[#allocation3 + $0x1d0] sm:$0xff]  ;;  %v8713_v0 = vpack.c.bf16 %v3960_v4, %v3956_v32  ;;  %v3975_v4 = vld [vmem:[#allocation8 + $0x98] sm:$0xff] }
 0x73a   :  { %v8615_v60 = vrot.slane %v3380_v18, 2  ;;  %v8665_v18 = vpack.c.bf16 %v3743_v49, %v3739_v35  ;;  %v8695_v35 = vpack.c.bf16 %v3768_v13, %v3764_v54  ;;  %v3765_v49 = vld [vmem:[#allocation3 + $0x1e0] sm:$0xff]  ;;  %v3767_v29 = vld [vmem:[#allocation3 + $0x1f0] sm:$0xff] }
 0x73b   :  { %v8699_v21 = vpack.c.bf16 %v3765_v49, %v3761_v8  ;;  %v8701_v41 = vpack.c.bf16 %v3767_v29, %v3763_v25  ;;  %v3962_v6 = vld [vmem:[#allocation8 + $0x30] sm:$0xff]  ;;  %v3971_v13 = vld [vmem:[#allocation8 + $0x78] sm:$0xff]  ;;  %v3964_v8 = vld [vmem:[#allocation8 + $0x40] sm:$0xff] }
 0x73c   :  { %3603 = vmatmul.mubr.f32.vlgmr.msra.gmra.mrb[22].mxu0 %v8615_v60  ;;  %3674 = vmatmul.mubr.f32.vlgmr.msra.gmra.mrb[30].mxu1 %v8615_v60  ;;  %v8716_v11 = vpack.c.bf16 %v3962_v6, %v3958_v34  ;;  %v3968_v49 = vld [vmem:[#allocation8 + $0x60] sm:$0xff]  ;;  %v8723_v25 = vpack.c.bf16 %v3971_v13, %v3967_v28  ;;  %v3977_v32 = vld [vmem:[#allocation8 + $0xa8] sm:$0xff]  ;;  %v3979_v6 = vld [vmem:[#allocation8 + $0xb8] sm:$0xff] }
 0x73d   :  { %6273 = vmatpush1.bf16.msra.mxu0 %v8611_v7  ;;  %6305 = vmatpush1.bf16.msra.mxu1 %v8613_v51  ;;  %v8725_v29 = vpack.c.bf16 %v3968_v49, %v3964_v8  ;;  %v8733_v34 = vpack.c.bf16 %v3977_v32, %v3973_v45  ;;  %v8735_v28 = vpack.c.bf16 %v3979_v6, %v3975_v4  ;;  %v3974_v8 = vld [vmem:[#allocation8 + $0x90] sm:$0xff]  ;;  %v3985_v45 = vld [vmem:[#allocation8 + $0xe8] sm:$0xff]  ;;  %v3983_v32 = vld [vmem:[#allocation8 + $0xd8] sm:$0xff] }
 0x73e   :  { %6275 = vmatprep.subr.bf16.mxu0 %v8617_v16  ;;  %6307 = vmatprep.subr.bf16.mxu1 %v8619_v23  ;;  %9672 = vst [vmem:[#allocation81_spill] sm:$0xff] %v8723_v25  ;;  %v3978_v49 = vld [vmem:[#allocation8 + $0xb0] sm:$0xff]  ;;  %v3987_v4 = vld [vmem:[#allocation8 + $0xf8] sm:$0xff]  ;;  %v3980_v6 = vld [vmem:[#allocation8 + $0xc0] sm:$0xff] }
 0x73f   :  { %3833 = vmatprep.mubr.f32.mxu0 %v9382_v40  ;;  %3904 = vmatprep.mubr.f32.mxu1 %v9382_v40  ;;  %9673 = vst [vmem:[#allocation82_spill] sm:$0xff] %v8725_v29  ;;  %9675 = vst [vmem:[#allocation75_spill] sm:$0xff] %v8733_v34  ;;  %v8740_v1 = vpack.c.bf16 %v3978_v49, %v3974_v8  ;;  %v3982_v8 = vld [vmem:[#allocation8 + $0xd0] sm:$0xff] }
 0x740   :  { %9676 = vst [vmem:[#allocation77_spill] sm:$0xff] %v8735_v28  ;;  %v3986_v49 = vld [vmem:[#allocation8 + $0xf0] sm:$0xff] }
 0x741   :  { %6277 = vmatpush1.bf16.msra.mxu0 %v8625_v38  ;;  %6309 = vmatpush1.bf16.msra.mxu1 %v8627_v47  ;;  %9678 = vst [vmem:[#allocation20_spill] sm:$0xff] %v8740_v1 }
 0x742   :  { %6279 = vmatprep.subr.bf16.mxu0 %v8631_v17  ;;  %6311 = vmatprep.subr.bf16.mxu1 %v8633_v3 }
 0x745   :  { %6281 = vmatpush1.bf16.msra.mxu0 %v8639_v55  ;;  %6313 = vmatpush1.bf16.msra.mxu1 %v8641_v62 }
 0x746   :  { %6283 = vmatprep.subr.bf16.mxu0 %v8645_v53  ;;  %6315 = vmatprep.subr.bf16.mxu1 %v8647_v10 }
 0x749   :  { %6285 = vmatpush1.bf16.msra.mxu0 %v8651_v50  ;;  %6317 = vmatpush1.bf16.msra.mxu1 %v8653_v5 }
 0x74a   :  { %6287 = vmatprep.subr.bf16.mxu0 %v8657_v59  ;;  %6319 = vmatprep.subr.bf16.mxu1 %v8659_v22 }
 0x74d   :  { %6289 = vmatpush1.bf16.msra.mxu0 %v8663_v33  ;;  %6321 = vmatpush1.bf16.msra.mxu1 %v8665_v18 }
 0x74e   :  { %6291 = vmatprep.subr.bf16.mxu0 %v8669_v36  ;;  %6323 = vmatprep.subr.bf16.mxu1 %v8671_v58 }
 0x751   :  { %6293 = vmatpush1.bf16.msra.mxu0 %v8675_v48  ;;  %6325 = vmatpush1.bf16.msra.mxu1 %v8677_v44 }
 0x752   :  { %6295 = vmatprep.subr.bf16.mxu0 %v8681_v39  ;;  %6327 = vmatprep.subr.bf16.mxu1 %v8683_v20 }
 0x755   :  { %6297 = vmatpush1.bf16.msra.mxu0 %v8687_v30  ;;  %6329 = vmatpush1.bf16.msra.mxu1 %v8689_v56 }
 0x756   :  { %6299 = vmatprep.subr.bf16.mxu0 %v8693_v46  ;;  %6331 = vmatprep.subr.bf16.mxu1 %v8695_v35 }
 0x759   :  { %6301 = vmatpush1.bf16.msra.mxu0 %v8699_v21  ;;  %6333 = vmatpush1.bf16.msra.mxu1 %v8701_v41 }
 0x75a   :  { %6335 = vmatprep.subr.bf16.mxu0 %v8709_v2  ;;  %6399 = vmatprep.subr.bf16.mxu1 %v8711_v27 }
 0x75c   :  { %3834 = vmatmul.mubr.f32.vlgmr.msra.gmra.mrb[24].mxu0 %v8615_v60  ;;  %3905 = vmatmul.mubr.f32.vlgmr.msra.gmra.mrb[32].mxu1 %v8615_v60  ;;  %v3965_v60 = vld [vmem:[#allocation8 + $0x48] sm:$0xff] }
 0x75d   :  { %6337 = vmatpush1.bf16.msra.mxu0 %v8713_v0  ;;  %6401 = vmatpush1.bf16.msra.mxu1 %v8716_v11  ;;  %v8721_v54 = vpack.c.bf16 %v3969_v26, %v3965_v60  ;;  %v3972_v60 = vld [vmem:[#allocation8 + $0x80] sm:$0xff] }
 0x75e   :  { %6403 = vmatprep.subr.bf16.mxu1 %v8723_v25  ;;  %v3976_v26 = vld [vmem:[#allocation8 + $0xa0] sm:$0xff]  ;;  %v4071_v25 = vld [vmem:[#allocation8 + $0x398] sm:$0xff] }
 0x75f   :  { %9671 = vst [vmem:[#allocation80_spill] sm:$0xff] %v8721_v54  ;;  %6339 = vmatprep.subr.bf16.mxu0 %v8721_v54  ;;  %v8737_v13 = vpack.c.bf16 %v3976_v26, %v3972_v60  ;;  %v3984_v60 = vld [vmem:[#allocation8 + $0xe0] sm:$0xff]  ;;  %v8747_v26 = vpack.c.bf16 %v3987_v4, %v3983_v32  ;;  %v3995_v32 = vld [vmem:[#allocation8 + $0x138] sm:$0xff] }
 0x760   :  { %v3988_v4 = vld [vmem:[#allocation8 + $0x100] sm:$0xff]  ;;  %v4075_v54 = vld [vmem:[#allocation8 + $0x3b8] sm:$0xff] }
 0x761   :  { %6341 = vmatpush1.bf16.msra.mxu0 %v8725_v29  ;;  %6405 = vmatpush1.bf16.msra.mxu1 %v8728_v31  ;;  %9677 = vst [vmem:[#allocation78_spill] sm:$0xff] %v8737_v13  ;;  %v8745_v31 = vpack.c.bf16 %v3985_v45, %v3981_v12  ;;  %9680 = vst [vmem:[#allocation22_spill] sm:$0xff] %v8747_v26  ;;  %v8749_v29 = vpack.c.bf16 %v3984_v60, %v3980_v6  ;;  %v3989_v12 = vld [vmem:[#allocation8 + $0x108] sm:$0xff]  ;;  %v3992_v6 = vld [vmem:[#allocation8 + $0x120] sm:$0xff] }
 0x762   :  { %6343 = vmatprep.subr.bf16.mxu0 %v8733_v34  ;;  %6407 = vmatprep.subr.bf16.mxu1 %v8735_v28  ;;  %v8752_v28 = vpack.c.bf16 %v3986_v49, %v3982_v8  ;;  %v3993_v45 = vld [vmem:[#allocation8 + $0x128] sm:$0xff]  ;;  %v8761_v34 = vpack.c.bf16 %v3992_v6, %v3988_v4  ;;  %v3990_v8 = vld [vmem:[#allocation8 + $0x110] sm:$0xff]  ;;  %v4000_v4 = vld [vmem:[#allocation8 + $0x160] sm:$0xff] }
 0x763   :  { %9679 = vst [vmem:[#allocation21_spill] sm:$0xff] %v8745_v31  ;;  %9681 = vst [vmem:[#allocation23_spill] sm:$0xff] %v8749_v29  ;;  %v3994_v49 = vld [vmem:[#allocation8 + $0x130] sm:$0xff] }
 0x764   :  { %9682 = vst [vmem:[#allocation24_spill] sm:$0xff] %v8752_v28  ;;  %9685 = vst [vmem:[#allocation27_spill] sm:$0xff] %v8761_v34 }
 0x765   :  { %6345 = vmatpush1.bf16.msra.mxu0 %v8737_v13  ;;  %6409 = vmatpush1.bf16.msra.mxu1 %v8740_v1  ;;  %v3991_v1 = vld [vmem:[#allocation8 + $0x118] sm:$0xff]  ;;  %v8757_v13 = vpack.c.bf16 %v3993_v45, %v3989_v12  ;;  %v4001_v12 = vld [vmem:[#allocation8 + $0x168] sm:$0xff] }
 0x766   :  { %6347 = vmatprep.subr.bf16.mxu0 %v8745_v31  ;;  %6411 = vmatprep.subr.bf16.mxu1 %v8747_v26  ;;  %v8759_v60 = vpack.c.bf16 %v3995_v32, %v3991_v1  ;;  %v8764_v26 = vpack.c.bf16 %v3994_v49, %v3990_v8  ;;  %v3999_v45 = vld [vmem:[#allocation8 + $0x158] sm:$0xff]  ;;  %v3996_v32 = vld [vmem:[#allocation8 + $0x140] sm:$0xff]  ;;  %v3998_v8 = vld [vmem:[#allocation8 + $0x150] sm:$0xff] }
 0x767   :  { %9683 = vst [vmem:[#allocation25_spill] sm:$0xff] %v8757_v13  ;;  %v4003_v1 = vld [vmem:[#allocation8 + $0x178] sm:$0xff]  ;;  %v8773_v31 = vpack.c.bf16 %v4000_v4, %v3996_v32  ;;  %v4002_v49 = vld [vmem:[#allocation8 + $0x170] sm:$0xff]  ;;  %v4008_v32 = vld [vmem:[#allocation8 + $0x1a0] sm:$0xff] }
 0x768   :  { %9684 = vst [vmem:[#allocation26_spill] sm:$0xff] %v8759_v60  ;;  %9686 = vst [vmem:[#allocation28_spill] sm:$0xff] %v8764_v26  ;;  %v8771_v6 = vpack.c.bf16 %v4003_v1, %v3999_v45  ;;  %v4011_v45 = vld [vmem:[#allocation8 + $0x1b8] sm:$0xff]  ;;  %v4004_v1 = vld [vmem:[#allocation8 + $0x180] sm:$0xff] }
 0x769   :  { %6349 = vmatpush1.bf16.msra.mxu0 %v8749_v29  ;;  %6413 = vmatpush1.bf16.msra.mxu1 %v8752_v28  ;;  %v3997_v28 = vld [vmem:[#allocation8 + $0x148] sm:$0xff]  ;;  %9689 = vst [vmem:[#allocation31_spill] sm:$0xff] %v8773_v31 }
 0x76a   :  { %6351 = vmatprep.subr.bf16.mxu0 %v8757_v13  ;;  %6415 = vmatprep.subr.bf16.mxu1 %v8759_v60  ;;  %v8769_v29 = vpack.c.bf16 %v4001_v12, %v3997_v28  ;;  %9688 = vst [vmem:[#allocation30_spill] sm:$0xff] %v8771_v6  ;;  %v8776_v60 = vpack.c.bf16 %v4002_v49, %v3998_v8  ;;  %v4009_v28 = vld [vmem:[#allocation8 + $0x1a8] sm:$0xff]  ;;  %v4007_v12 = vld [vmem:[#allocation8 + $0x198] sm:$0xff]  ;;  %v4006_v8 = vld [vmem:[#allocation8 + $0x190] sm:$0xff] }
 0x76b   :  { %v8783_v4 = vpack.c.bf16 %v4011_v45, %v4007_v12  ;;  %v8785_v13 = vpack.c.bf16 %v4008_v32, %v4004_v1  ;;  %v4010_v49 = vld [vmem:[#allocation8 + $0x1b0] sm:$0xff]  ;;  %v4019_v12 = vld [vmem:[#allocation8 + $0x1f8] sm:$0xff]  ;;  %v4012_v45 = vld [vmem:[#allocation8 + $0x1c0] sm:$0xff] }
 0x76c   :  { %9687 = vst [vmem:[#allocation29_spill] sm:$0xff] %v8769_v29  ;;  %9690 = vst [vmem:[#allocation32_spill] sm:$0xff] %v8776_v60  ;;  %v4016_v1 = vld [vmem:[#allocation8 + $0x1e0] sm:$0xff] }
 0x76d   :  { %6353 = vmatpush1.bf16.msra.mxu0 %v8761_v34  ;;  %6417 = vmatpush1.bf16.msra.mxu1 %v8764_v26  ;;  %v4005_v26 = vld [vmem:[#allocation8 + $0x188] sm:$0xff]  ;;  %9692 = vst [vmem:[#allocation34_spill] sm:$0xff] %v8783_v4  ;;  %9693 = vst [vmem:[#allocation35_spill] sm:$0xff] %v8785_v13 }
 0x76e   :  { %6355 = vmatprep.subr.bf16.mxu0 %v8769_v29  ;;  %6419 = vmatprep.subr.bf16.mxu1 %v8771_v6  ;;  %v8781_v34 = vpack.c.bf16 %v4009_v28, %v4005_v26  ;;  %v8788_v6 = vpack.c.bf16 %v4010_v49, %v4006_v8  ;;  %v4017_v26 = vld [vmem:[#allocation8 + $0x1e8] sm:$0xff]  ;;  %v4015_v28 = vld [vmem:[#allocation8 + $0x1d8] sm:$0xff]  ;;  %v8797_v29 = vpack.c.bf16 %v4016_v1, %v4012_v45  ;;  %v4014_v8 = vld [vmem:[#allocation8 + $0x1d0] sm:$0xff] }
 0x76f   :  { %v8795_v32 = vpack.c.bf16 %v4019_v12, %v4015_v28  ;;  %v4018_v49 = vld [vmem:[#allocation8 + $0x1f0] sm:$0xff]  ;;  %v4027_v28 = vld [vmem:[#allocation8 + $0x238] sm:$0xff]  ;;  %v4020_v12 = vld [vmem:[#allocation8 + $0x200] sm:$0xff] }
 0x770   :  { %9691 = vst [vmem:[#allocation33_spill] sm:$0xff] %v8781_v34  ;;  %9694 = vst [vmem:[#allocation36_spill] sm:$0xff] %v8788_v6  ;;  %v4024_v45 = vld [vmem:[#allocation8 + $0x220] sm:$0xff] }
 0x771   :  { %6357 = vmatpush1.bf16.msra.mxu0 %v8773_v31  ;;  %6421 = vmatpush1.bf16.msra.mxu1 %v8776_v60  ;;  %v4013_v60 = vld [vmem:[#allocation8 + $0x1c8] sm:$0xff]  ;;  %9696 = vst [vmem:[#allocation38_spill] sm:$0xff] %v8795_v32  ;;  %9697 = vst [vmem:[#allocation39_spill] sm:$0xff] %v8797_v29 }
 0x772   :  { %6359 = vmatprep.subr.bf16.mxu0 %v8781_v34  ;;  %6423 = vmatprep.subr.bf16.mxu1 %v8783_v4  ;;  %v8793_v31 = vpack.c.bf16 %v4017_v26, %v4013_v60  ;;  %v8800_v4 = vpack.c.bf16 %v4018_v49, %v4014_v8  ;;  %v4025_v60 = vld [vmem:[#allocation8 + $0x228] sm:$0xff]  ;;  %v4023_v26 = vld [vmem:[#allocation8 + $0x218] sm:$0xff]  ;;  %v8809_v34 = vpack.c.bf16 %v4024_v45, %v4020_v12  ;;  %v4022_v8 = vld [vmem:[#allocation8 + $0x210] sm:$0xff] }
 0x773   :  { %v8807_v1 = vpack.c.bf16 %v4027_v28, %v4023_v26  ;;  %v4026_v49 = vld [vmem:[#allocation8 + $0x230] sm:$0xff]  ;;  %v4035_v26 = vld [vmem:[#allocation8 + $0x278] sm:$0xff]  ;;  %v4028_v28 = vld [vmem:[#allocation8 + $0x240] sm:$0xff] }
 0x774   :  { %9695 = vst [vmem:[#allocation37_spill] sm:$0xff] %v8793_v31  ;;  %9698 = vst [vmem:[#allocation40_spill] sm:$0xff] %v8800_v4  ;;  %v4032_v12 = vld [vmem:[#allocation8 + $0x260] sm:$0xff] }
 0x775   :  { %6361 = vmatpush1.bf16.msra.mxu0 %v8785_v13  ;;  %6425 = vmatpush1.bf16.msra.mxu1 %v8788_v6  ;;  %v4021_v6 = vld [vmem:[#allocation8 + $0x208] sm:$0xff]  ;;  %9700 = vst [vmem:[#allocation42_spill] sm:$0xff] %v8807_v1  ;;  %9701 = vst [vmem:[#allocation43_spill] sm:$0xff] %v8809_v34 }
 0x776   :  { %6363 = vmatprep.subr.bf16.mxu0 %v8793_v31  ;;  %6427 = vmatprep.subr.bf16.mxu1 %v8795_v32  ;;  %v8805_v13 = vpack.c.bf16 %v4025_v60, %v4021_v6  ;;  %v8812_v32 = vpack.c.bf16 %v4026_v49, %v4022_v8  ;;  %v4033_v6 = vld [vmem:[#allocation8 + $0x268] sm:$0xff]  ;;  %v4031_v60 = vld [vmem:[#allocation8 + $0x258] sm:$0xff]  ;;  %v8821_v31 = vpack.c.bf16 %v4032_v12, %v4028_v28  ;;  %v4030_v8 = vld [vmem:[#allocation8 + $0x250] sm:$0xff] }
 0x777   :  { %v8819_v45 = vpack.c.bf16 %v4035_v26, %v4031_v60  ;;  %v4034_v49 = vld [vmem:[#allocation8 + $0x270] sm:$0xff]  ;;  %v4043_v60 = vld [vmem:[#allocation8 + $0x2b8] sm:$0xff]  ;;  %v4036_v26 = vld [vmem:[#allocation8 + $0x280] sm:$0xff] }
 0x778   :  { %9699 = vst [vmem:[#allocation41_spill] sm:$0xff] %v8805_v13  ;;  %9702 = vst [vmem:[#allocation44_spill] sm:$0xff] %v8812_v32  ;;  %v4040_v28 = vld [vmem:[#allocation8 + $0x2a0] sm:$0xff] }
 0x779   :  { %6365 = vmatpush1.bf16.msra.mxu0 %v8797_v29  ;;  %6429 = vmatpush1.bf16.msra.mxu1 %v8800_v4  ;;  %v4029_v4 = vld [vmem:[#allocation8 + $0x248] sm:$0xff]  ;;  %9704 = vst [vmem:[#allocation46_spill] sm:$0xff] %v8819_v45  ;;  %9705 = vst [vmem:[#allocation47_spill] sm:$0xff] %v8821_v31 }
 0x77a   :  { %6367 = vmatprep.subr.bf16.mxu0 %v8805_v13  ;;  %6431 = vmatprep.subr.bf16.mxu1 %v8807_v1  ;;  %v8817_v29 = vpack.c.bf16 %v4033_v6, %v4029_v4  ;;  %v8824_v1 = vpack.c.bf16 %v4034_v49, %v4030_v8  ;;  %v4041_v4 = vld [vmem:[#allocation8 + $0x2a8] sm:$0xff]  ;;  %v4039_v6 = vld [vmem:[#allocation8 + $0x298] sm:$0xff]  ;;  %v8833_v13 = vpack.c.bf16 %v4040_v28, %v4036_v26  ;;  %v4038_v8 = vld [vmem:[#allocation8 + $0x290] sm:$0xff] }
 0x77b   :  { %v8831_v12 = vpack.c.bf16 %v4043_v60, %v4039_v6  ;;  %v4042_v49 = vld [vmem:[#allocation8 + $0x2b0] sm:$0xff]  ;;  %v4051_v6 = vld [vmem:[#allocation8 + $0x2f8] sm:$0xff]  ;;  %v4044_v60 = vld [vmem:[#allocation8 + $0x2c0] sm:$0xff] }
 0x77c   :  { %9703 = vst [vmem:[#allocation45_spill] sm:$0xff] %v8817_v29  ;;  %9706 = vst [vmem:[#allocation48_spill] sm:$0xff] %v8824_v1  ;;  %v4048_v26 = vld [vmem:[#allocation8 + $0x2e0] sm:$0xff] }
 0x77d   :  { %6369 = vmatpush1.bf16.msra.mxu0 %v8809_v34  ;;  %6433 = vmatpush1.bf16.msra.mxu1 %v8812_v32  ;;  %v4037_v32 = vld [vmem:[#allocation8 + $0x288] sm:$0xff]  ;;  %9708 = vst [vmem:[#allocation50_spill] sm:$0xff] %v8831_v12  ;;  %9709 = vst [vmem:[#allocation51_spill] sm:$0xff] %v8833_v13 }
 0x77e   :  { %6371 = vmatprep.subr.bf16.mxu0 %v8817_v29  ;;  %6435 = vmatprep.subr.bf16.mxu1 %v8819_v45  ;;  %v8829_v34 = vpack.c.bf16 %v4041_v4, %v4037_v32  ;;  %v8836_v45 = vpack.c.bf16 %v4042_v49, %v4038_v8  ;;  %v4049_v32 = vld [vmem:[#allocation8 + $0x2e8] sm:$0xff]  ;;  %v4047_v4 = vld [vmem:[#allocation8 + $0x2d8] sm:$0xff]  ;;  %v8845_v29 = vpack.c.bf16 %v4048_v26, %v4044_v60  ;;  %v4046_v8 = vld [vmem:[#allocation8 + $0x2d0] sm:$0xff] }
 0x77f   :  { %v8843_v28 = vpack.c.bf16 %v4051_v6, %v4047_v4  ;;  %v4050_v49 = vld [vmem:[#allocation8 + $0x2f0] sm:$0xff]  ;;  %v4059_v4 = vld [vmem:[#allocation8 + $0x338] sm:$0xff]  ;;  %v4052_v6 = vld [vmem:[#allocation8 + $0x300] sm:$0xff] }
 0x780   :  { %9707 = vst [vmem:[#allocation49_spill] sm:$0xff] %v8829_v34  ;;  %9710 = vst [vmem:[#allocation52_spill] sm:$0xff] %v8836_v45  ;;  %v4056_v60 = vld [vmem:[#allocation8 + $0x320] sm:$0xff] }
 0x781   :  { %6373 = vmatpush1.bf16.msra.mxu0 %v8821_v31  ;;  %6437 = vmatpush1.bf16.msra.mxu1 %v8824_v1  ;;  %v4045_v1 = vld [vmem:[#allocation8 + $0x2c8] sm:$0xff]  ;;  %9712 = vst [vmem:[#allocation54_spill] sm:$0xff] %v8843_v28  ;;  %9713 = vst [vmem:[#allocation55_spill] sm:$0xff] %v8845_v29 }
 0x782   :  { %6375 = vmatprep.subr.bf16.mxu0 %v8829_v34  ;;  %6439 = vmatprep.subr.bf16.mxu1 %v8831_v12  ;;  %v8841_v31 = vpack.c.bf16 %v4049_v32, %v4045_v1  ;;  %v8848_v12 = vpack.c.bf16 %v4050_v49, %v4046_v8  ;;  %v4057_v1 = vld [vmem:[#allocation8 + $0x328] sm:$0xff]  ;;  %v4055_v32 = vld [vmem:[#allocation8 + $0x318] sm:$0xff]  ;;  %v8857_v34 = vpack.c.bf16 %v4056_v60, %v4052_v6  ;;  %v4054_v8 = vld [vmem:[#allocation8 + $0x310] sm:$0xff] }
 0x783   :  { %v8855_v26 = vpack.c.bf16 %v4059_v4, %v4055_v32  ;;  %v4058_v49 = vld [vmem:[#allocation8 + $0x330] sm:$0xff]  ;;  %v4067_v32 = vld [vmem:[#allocation8 + $0x378] sm:$0xff]  ;;  %v4060_v4 = vld [vmem:[#allocation8 + $0x340] sm:$0xff] }
 0x784   :  { %9711 = vst [vmem:[#allocation53_spill] sm:$0xff] %v8841_v31  ;;  %9714 = vst [vmem:[#allocation56_spill] sm:$0xff] %v8848_v12  ;;  %v4064_v6 = vld [vmem:[#allocation8 + $0x360] sm:$0xff] }
 0x785   :  { %6377 = vmatpush1.bf16.msra.mxu0 %v8833_v13  ;;  %6441 = vmatpush1.bf16.msra.mxu1 %v8836_v45  ;;  %v4053_v45 = vld [vmem:[#allocation8 + $0x308] sm:$0xff]  ;;  %9716 = vst [vmem:[#allocation58_spill] sm:$0xff] %v8855_v26  ;;  %9717 = vst [vmem:[#allocation59_spill] sm:$0xff] %v8857_v34 }
 0x786   :  { %6379 = vmatprep.subr.bf16.mxu0 %v8841_v31  ;;  %6443 = vmatprep.subr.bf16.mxu1 %v8843_v28  ;;  %v8853_v13 = vpack.c.bf16 %v4057_v1, %v4053_v45  ;;  %v8860_v28 = vpack.c.bf16 %v4058_v49, %v4054_v8  ;;  %v4065_v45 = vld [vmem:[#allocation8 + $0x368] sm:$0xff]  ;;  %v4063_v1 = vld [vmem:[#allocation8 + $0x358] sm:$0xff]  ;;  %v8869_v31 = vpack.c.bf16 %v4064_v6, %v4060_v4  ;;  %v4062_v8 = vld [vmem:[#allocation8 + $0x350] sm:$0xff] }
 0x787   :  { %v8867_v60 = vpack.c.bf16 %v4067_v32, %v4063_v1  ;;  %v4066_v49 = vld [vmem:[#allocation8 + $0x370] sm:$0xff]  ;;  %v4068_v1 = vld [vmem:[#allocation8 + $0x380] sm:$0xff] }
 0x788   :  { %9715 = vst [vmem:[#allocation57_spill] sm:$0xff] %v8853_v13  ;;  %9718 = vst [vmem:[#allocation60_spill] sm:$0xff] %v8860_v28  ;;  %v4072_v32 = vld [vmem:[#allocation8 + $0x3a0] sm:$0xff]  ;;  %v4070_v4 = vld [vmem:[#allocation8 + $0x390] sm:$0xff] }
 0x789   :  { %6381 = vmatpush1.bf16.msra.mxu0 %v8845_v29  ;;  %6445 = vmatpush1.bf16.msra.mxu1 %v8848_v12  ;;  %v4061_v12 = vld [vmem:[#allocation8 + $0x348] sm:$0xff]  ;;  %9720 = vst [vmem:[#allocation62_spill] sm:$0xff] %v8867_v60  ;;  %9721 = vst [vmem:[#allocation63_spill] sm:$0xff] %v8869_v31  ;;  %v8881_v6 = vpack.c.bf16 %v4072_v32, %v4068_v1  ;;  %v4082_v1 = vld [vmem:[#allocation8 + $0x3f0] sm:$0xff] }
 0x78a   :  { %6383 = vmatprep.subr.bf16.mxu0 %v8853_v13  ;;  %6447 = vmatprep.subr.bf16.mxu1 %v8855_v26  ;;  %v8865_v29 = vpack.c.bf16 %v4065_v45, %v4061_v12  ;;  %v4069_v13 = vld [vmem:[#allocation8 + $0x388] sm:$0xff]  ;;  %v8878_v45 = vpack.c.bf16 %v4075_v54, %v4071_v25  ;;  %v4079_v54 = vld [vmem:[#allocation8 + $0x3d8] sm:$0xff] }
 0x78b   :  { %v4073_v26 = vld [vmem:[#allocation8 + $0x3a8] sm:$0xff]  ;;  %9723 = vst [vmem:[#allocation65_spill] sm:$0xff] %v8881_v6  ;;  %v4083_v25 = vld [vmem:[#allocation8 + $0x3f8] sm:$0xff] }
 0x78c   :  { %9719 = vst [vmem:[#allocation61_spill] sm:$0xff] %v8865_v29  ;;  %v8876_v12 = vpack.c.bf16 %v4073_v26, %v4069_v13  ;;  %v4076_v26 = vld [vmem:[#allocation8 + $0x3c0] sm:$0xff] }
 0x78d   :  { %6385 = vmatpush1.bf16.msra.mxu0 %v8857_v34  ;;  %6449 = vmatpush1.bf16.msra.mxu1 %v8860_v28  ;;  %v8872_v34 = vpack.c.bf16 %v4066_v49, %v4062_v8  ;;  %v4074_v8 = vld [vmem:[#allocation8 + $0x3b0] sm:$0xff]  ;;  %v4077_v49 = vld [vmem:[#allocation8 + $0x3c8] sm:$0xff]  ;;  %v4080_v28 = vld [vmem:[#allocation8 + $0x3e0] sm:$0xff] }
 0x78e   :  { %6387 = vmatprep.subr.bf16.mxu0 %v8865_v29  ;;  %6451 = vmatprep.subr.bf16.mxu1 %v8867_v60  ;;  %v4081_v29 = vld [vmem:[#allocation8 + $0x3e8] sm:$0xff]  ;;  %v8885_v60 = vpack.c.bf16 %v4074_v8, %v4070_v4  ;;  %v8892_v32 = vpack.c.bf16 %v4080_v28, %v4076_v26 }
 0x78f   :  { %9722 = vst [vmem:[#allocation64_spill] sm:$0xff] %v8872_v34  ;;  %v8887_v13 = vpack.c.bf16 %v4081_v29, %v4077_v49  ;;  %v3511_v29 = vld [vmem:[#allocation9] sm:$0xf] }
 0x790   :  { %9724 = vst [vmem:[#allocation66_spill] sm:$0xff] %v8885_v60  ;;  %9727 = vst [vmem:[#allocation69_spill] sm:$0xff] %v8892_v32  ;;  %v3516_v28 = vrot.slane %v3511_v29, %v9668_v63  ;;  %v3520_v8 = vrot.slane %v3511_v29, %v9669_v15 }
 0x791   :  { %6389 = vmatpush1.bf16.msra.mxu0 %v8869_v31  ;;  %6453 = vmatpush1.bf16.msra.mxu1 %v8872_v34  ;;  %9725 = vst [vmem:[#allocation67_spill] sm:$0xff] %v8887_v13  ;;  %v8889_v31 = vpack.c.bf16 %v4083_v25, %v4079_v54  ;;  %v4078_v34 = vld [vmem:[#allocation8 + $0x3d0] sm:$0xff] }
 0x792   :  { %6391 = vmatprep.subr.bf16.mxu0 %v8876_v12  ;;  %6455 = vmatprep.subr.bf16.mxu1 %v8878_v45  ;;  %v8896_v4 = vpack.c.bf16 %v4082_v1, %v4078_v34 }
 0x793   :  { %9726 = vst [vmem:[#allocation68_spill] sm:$0xff] %v8889_v31 }
 0x794   :  { %9728 = vst [vmem:[#allocation70_spill] sm:$0xff] %v8896_v4 }
 0x795   :  { %6393 = vmatpush1.bf16.msra.mxu0 %v8881_v6  ;;  %6457 = vmatpush1.bf16.msra.mxu1 %v8885_v60 }
 0x796   :  { %6395 = vmatprep.subr.bf16.mxu0 %v8887_v13  ;;  %6459 = vmatprep.subr.bf16.mxu1 %v8889_v31 }
 0x799   :  { %6397 = vmatpush1.bf16.msra.mxu0 %v8892_v32  ;;  %6461 = vmatpush1.bf16.msra.mxu1 %v8896_v4  ;;  %v3524_v4 = vrot.slane %v3511_v29, %v9437_v9 }
 0x79a   :  { %6463 = vmatprep.subr.bf16.mxu0 %v8589_v43  ;;  %6495 = vmatprep.subr.bf16.mxu1 %v8591_v14  ;;  %v3528_v43 = vrot.slane %v3511_v29, %v7611_v19 }
 0x80f   :  { %v3604_v49 = vpop.f32.mrb[22].mxu0  ;;  %v3675_v54 = vpop.f32.mrb[30].mxu1 }
 0x810   :  { %v3605_v25 = vadd.f32 %v3604_v49, %v3516_v28  ;;  %v3606_v34 = vpop.f32.mrb[23].mxu0  ;;  %v3677_v26 = vpop.f32.mrb[31].mxu1  ;;  %v3676_v14 = vadd.f32 %v3675_v54, %v3524_v4 }
 0x811   :  { %v3607_v1 = vadd.f32 %v3606_v34, %v3520_v8  ;;  %v3678_v32 = vadd.f32 %v3677_v26, %v3528_v43 }
 0x812   :  { %v5041_v31 = vmul.f32 -1.442695, %v3605_v25  ;;  %v5043_v60 = vmul.f32 -1.442695, %v3676_v14 }
 0x813   :  { %v5042_v13 = vmul.f32 -1.442695, %v3607_v1 }
 0x814   :  { %6875 = vpow2.f32 %v5041_v31 }
 0x815   :  { %6877 = vpow2.f32 %v5042_v13 }
 0x816   :  { %6879 = vtanh.f32 %v3678_v32 }
 0x817   :  { %6881 = vpow2.f32 %v5043_v60 }
 0x81e   :  { %v6876_v63 = vpop.eup %6875 }
 0x81f   :  { %v3689_v6 = vadd.f32 1.0, %v6876_v63  ;;  %v6878_v15 = vpop.eup %6877 }
 0x820   :  { %v3690_v28 = vadd.f32 1.0, %v6878_v15  ;;  %v6880_v8 = vpop.eup %6879 }
 0x821   :  { %6883 = vrcp.f32 %v3689_v6  ;;  %v6882_v49 = vpop.eup %6881 }
 0x822   :  { %6885 = vrcp.f32 %v3690_v28  ;;  %v3691_v1 = vadd.f32 1.0, %v6882_v49 }
 0x824   :  { %6887 = vrcp.f32 %v3691_v1 }
 0x82b   :  { %v6884_v25 = vpop.eup %6883 }
 0x82c   :  { %v3700_v31 = vmul.f32 %v6884_v25, %v6880_v8  ;;  %v6886_v34 = vpop.eup %6885 }
 0x82d   :  { %v3699_v13 = vmul.f32 %v6886_v34, %v8600_v61 }
 0x82e   :  { %v6888_v49 = vpop.eup %6887 }
 0x82f   :  { %v3835_v29 = vpop.f32.mrb[24].mxu0  ;;  %v3906_v4 = vpop.f32.mrb[32].mxu1  ;;  %v8908_v54 = vadd.f32 %v3700_v31, %v3699_v13 }
 0x830   :  { %v3915_v26 = vrot.slane %v3835_v29, 4  ;;  %v3837_v63 = vpop.f32.mrb[25].mxu0  ;;  %v3908_v32 = vpop.f32.mrb[33].mxu1  ;;  %v3917_v28 = vrot.slane %v3906_v4, 4 }
 0x831   :  { %v3916_v60 = vrot.slane %v3837_v63, 4  ;;  %6889 = vtanh.f32 %v8908_v54  ;;  %v3918_v61 = vrot.slane %v3908_v32, 4 }
 0x832   :  { %v3923_v15 = vadd.f32 %v3915_v26, %v9670_v42  ;;  %v3925_v8 = vadd.f32 %v3917_v28, %v9612_v52 }
 0x833   :  { %v3924_v6 = vadd.f32 %v3916_v60, %v9611_v37  ;;  %v3926_v31 = vadd.f32 %v3918_v61, %v9613_v24 }
 0x834   :  { %v5044_v43 = vmul.f32 -1.442695, %v3923_v15  ;;  %v5046_v1 = vmul.f32 -1.442695, %v3925_v8 }
 0x835   :  { %v5045_v14 = vmul.f32 -1.442695, %v3924_v6 }
 0x836   :  { %6891 = vpow2.f32 %v5044_v43  ;;  %v3947_v43 = vrot.slane %v8608_v57, 6  ;;  %v9730_v57 = vld [vmem:[#allocation81_spill] sm:$0xff] }
 0x837   :  { %6893 = vpow2.f32 %v5045_v14 }
 0x838   :  { %6895 = vtanh.f32 %v3926_v31 }
 0x839   :  { %6897 = vpow2.f32 %v5046_v1 }
 0x83b   :  { %v6890_v25 = vpop.eup %6889 }
 0x83c   :  { %v3703_v34 = vmul.f32 %v6890_v25, %v6888_v49 }
 0x83e   :  { %3704 = vst [vmem:[#allocation2 + $0xa] sm:$0x3] %v3703_v34  ;;  %v3955_v13 = vrot.slane %v3703_v34, 4 }
 0x840   :  { %v6892_v29 = vpop.eup %6891  ;;  %v4108_v63 = vrot.slane %v3955_v13, 4  ;;  %v9765_v13 = vld [vmem:[#allocation49_spill] sm:$0xff] }
 0x841   :  { %v3936_v26 = vadd.f32 1.0, %v6892_v29  ;;  %v6894_v60 = vpop.eup %6893  ;;  %v9766_v29 = vld [vmem:[#allocation50_spill] sm:$0xff] }
 0x842   :  { %v3937_v4 = vadd.f32 1.0, %v6894_v60  ;;  %4175 = vmatprep.mubr.f32.mxu0 %v4108_v63  ;;  %4246 = vmatprep.mubr.f32.mxu1 %v4108_v63  ;;  %v6896_v32 = vpop.eup %6895  ;;  %v9768_v63 = vld [vmem:[#allocation52_spill] sm:$0xff]  ;;  %v9769_v60 = vld [vmem:[#allocation53_spill] sm:$0xff] }
 0x843   :  { %6899 = vrcp.f32 %v3936_v26  ;;  %v6898_v15 = vpop.eup %6897  ;;  %v9767_v26 = vld [vmem:[#allocation51_spill] sm:$0xff] }
 0x844   :  { %6901 = vrcp.f32 %v3937_v4  ;;  %v3938_v61 = vadd.f32 1.0, %v6898_v15  ;;  %v9770_v4 = vld [vmem:[#allocation54_spill] sm:$0xff]  ;;  %v9772_v15 = vld [vmem:[#allocation56_spill] sm:$0xff] }
 0x846   :  { %6903 = vrcp.f32 %v3938_v61  ;;  %v9777_v61 = vld [vmem:[#allocation61_spill] sm:$0xff] }
 0x84d   :  { %v6900_v6 = vpop.eup %6899 }
 0x84e   :  { %v3950_v14 = vmul.f32 %v6900_v6, %v6896_v32  ;;  %v6902_v28 = vpop.eup %6901  ;;  %v9771_v32 = vld [vmem:[#allocation55_spill] sm:$0xff]  ;;  %v9773_v6 = vld [vmem:[#allocation57_spill] sm:$0xff] }
 0x84f   :  { %v3949_v8 = vmul.f32 %v6902_v28, %v3947_v43  ;;  %v9774_v43 = vld [vmem:[#allocation58_spill] sm:$0xff]  ;;  %v9776_v28 = vld [vmem:[#allocation60_spill] sm:$0xff] }
 0x850   :  { %v6904_v25 = vpop.eup %6903 }
 0x851   :  { %v8916_v49 = vadd.f32 %v3950_v14, %v3949_v8  ;;  %v9775_v14 = vld [vmem:[#allocation59_spill] sm:$0xff]  ;;  %v9778_v8 = vld [vmem:[#allocation62_spill] sm:$0xff] }
 0x853   :  { %6905 = vtanh.f32 %v8916_v49 }
 0x85d   :  { %v6906_v31 = vpop.eup %6905 }
 0x85e   :  { %v3953_v34 = vmul.f32 %v6906_v31, %v6904_v25  ;;  %v9779_v25 = vld [vmem:[#allocation63_spill] sm:$0xff]  ;;  %v9780_v31 = vld [vmem:[#allocation64_spill] sm:$0xff] }
 0x860   :  { %v4107_v1 = vrot.slane %v3953_v34, 4  ;;  %v9781_v34 = vld [vmem:[#allocation65_spill] sm:$0xff] }
 0x862   :  { %4176 = vmatmul.mubr.f32.vlgmr.msra.gmra.mrb[26].mxu0 %v4107_v1  ;;  %4247 = vmatmul.mubr.f32.vlgmr.msra.gmra.mrb[34].mxu1 %v4107_v1 }
 0x863   :  { %6465 = vmatpush1.bf16.msra.mxu0 %v8611_v7  ;;  %6497 = vmatpush1.bf16.msra.mxu1 %v8613_v51  ;;  %v9731_v7 = vld [vmem:[#allocation82_spill] sm:$0xff]  ;;  %v9732_v51 = vld [vmem:[#allocation83_spill] sm:$0xff] }
 0x864   :  { %6467 = vmatprep.subr.bf16.mxu0 %v8617_v16  ;;  %6499 = vmatprep.subr.bf16.mxu1 %v8619_v23  ;;  %v9733_v16 = vld [vmem:[#allocation75_spill] sm:$0xff]  ;;  %v9734_v23 = vld [vmem:[#allocation77_spill] sm:$0xff] }
 0x865   :  { %4406 = vmatprep.mubr.f32.mxu0 %v9382_v40  ;;  %4477 = vmatprep.mubr.f32.mxu1 %v9382_v40  ;;  %v9729_v40 = vld [vmem:[#allocation80_spill] sm:$0xff] }
 0x867   :  { %6469 = vmatpush1.bf16.msra.mxu0 %v8625_v38  ;;  %6501 = vmatpush1.bf16.msra.mxu1 %v8627_v47  ;;  %v9735_v38 = vld [vmem:[#allocation78_spill] sm:$0xff]  ;;  %v9736_v47 = vld [vmem:[#allocation20_spill] sm:$0xff] }
 0x868   :  { %6471 = vmatprep.subr.bf16.mxu0 %v8631_v17  ;;  %6503 = vmatprep.subr.bf16.mxu1 %v8633_v3  ;;  %v9737_v17 = vld [vmem:[#allocation21_spill] sm:$0xff]  ;;  %v9738_v3 = vld [vmem:[#allocation22_spill] sm:$0xff] }
 0x86b   :  { %6473 = vmatpush1.bf16.msra.mxu0 %v8639_v55  ;;  %6505 = vmatpush1.bf16.msra.mxu1 %v8641_v62  ;;  %v9739_v55 = vld [vmem:[#allocation23_spill] sm:$0xff]  ;;  %v9740_v62 = vld [vmem:[#allocation24_spill] sm:$0xff] }
 0x86c   :  { %6475 = vmatprep.subr.bf16.mxu0 %v8645_v53  ;;  %6507 = vmatprep.subr.bf16.mxu1 %v8647_v10  ;;  %v9741_v53 = vld [vmem:[#allocation25_spill] sm:$0xff]  ;;  %v9742_v10 = vld [vmem:[#allocation26_spill] sm:$0xff] }
 0x86f   :  { %6477 = vmatpush1.bf16.msra.mxu0 %v8651_v50  ;;  %6509 = vmatpush1.bf16.msra.mxu1 %v8653_v5  ;;  %v9743_v50 = vld [vmem:[#allocation27_spill] sm:$0xff]  ;;  %v9744_v5 = vld [vmem:[#allocation28_spill] sm:$0xff] }
 0x870   :  { %6479 = vmatprep.subr.bf16.mxu0 %v8657_v59  ;;  %6511 = vmatprep.subr.bf16.mxu1 %v8659_v22  ;;  %v9745_v59 = vld [vmem:[#allocation29_spill] sm:$0xff]  ;;  %v9746_v22 = vld [vmem:[#allocation30_spill] sm:$0xff] }
 0x873   :  { %6481 = vmatpush1.bf16.msra.mxu0 %v8663_v33  ;;  %6513 = vmatpush1.bf16.msra.mxu1 %v8665_v18  ;;  %v9747_v33 = vld [vmem:[#allocation31_spill] sm:$0xff]  ;;  %v9748_v18 = vld [vmem:[#allocation32_spill] sm:$0xff] }
 0x874   :  { %6483 = vmatprep.subr.bf16.mxu0 %v8669_v36  ;;  %6515 = vmatprep.subr.bf16.mxu1 %v8671_v58  ;;  %v9749_v36 = vld [vmem:[#allocation33_spill] sm:$0xff]  ;;  %v9750_v58 = vld [vmem:[#allocation34_spill] sm:$0xff] }
 0x877   :  { %6485 = vmatpush1.bf16.msra.mxu0 %v8675_v48  ;;  %6517 = vmatpush1.bf16.msra.mxu1 %v8677_v44  ;;  %v9751_v48 = vld [vmem:[#allocation35_spill] sm:$0xff]  ;;  %v9752_v44 = vld [vmem:[#allocation36_spill] sm:$0xff] }
 0x878   :  { %6487 = vmatprep.subr.bf16.mxu0 %v8681_v39  ;;  %6519 = vmatprep.subr.bf16.mxu1 %v8683_v20  ;;  %v9753_v39 = vld [vmem:[#allocation37_spill] sm:$0xff]  ;;  %v9754_v20 = vld [vmem:[#allocation38_spill] sm:$0xff] }
 0x87b   :  { %6489 = vmatpush1.bf16.msra.mxu0 %v8687_v30  ;;  %6521 = vmatpush1.bf16.msra.mxu1 %v8689_v56  ;;  %v9755_v30 = vld [vmem:[#allocation39_spill] sm:$0xff]  ;;  %v9756_v56 = vld [vmem:[#allocation40_spill] sm:$0xff] }
 0x87c   :  { %6491 = vmatprep.subr.bf16.mxu0 %v8693_v46  ;;  %6523 = vmatprep.subr.bf16.mxu1 %v8695_v35  ;;  %v9757_v46 = vld [vmem:[#allocation41_spill] sm:$0xff]  ;;  %v9758_v35 = vld [vmem:[#allocation42_spill] sm:$0xff] }
 0x87f   :  { %6493 = vmatpush1.bf16.msra.mxu0 %v8699_v21  ;;  %6525 = vmatpush1.bf16.msra.mxu1 %v8701_v41  ;;  %v9759_v21 = vld [vmem:[#allocation43_spill] sm:$0xff]  ;;  %v9760_v41 = vld [vmem:[#allocation44_spill] sm:$0xff] }
 0x880   :  { %6527 = vmatprep.subr.bf16.mxu0 %v8709_v2  ;;  %6591 = vmatprep.subr.bf16.mxu1 %v8711_v27  ;;  %v9761_v2 = vld [vmem:[#allocation45_spill] sm:$0xff]  ;;  %v9762_v27 = vld [vmem:[#allocation46_spill] sm:$0xff] }
 0x882   :  { %4407 = vmatmul.mubr.f32.vlgmr.msra.gmra.mrb[28].mxu0 %v4107_v1  ;;  %4478 = vmatmul.mubr.f32.vlgmr.msra.gmra.mrb[36].mxu1 %v4107_v1  ;;  %v9782_v1 = vld [vmem:[#allocation66_spill] sm:$0xff] }
 0x883   :  { %6529 = vmatpush1.bf16.msra.mxu0 %v8713_v0  ;;  %6593 = vmatpush1.bf16.msra.mxu1 %v8716_v11  ;;  %v9763_v0 = vld [vmem:[#allocation47_spill] sm:$0xff]  ;;  %v9764_v11 = vld [vmem:[#allocation48_spill] sm:$0xff] }
 0x884   :  { %6531 = vmatprep.subr.bf16.mxu0 %v9729_v40  ;;  %6595 = vmatprep.subr.bf16.mxu1 %v9730_v57  ;;  %v9783_v40 = vld [vmem:[#allocation67_spill] sm:$0xff]  ;;  %v9784_v57 = vld [vmem:[#allocation68_spill] sm:$0xff] }
 0x887   :  { %6533 = vmatpush1.bf16.msra.mxu0 %v9731_v7  ;;  %6597 = vmatpush1.bf16.msra.mxu1 %v9732_v51  ;;  %v9785_v7 = vld [vmem:[#allocation69_spill] sm:$0xff]  ;;  %v9786_v51 = vld [vmem:[#allocation70_spill] sm:$0xff] }
 0x888   :  { %6535 = vmatprep.subr.bf16.mxu0 %v9733_v16  ;;  %6599 = vmatprep.subr.bf16.mxu1 %v9734_v23  ;;  %v4084_v16 = vld [vmem:[#allocation9] sm:$0xf]  ;;  %v9787_v23 = vld [vmem:[#allocation72_spill] sm:$0xff] }
 0x88b   :  { %6537 = vmatpush1.bf16.msra.mxu0 %v9735_v38  ;;  %6601 = vmatpush1.bf16.msra.mxu1 %v9736_v47  ;;  %v4089_v38 = vrot.slane %v4084_v16, %v9787_v23  ;;  %v9788_v47 = vld [vmem:[#allocation73_spill] sm:$0xff] }
 0x88c   :  { %6539 = vmatprep.subr.bf16.mxu0 %v9737_v17  ;;  %6603 = vmatprep.subr.bf16.mxu1 %v9738_v3  ;;  %v4093_v17 = vrot.slane %v4084_v16, %v9788_v47 }
 0x88f   :  { %6541 = vmatpush1.bf16.msra.mxu0 %v9739_v55  ;;  %6605 = vmatpush1.bf16.msra.mxu1 %v9740_v62 }
 0x890   :  { %6543 = vmatprep.subr.bf16.mxu0 %v9741_v53  ;;  %6607 = vmatprep.subr.bf16.mxu1 %v9742_v10 }
 0x893   :  { %6545 = vmatpush1.bf16.msra.mxu0 %v9743_v50  ;;  %6609 = vmatpush1.bf16.msra.mxu1 %v9744_v5  ;;  %v4097_v5 = vrot.slane %v4084_v16, %v9437_v9 }
 0x894   :  { %6547 = vmatprep.subr.bf16.mxu0 %v9745_v59  ;;  %6611 = vmatprep.subr.bf16.mxu1 %v9746_v22  ;;  %v4101_v59 = vrot.slane %v4084_v16, %v7611_v19 }
 0x897   :  { %6549 = vmatpush1.bf16.msra.mxu0 %v9747_v33  ;;  %6613 = vmatpush1.bf16.msra.mxu1 %v9748_v18 }
 0x898   :  { %6551 = vmatprep.subr.bf16.mxu0 %v9749_v36  ;;  %6615 = vmatprep.subr.bf16.mxu1 %v9750_v58 }
 0x89b   :  { %6553 = vmatpush1.bf16.msra.mxu0 %v9751_v48  ;;  %6617 = vmatpush1.bf16.msra.mxu1 %v9752_v44 }
 0x89c   :  { %6555 = vmatprep.subr.bf16.mxu0 %v9753_v39  ;;  %6619 = vmatprep.subr.bf16.mxu1 %v9754_v20 }
 0x89f   :  { %6557 = vmatpush1.bf16.msra.mxu0 %v9755_v30  ;;  %6621 = vmatpush1.bf16.msra.mxu1 %v9756_v56 }
 0x8a0   :  { %6559 = vmatprep.subr.bf16.mxu0 %v9757_v46  ;;  %6623 = vmatprep.subr.bf16.mxu1 %v9758_v35 }
 0x8a3   :  { %6561 = vmatpush1.bf16.msra.mxu0 %v9759_v21  ;;  %6625 = vmatpush1.bf16.msra.mxu1 %v9760_v41 }
 0x8a4   :  { %6563 = vmatprep.subr.bf16.mxu0 %v9761_v2  ;;  %6627 = vmatprep.subr.bf16.mxu1 %v9762_v27 }
 0x8a7   :  { %6565 = vmatpush1.bf16.msra.mxu0 %v9763_v0  ;;  %6629 = vmatpush1.bf16.msra.mxu1 %v9764_v11 }
 0x8a8   :  { %6567 = vmatprep.subr.bf16.mxu0 %v9765_v13  ;;  %6631 = vmatprep.subr.bf16.mxu1 %v9766_v29 }
 0x8ab   :  { %6569 = vmatpush1.bf16.msra.mxu0 %v9767_v26  ;;  %6633 = vmatpush1.bf16.msra.mxu1 %v9768_v63 }
 0x8ac   :  { %6571 = vmatprep.subr.bf16.mxu0 %v9769_v60  ;;  %6635 = vmatprep.subr.bf16.mxu1 %v9770_v4 }
 0x8af   :  { %6573 = vmatpush1.bf16.msra.mxu0 %v9771_v32  ;;  %6637 = vmatpush1.bf16.msra.mxu1 %v9772_v15 }
 0x8b0   :  { %6575 = vmatprep.subr.bf16.mxu0 %v9773_v6  ;;  %6639 = vmatprep.subr.bf16.mxu1 %v9774_v43 }
 0x8b3   :  { %6577 = vmatpush1.bf16.msra.mxu0 %v9775_v14  ;;  %6641 = vmatpush1.bf16.msra.mxu1 %v9776_v28 }
 0x8b4   :  { %6579 = vmatprep.subr.bf16.mxu0 %v9777_v61  ;;  %6643 = vmatprep.subr.bf16.mxu1 %v9778_v8 }
 0x8b7   :  { %6581 = vmatpush1.bf16.msra.mxu0 %v9779_v25  ;;  %6645 = vmatpush1.bf16.msra.mxu1 %v9780_v31 }
 0x8b8   :  { %6583 = vmatprep.subr.bf16.mxu0 %v8876_v12  ;;  %6647 = vmatprep.subr.bf16.mxu1 %v8878_v45 }
 0x8bb   :  { %6585 = vmatpush1.bf16.msra.mxu0 %v9781_v34  ;;  %6649 = vmatpush1.bf16.msra.mxu1 %v9782_v1 }
 0x8bc   :  { %6587 = vmatprep.subr.bf16.mxu0 %v9783_v40  ;;  %6651 = vmatprep.subr.bf16.mxu1 %v9784_v57 }
 0x8bf   :  { %6589 = vmatpush1.bf16.msra.mxu0 %v9785_v7  ;;  %6653 = vmatpush1.bf16.msra.mxu1 %v9786_v51 }
 0x935   :  { %v4177_v12 = vpop.f32.mrb[26].mxu0  ;;  %v4248_v3 = vpop.f32.mrb[34].mxu1 }
 0x936   :  { %v4178_v45 = vadd.f32 %v4177_v12, %v4089_v38  ;;  %v4179_v55 = vpop.f32.mrb[27].mxu0  ;;  %v4250_v62 = vpop.f32.mrb[35].mxu1  ;;  %v4249_v22 = vadd.f32 %v4248_v3, %v4097_v5 }
 0x937   :  { %v4180_v53 = vadd.f32 %v4179_v55, %v4093_v17  ;;  %v4251_v33 = vadd.f32 %v4250_v62, %v4101_v59  ;;  %v4857_v55 = vld [vmem:[#allocation2] sm:$0xff]  ;;  %v4859_v62 = vld [vmem:[#allocation11] sm:$0xff] }
 0x938   :  { %v5047_v10 = vmul.f32 -1.442695, %v4178_v45  ;;  %v5049_v18 = vmul.f32 -1.442695, %v4249_v22  ;;  %v4863_v59 = vld [vmem:[#allocation11 + $0x20] sm:$0xff]  ;;  %v4864_v22 = vld [vmem:[#allocation11 + $0x28] sm:$0xff] }
 0x939   :  { %v5048_v50 = vmul.f32 -1.442695, %v4180_v53  ;;  %v4860_v53 = vld [vmem:[#allocation11 + $0x8] sm:$0xff] }
 0x93a   :  { %6907 = vpow2.f32 %v5047_v10  ;;  %v4861_v10 = vld [vmem:[#allocation11 + $0x10] sm:$0xff] }
 0x93b   :  { %6909 = vpow2.f32 %v5048_v50  ;;  %v4862_v50 = vld [vmem:[#allocation11 + $0x18] sm:$0xff] }
 0x93c   :  { %6911 = vtanh.f32 %v4251_v33  ;;  %v6658_v5 = vpack.c.bf16 %v4862_v50, %v4861_v10  ;;  %v6662_v33 = vpack.c.bf16 %v4864_v22, %v4863_v59 }
 0x93d   :  { %6913 = vpow2.f32 %v5049_v18  ;;  %v4865_v18 = vld [vmem:[#allocation11 + $0x30] sm:$0xff] }
 0x944   :  { %v6908_v36 = vpop.eup %6907 }
 0x945   :  { %v4262_v58 = vadd.f32 1.0, %v6908_v36  ;;  %v6910_v48 = vpop.eup %6909  ;;  %v4866_v36 = vld [vmem:[#allocation11 + $0x38] sm:$0xff] }
 0x946   :  { %v4263_v44 = vadd.f32 1.0, %v6910_v48  ;;  %v6912_v39 = vpop.eup %6911  ;;  %v4867_v48 = vld [vmem:[#allocation11 + $0x40] sm:$0xff] }
 0x947   :  { %6915 = vrcp.f32 %v4262_v58  ;;  %v6914_v20 = vpop.eup %6913  ;;  %v6666_v58 = vpack.c.bf16 %v4866_v36, %v4865_v18 }
 0x948   :  { %6917 = vrcp.f32 %v4263_v44  ;;  %v4264_v35 = vadd.f32 1.0, %v6914_v20  ;;  %v4868_v44 = vld [vmem:[#allocation11 + $0x48] sm:$0xff]  ;;  %v4869_v20 = vld [vmem:[#allocation11 + $0x50] sm:$0xff] }
 0x94a   :  { %6919 = vrcp.f32 %v4264_v35  ;;  %v4872_v35 = vld [vmem:[#allocation11 + $0x68] sm:$0xff] }
 0x951   :  { %v6916_v30 = vpop.eup %6915 }
 0x952   :  { %v4273_v56 = vmul.f32 %v6916_v30, %v6912_v39  ;;  %v6918_v46 = vpop.eup %6917  ;;  %v6670_v39 = vpack.c.bf16 %v4868_v44, %v4867_v48  ;;  %v4870_v30 = vld [vmem:[#allocation11 + $0x58] sm:$0xff] }
 0x953   :  { %v4272_v21 = vmul.f32 %v6918_v46, %v8908_v54  ;;  %v4871_v46 = vld [vmem:[#allocation11 + $0x60] sm:$0xff] }
 0x954   :  { %v6920_v6 = vpop.eup %6919 }
 0x955   :  { %v4408_v41 = vpop.f32.mrb[28].mxu0  ;;  %v4479_v2 = vpop.f32.mrb[36].mxu1  ;;  %v9020_v27 = vadd.f32 %v4273_v56, %v4272_v21  ;;  %v6674_v56 = vpack.c.bf16 %v4870_v30, %v4869_v20  ;;  %v6678_v21 = vpack.c.bf16 %v4872_v35, %v4871_v46 }
 0x956   :  { %v4488_v0 = vrot.slane %v4408_v41, 2  ;;  %v4410_v11 = vpop.f32.mrb[29].mxu0  ;;  %v4481_v13 = vpop.f32.mrb[37].mxu1  ;;  %v4490_v32 = vrot.slane %v4479_v2, 2  ;;  %v4873_v41 = vld [vmem:[#allocation11 + $0x70] sm:$0xff]  ;;  %v4874_v2 = vld [vmem:[#allocation11 + $0x78] sm:$0xff] }
 0x957   :  { %v4489_v29 = vrot.slane %v4410_v11, 2  ;;  %6921 = vtanh.f32 %v9020_v27  ;;  %v4491_v54 = vrot.slane %v4481_v13, 2  ;;  %v4657_v11 = vld [vmem:[#allocation9] sm:$0xf] }
 0x958   :  { %v4496_v26 = vadd.f32 %v4488_v0, %v9670_v42  ;;  %v4498_v15 = vadd.f32 %v4490_v32, %v9612_v52  ;;  %v6682_v0 = vpack.c.bf16 %v4874_v2, %v4873_v41  ;;  %v4662_v13 = vrot.slane %v4657_v11, %v9787_v23 }
 0x959   :  { %v4497_v63 = vadd.f32 %v4489_v29, %v9611_v37  ;;  %v4499_v14 = vadd.f32 %v4491_v54, %v9613_v24  ;;  %v4520_v24 = vrot.slane %v8916_v49, 6  ;;  %v6654_v49 = vpack.c.bf16 %v4860_v53, %v4859_v62 }
 0x95a   :  { %v5050_v60 = vmul.f32 -1.442695, %v4496_v26  ;;  %v5052_v61 = vmul.f32 -1.442695, %v4498_v15  ;;  %v4666_v29 = vrot.slane %v4657_v11, %v9788_v47 }
 0x95b   :  { %v5051_v4 = vmul.f32 -1.442695, %v4497_v63  ;;  %6655 = vmatprep.subr.bf16.mxu0 %v6654_v49 }
 0x95c   :  { %6923 = vpow2.f32 %v5050_v60 }
 0x95d   :  { %6925 = vpow2.f32 %v5051_v4 }
 0x95e   :  { %6927 = vtanh.f32 %v4499_v14  ;;  %v4674_v14 = vrot.slane %v4657_v11, %v7611_v19 }
 0x95f   :  { %6929 = vpow2.f32 %v5052_v61 }
 0x961   :  { %v6922_v43 = vpop.eup %6921 }
 0x962   :  { %v4276_v28 = vmul.f32 %v6922_v43, %v6920_v6  ;;  %v4670_v43 = vrot.slane %v4657_v11, %v9437_v9 }
 0x964   :  { %4277 = vst [vmem:[#allocation2 + $0xc] sm:$0x3] %v4276_v28  ;;  %v4528_v8 = vrot.slane %v4276_v28, 2 }
 0x966   :  { %v6924_v25 = vpop.eup %6923  ;;  %v4681_v37 = vrot.slane %v4528_v8, 6 }
 0x967   :  { %v4509_v42 = vadd.f32 1.0, %v6924_v25  ;;  %v6926_v31 = vpop.eup %6925 }
 0x968   :  { %v4510_v34 = vadd.f32 1.0, %v6926_v31  ;;  %4748 = vmatprep.mubr.f32.mxu0 %v4681_v37  ;;  %4819 = vmatprep.mubr.f32.mxu1 %v4681_v37  ;;  %v6928_v52 = vpop.eup %6927 }
 0x969   :  { %6931 = vrcp.f32 %v4509_v42  ;;  %v6930_v1 = vpop.eup %6929 }
 0x96a   :  { %6933 = vrcp.f32 %v4510_v34  ;;  %v4511_v51 = vadd.f32 1.0, %v6930_v1 }
 0x96c   :  { %6935 = vrcp.f32 %v4511_v51 }
 0x973   :  { %v6932_v40 = vpop.eup %6931 }
 0x974   :  { %v4523_v57 = vmul.f32 %v6932_v40, %v6928_v52  ;;  %v6934_v7 = vpop.eup %6933 }
 0x975   :  { %v4522_v16 = vmul.f32 %v6934_v7, %v4520_v24 }
 0x976   :  { %v6936_v17 = vpop.eup %6935 }
 0x977   :  { %v4524_v38 = vadd.f32 %v4523_v57, %v4522_v16 }
 0x979   :  { %6937 = vtanh.f32 %v4524_v38  ;;  %4854 = vst [vmem:[#allocation13 - $0x6] sm:$0xc0] %v4524_v38 }
 0x983   :  { %v6938_v12 = vpop.eup %6937 }
 0x984   :  { %v4526_v3 = vmul.f32 %v6938_v12, %v6936_v17 }
 0x986   :  { %v4680_v45 = vrot.slane %v4526_v3, 6  ;;  %4851 = vst [vmem:[#allocation12 - $0x6] sm:$0xc0] %v4526_v3 }
 0x988   :  { %4749 = vmatmul.mubr.f32.vlgmr.msra.gmra.mrb[30].mxu0 %v4680_v45  ;;  %4820 = vmatmul.mubr.f32.vlgmr.msra.gmra.mrb[38].mxu1 %v4680_v45 }
 0x989   :  { %5107 = vmatprep.mubr.f32.mxu0 %v4857_v55  ;;  %6657 = vmatpush3.bf16.msra.mxu0 %v6654_v49 }
 0x98a   :  { %6659 = vmatprep.subr.bf16.mxu0 %v6658_v5 }
 0x98d   :  { %6661 = vmatpush3.bf16.msra.mxu0 %v6658_v5 }
 0x98e   :  { %6663 = vmatprep.subr.bf16.mxu0 %v6662_v33 }
 0x991   :  { %6665 = vmatpush3.bf16.msra.mxu0 %v6662_v33 }
 0x992   :  { %6667 = vmatprep.subr.bf16.mxu0 %v6666_v58 }
 0x995   :  { %6669 = vmatpush3.bf16.msra.mxu0 %v6666_v58 }
 0x996   :  { %6671 = vmatprep.subr.bf16.mxu0 %v6670_v39 }
 0x999   :  { %6673 = vmatpush3.bf16.msra.mxu0 %v6670_v39 }
 0x99a   :  { %6675 = vmatprep.subr.bf16.mxu0 %v6674_v56 }
 0x99d   :  { %6677 = vmatpush3.bf16.msra.mxu0 %v6674_v56 }
 0x99e   :  { %6679 = vmatprep.subr.bf16.mxu0 %v6678_v21 }
 0x9a1   :  { %6681 = vmatpush3.bf16.msra.mxu0 %v6678_v21 }
 0x9a2   :  { %6683 = vmatprep.subr.bf16.mxu0 %v6682_v0 }
 0x9a5   :  { %6685 = vmatpush3.bf16.msra.mxu0 %v6682_v0 }
 0xa5b   :  { %v4750_v26 = vpop.f32.mrb[30].mxu0  ;;  %v4821_v63 = vpop.f32.mrb[38].mxu1 }
 0xa5c   :  { %v4751_v60 = vadd.f32 %v4750_v26, %v4662_v13  ;;  %v4752_v4 = vpop.f32.mrb[31].mxu0  ;;  %v4823_v32 = vpop.f32.mrb[39].mxu1  ;;  %v4822_v28 = vadd.f32 %v4821_v63, %v4670_v43 }
 0xa5d   :  { %v4753_v54 = vadd.f32 %v4752_v4, %v4666_v29  ;;  %v4824_v61 = vadd.f32 %v4823_v32, %v4674_v14 }
 0xa5e   :  { %v5053_v15 = vmul.f32 -1.442695, %v4751_v60  ;;  %v5055_v8 = vmul.f32 -1.442695, %v4822_v28 }
 0xa5f   :  { %v5054_v6 = vmul.f32 -1.442695, %v4753_v54 }
 0xa60   :  { %6939 = vpow2.f32 %v5053_v15 }
 0xa61   :  { %6941 = vpow2.f32 %v5054_v6 }
 0xa62   :  { %6943 = vtanh.f32 %v4824_v61 }
 0xa63   :  { %6945 = vpow2.f32 %v5055_v8 }
 0xa6a   :  { %v6940_v23 = vpop.eup %6939 }
 0xa6b   :  { %v4835_v25 = vadd.f32 1.0, %v6940_v23  ;;  %v6942_v47 = vpop.eup %6941 }
 0xa6c   :  { %v4836_v42 = vadd.f32 1.0, %v6942_v47  ;;  %v6944_v37 = vpop.eup %6943 }
 0xa6d   :  { %6947 = vrcp.f32 %v4835_v25  ;;  %v6946_v31 = vpop.eup %6945 }
 0xa6e   :  { %6949 = vrcp.f32 %v4836_v42  ;;  %v4837_v9 = vadd.f32 1.0, %v6946_v31 }
 0xa70   :  { %6951 = vrcp.f32 %v4837_v9 }
 0xa77   :  { %v6948_v34 = vpop.eup %6947 }
 0xa78   :  { %v4846_v52 = vmul.f32 %v6948_v34, %v6944_v37  ;;  %v6950_v1 = vpop.eup %6949 }
 0xa79   :  { %v4845_v40 = vmul.f32 %v6950_v1, %v9020_v27 }
 0xa7a   :  { %v6952_v24 = vpop.eup %6951 }
 0xa7b   :  { %v4847_v19 = vadd.f32 %v4846_v52, %v4845_v40 }
 0xa7d   :  { %6953 = vtanh.f32 %v4847_v19  ;;  %4856 = vst [vmem:[#allocation13 + $0x2] sm:$0x3] %v4847_v19 }
 0xa87   :  { %v6954_v57 = vpop.eup %6953 }
 0xa88   :  { %v4849_v7 = vmul.f32 %v6954_v57, %v6952_v24 }
 0xa8a   :  { %4850 = vst [vmem:[#allocation2 + $0xe] sm:$0x3] %v4849_v7  ;;  %4853 = vst [vmem:[#allocation12 + $0x2] sm:$0x3] %v4849_v7 }
 0xa91   :  { %v4858_v51 = vld [vmem:[#allocation2 + $0x8] sm:$0xff] }
 0xa92   :  { %5108 = vmatmul.mubr.f32.vlgmr.msra.gmra.mrb[32].mxu0 %v4858_v51 }
 0xa93   :  { %7076 = shalt.err (!%p7073_p2)
}
 0xa94   :  { %s7077_s15 = scalar_lea.hbm %s9081_s11, 64 }
 0xa95   :  { %p7078_p3 = scmp.ne.s32.totalorder %s9081_s11, %s7077_s15  ;;  %p7081_p4 = scmp.lt.u32.totalorder %s7077_s15, %s9081_s11 }
 0xa97   :  { %p7083_p5 = pnand %p7081_p4, %p7078_p3 }
 0xa99   :  { %7086 = shalt.err (!%p7083_p5)
}
 0xa9a   :  { %s7131_s20 = smov 2   ;;  %s7087_s5 = scalar_lea.vmem %s4979_s26, 64 }
 0xa9b   :  { %4972 = dma.vmem_to_hbm [thread:$0]  %s4967_s13, 64, %s9081_s11, [#allocation5], %s7123_s24, %s7123_s24, %s7131_s20  }
 0xa9c   :  { %p7088_p6 = scmp.ne.s32.totalorder %s4979_s26, %s7087_s5  ;;  %p7092_p7 = scmp.lt.s32.totalorder %s4979_s26, %s4979_s26 }
 0xa9d   :  { %p7093_p8 = scmp.lt.s32.totalorder %s7087_s5, %s7087_s5 }
 0xa9f   :  { %p7094_p9 = por %p7093_p8, %p7092_p7 }
 0xaa1   :  { %p7095_p10 = pnand %p7094_p9, %p7088_p6 }
 0xaa3   :  { %7098 = shalt.err (!%p7095_p10)
}
 0xaa4   :  { %s7099_s0 = scalar_lea.hbm %s9082_s12, 64 }
 0xaa5   :  { %p7100_p11 = scmp.ne.s32.totalorder %s9082_s12, %s7099_s0  ;;  %p7103_p12 = scmp.lt.u32.totalorder %s7099_s0, %s9082_s12 }
 0xaa7   :  { %p7105_p13 = pnand %p7103_p12, %p7100_p11 }
 0xaa9   :  { %7108 = shalt.err (!%p7105_p13)
}
 0xaaa   :  { %4984 = dma.vmem_to_hbm [thread:$0]  %s4979_s26, 64, %s9082_s12, [#allocation14], %s7123_s24, %s7123_s24, %s7131_s20  }
 0xaab   :  { %v5056_v27 = vld [vmem:[%s9079_s9] ss:$0 sm:$0xff] }
 0xb65   :  { %v5109_v16 = vpop.f32.mrb[32].mxu0 }
 0xb66   :  { %v4954_v38 = vadd.f32 %v5109_v16, %v5056_v27  ;;  %v4948_v17 = vpop.f32.mrb[33].mxu0 }
 0xb67   :  { %v4949_v12 = vadd.f32 %v5056_v27, %v4948_v17 }
 0xb68   :  { %4958 = vst [vmem:[%s9080_s10 + $0x8] sm:$0xff] %v4954_v38 }
 0xb69   :  { %4957 = vst [vmem:[%s9080_s10] sm:$0xff] %v4949_v12 }
 0xb6a   :  { %7115 = dma.done.wait [#allocation5], 64  }
 0xb6b   :  { %7116 = vsyncadd [#allocation5], 4294967232 }
 0xb6c   :  { %7117 = dma.done.wait [#allocation14], 64  }
 0xb6d   :  { %7118 = vsyncadd [#allocation14], 4294967232 }
 0xb6e   :  { %4993 = vsyncpa [#allocation4], 1 }
 0xb6f   :  { %4994 = vsyncpa [#allocation7], 1 }
 0xb70   :  { %4995 = vsyncpa [#allocation10], 1 }
 0xb71   :  { %4996 = vsyncpa [#allocation5], 1 }
 0xb72   :  { %4997 = vsyncpa [#allocation14], 1 }

</bundles_post_ra>
